<compile_context>
chip_gen: v7x
topology: tpu7x:2x2x1
jax: 0.10.0
libtpu: 0.0.40
codegen_flags: <defaults>
</compile_context>

<pallas_src>
import numpy as np

import jax
import jax.numpy as jnp
from jax.experimental import pallas as pl
from jax.experimental.pallas import tpu as pltpu


# ----------------------------------------------------------------------------
# Model constants (pinned by fc1 = Linear(16*5*5, 120) -> 32x32 CIFAR-like input)
# ----------------------------------------------------------------------------
KS = 5                      # conv kernel size
IN_H = IN_W = 32            # input spatial size
C_IN, C_MID, C_OUT = 3, 6, 16
PH1, PW1 = 14, 14           # spatial size after conv1+pool
PH2, PW2 = 5, 5             # spatial size after conv2+pool
N_CLASSES = 10

MXU_DTYPE = jnp.bfloat16    # MXU input dtype (f32 accumulation); use jnp.float32 for exact f32


# ----------------------------------------------------------------------------
# Fused whole-network kernel (one grid step == one sample)
# ----------------------------------------------------------------------------
def _net_kernel(x_ref, w1_ref, b1_ref, w2_ref, b2_ref,
                fw1_ref, fb1_ref, fw2_ref, fb2_ref, fw3_ref, fb3_ref,
                o_ref):
    f32 = jnp.float32
    cdt = w1_ref.dtype          # MXU input dtype (bf16 or f32)

    def mm(a, w):
        return jnp.dot(a, w, preferred_element_type=f32)

    # ----------------- conv1 -> relu -> maxpool(2x2) -----------------
    # x_ref[0]: (4, 8, 96) with [p, r, :] == image row (4*r + p) in (w*C_IN + ci) lane layout.
    # xrows[s][q, :] == image row (4*q + s); s in [0, 8) covers all rows any pooled row needs.
    xrows = [x_ref[0, s % 4, pl.ds(s // 4, PH1 // 2), :].astype(cdt) for s in range(8)]

    pooled1 = []                # pooled1[par][q, pw*C_MID + c] == pool1 row (2*q + par)
    for par in (0, 1):
        corners = []
        for dh in (0, 1):
            for dw in (0, 1):
                acc = None
                for kh in range(KS):
                    t = mm(xrows[2 * par + dh + kh], w1_ref[kh, dw])    # (7, 84)
                    acc = t if acc is None else acc + t
                corners.append(acc)
        m = jnp.maximum(jnp.maximum(corners[0], corners[1]),
                        jnp.maximum(corners[2], corners[3]))
        pooled1.append(jnp.maximum(m + b1_ref[...], 0.0))               # (7, 84) f32

    # ----------------- conv2 -> relu -> maxpool(2x2) -----------------
    # rows2[s][ph2, :] == pool1 row (2*ph2 + s), s in [0, 6).
    rows2 = [pooled1[s % 2][s // 2: s // 2 + PH2, :].astype(cdt) for s in range(6)]
    corners = []
    for dh in (0, 1):
        for dw in (0, 1):
            acc = None
            for kh in range(KS):
                t = mm(rows2[dh + kh], w2_ref[kh, dw])                  # (5, 80)
                acc = t if acc is None else acc + t
            corners.append(acc)
    m = jnp.maximum(jnp.maximum(corners[0], corners[1]),
                    jnp.maximum(corners[2], corners[3]))
    pooled2 = jnp.maximum(m + b2_ref[...], 0.0)                         # (5, 80) f32

    # ----------------- fc1 -> relu -> fc2 -> relu -> fc3 -----------------
    p2 = pooled2.astype(cdt)
    h = None
    for r in range(PH2):
        t = mm(p2[r:r + 1, :], fw1_ref[r])                              # (1, 120)
        h = t if h is None else h + t
    h = jnp.maximum(h + fb1_ref[...], 0.0)
    h = jnp.maximum(mm(h.astype(cdt), fw2_ref[...]) + fb2_ref[...], 0.0)
    out = mm(h.astype(cdt), fw3_ref[...]) + fb3_ref[...]                # (1, 10) f32
    o_ref[0] = out


# ----------------------------------------------------------------------------
# One-time host-side parameter repacking (PyTorch layout -> kernel layout)
# ----------------------------------------------------------------------------
def init_params(key):
    """Deterministic synthetic parameters with PyTorch layer shapes/conventions."""
    ks = jax.random.split(key, 10)

    def u(k, shape, fan_in):
        bound = 1.0 / jnp.sqrt(float(fan_in))
        return jax.random.uniform(k, shape, jnp.float32, -bound, bound)

    return {
        "conv1_w": u(ks[0], (C_MID, C_IN, KS, KS), C_IN * KS * KS),
        "conv1_b": u(ks[1], (C_MID,), C_IN * KS * KS),
        "conv2_w": u(ks[2], (C_OUT, C_MID, KS, KS), C_MID * KS * KS),
        "conv2_b": u(ks[3], (C_OUT,), C_MID * KS * KS),
        "fc1_w": u(ks[4], (120, C_OUT * PH2 * PW2), 400),   # (out, in) like nn.Linear
        "fc1_b": u(ks[5], (120,), 400),
        "fc2_w": u(ks[6], (84, 120), 120),
        "fc2_b": u(ks[7], (84,), 120),
        "fc3_w": u(ks[8], (N_CLASSES, 84), 84),
        "fc3_b": u(ks[9], (N_CLASSES,), 84),
    }


def pack_params(params, mxu_dtype=MXU_DTYPE):
    f32 = np.float32

    def conv_toeplitz(W, in_w, out_pw):
        # W: (cout, cin, KS, KS).  m[kh, dw] maps an input row in (w*cin + ci) lane layout to a
        # pooled output row in (pw*cout + co) lane layout, for pool-window column corner dw.
        cout, cin, _, _ = W.shape
        m = np.zeros((KS, 2, in_w * cin, out_pw * cout), f32)
        for kh in range(KS):
            for dw in range(2):
                for kw in range(KS):
                    for pw in range(out_pw):
                        r0 = (2 * pw + dw + kw) * cin
                        c0 = pw * cout
                        m[kh, dw, r0:r0 + cin, c0:c0 + cout] = W[:, :, kh, kw].T
        return m

    m1 = conv_toeplitz(np.asarray(params["conv1_w"], f32), IN_W, PW1)   # (5, 2, 96, 84)
    m2 = conv_toeplitz(np.asarray(params["conv2_w"], f32), PW1, PW2)    # (5, 2, 84, 80)

    b1 = np.tile(np.asarray(params["conv1_b"], f32), PW1)[None, :]      # (1, 84)
    b2 = np.tile(np.asarray(params["conv2_b"], f32), PW2)[None, :]      # (1, 80)

    # fc1 consumes PyTorch's NCHW flatten order (c*25 + h*5 + w); permute rows once so the kernel
    # can consume the channels-last (h, w, c) activation directly.
    F1 = np.asarray(params["fc1_w"], f32)                               # (120, 400)
    fw1 = (F1.reshape(120, C_OUT, PH2, PW2)
             .transpose(2, 3, 1, 0)
             .reshape(PH2, PW2 * C_OUT, 120))                           # (5, 80, 120)
    fw2 = np.asarray(params["fc2_w"], f32).T                            # (120, 84)
    fw3 = np.asarray(params["fc3_w"], f32).T                            # (84, 10)

    j = jnp.asarray
    return {
        "w1": j(m1, mxu_dtype), "b1": j(b1, jnp.float32),
        "w2": j(m2, mxu_dtype), "b2": j(b2, jnp.float32),
        "fw1": j(fw1, mxu_dtype),
        "fb1": j(np.asarray(params["fc1_b"], f32)[None, :], jnp.float32),
        "fw2": j(fw2, mxu_dtype),
        "fb2": j(np.asarray(params["fc2_b"], f32)[None, :], jnp.float32),
        "fw3": j(fw3, mxu_dtype),
        "fb3": j(np.asarray(params["fc3_b"], f32)[None, :], jnp.float32),
    }


# ----------------------------------------------------------------------------
# Forward pass
# ----------------------------------------------------------------------------
def net_forward(packed, x_nchw):
    """x_nchw: (B, 3, 32, 32) float32 -> (B, 10) float32."""
    B = x_nchw.shape[0]
    # NCHW -> channels-last 2D layout (rows = height, lanes = width*channels), then regroup rows
    # by (row mod 4) so every conv+pool row access inside the kernel is a contiguous slice.
    x2d = jnp.transpose(x_nchw, (0, 2, 3, 1)).reshape(B, IN_H, IN_W * C_IN)
    x4 = x2d.reshape(B, IN_H // 4, 4, IN_W * C_IN).transpose(0, 2, 1, 3)   # (B, 4, 8, 96)

    zmap2 = lambda b: (0, 0)
    out = pl.pallas_call(
        _net_kernel,
        out_shape=jax.ShapeDtypeStruct((B, 1, N_CLASSES), jnp.float32),
        grid=(B,),
        in_specs=[
            pl.BlockSpec((1, 4, IN_H // 4, IN_W * C_IN), lambda b: (b, 0, 0, 0)),
            pl.BlockSpec(packed["w1"].shape, lambda b: (0, 0, 0, 0)),
            pl.BlockSpec(packed["b1"].shape, zmap2),
            pl.BlockSpec(packed["w2"].shape, lambda b: (0, 0, 0, 0)),
            pl.BlockSpec(packed["b2"].shape, zmap2),
            pl.BlockSpec(packed["fw1"].shape, lambda b: (0, 0, 0)),
            pl.BlockSpec(packed["fb1"].shape, zmap2),
            pl.BlockSpec(packed["fw2"].shape, zmap2),
            pl.BlockSpec(packed["fb2"].shape, zmap2),
            pl.BlockSpec(packed["fw3"].shape, zmap2),
            pl.BlockSpec(packed["fb3"].shape, zmap2),
        ],
        out_specs=pl.BlockSpec((1, 1, N_CLASSES), lambda b: (b, 0, 0)),
        compiler_params=pltpu.CompilerParams(
            dimension_semantics=("parallel",),        # shard samples across TCs (v7x megacore)
            vmem_limit_bytes=32 * 1024 * 1024,        # well under the 64 MiB v7x physical VMEM
        ),
    )(x4, packed["w1"], packed["b1"], packed["w2"], packed["b2"],
      packed["fw1"], packed["fb1"], packed["fw2"], packed["fb2"],
      packed["fw3"], packed["fb3"])
    return out.reshape(B, N_CLASSES)


# ----------------------------------------------------------------------------
# Pure-JAX/XLA reference (exact f32) for a numeric sanity check
# ----------------------------------------------------------------------------
def net_reference(params, x_nchw):
    hi = jax.lax.Precision.HIGHEST
    dn = ("NCHW", "OIHW", "NCHW")
    y = jax.lax.conv_general_dilated(x_nchw, params["conv1_w"], (1, 1), "VALID",
                                     dimension_numbers=dn, precision=hi)
    y = jax.nn.relu(y + params["conv1_b"][None, :, None, None])
    y = jax.lax.reduce_window(y, -jnp.inf, jax.lax.max, (1, 1, 2, 2), (1, 1, 2, 2), "VALID")
    y = jax.lax.conv_general_dilated(y, params["conv2_w"], (1, 1), "VALID",
                                     dimension_numbers=dn, precision=hi)
    y = jax.nn.relu(y + params["conv2_b"][None, :, None, None])
    y = jax.lax.reduce_window(y, -jnp.inf, jax.lax.max, (1, 1, 2, 2), (1, 1, 2, 2), "VALID")
    y = y.reshape(y.shape[0], -1)                         # NCHW flatten, matches x.view(-1, 400)
    y = jax.nn.relu(jnp.dot(y, params["fc1_w"].T, precision=hi) + params["fc1_b"])
    y = jax.nn.relu(jnp.dot(y, params["fc2_w"].T, precision=hi) + params["fc2_b"])
    return jnp.dot(y, params["fc3_w"].T, precision=hi) + params["fc3_b"]


if __name__ == "__main__":
    key = jax.random.PRNGKey(0)
    k_param, k_x = jax.random.split(key)
    params = init_params(k_param)
    packed = pack_params(params)

    # fc1 expects 16*5*5 features, which pins the spatial size to 32x32 (CIFAR-like input).
    x = jax.random.normal(k_x, (2, C_IN, IN_H, IN_W), jnp.float32)

    out = jax.jit(net_forward)(packed, x)
    out = jax.block_until_ready(out)
    assert out.shape == (2, N_CLASSES) and out.dtype == jnp.float32

    # Sanity check against the exact f32 XLA reference (tolerance covers bf16 MXU inputs).
    ref = jax.block_until_ready(jax.jit(net_reference)(params, x))
    np.testing.assert_allclose(np.asarray(out), np.asarray(ref), rtol=5e-2, atol=5e-2)

    print("KERNEL_OK")
</pallas_src>

<mosaic_0001>
module attributes {stable_mosaic.version = 11 : i64} {
  func.func @_net_kernel(%arg0: i32, %arg1: memref<1x4x8x96xf32, #tpu.memory_space<vmem>>, %arg2: memref<5x2x96x84xbf16, #tpu.memory_space<vmem>>, %arg3: memref<1x84xf32, #tpu.memory_space<vmem>>, %arg4: memref<5x2x84x80xbf16, #tpu.memory_space<vmem>>, %arg5: memref<1x80xf32, #tpu.memory_space<vmem>>, %arg6: memref<5x80x120xbf16, #tpu.memory_space<vmem>>, %arg7: memref<1x120xf32, #tpu.memory_space<vmem>>, %arg8: memref<120x84xbf16, #tpu.memory_space<vmem>>, %arg9: memref<1x84xf32, #tpu.memory_space<vmem>>, %arg10: memref<84x10xbf16, #tpu.memory_space<vmem>>, %arg11: memref<1x10xf32, #tpu.memory_space<vmem>>, %arg12: memref<1x1x10xf32, #tpu.memory_space<vmem>>) attributes {dimension_semantics = [#tpu.dimension_semantics<parallel>], iteration_bounds = array<i64: 2>, scalar_prefetch = 0 : i64, scratch_operands = 0 : i64, tpu.core_type = #tpu.core_type<tc>, window_params = [{transform_indices = @transform_0, window_bounds = array<i64: 1, 4, 8, 96>}, {pipeline_mode = #tpu.pipeline_mode<synchronous>, transform_indices = @transform_1, window_bounds = array<i64: 5, 2, 96, 84>}, {pipeline_mode = #tpu.pipeline_mode<synchronous>, transform_indices = @transform_2, window_bounds = array<i64: 1, 84>}, {pipeline_mode = #tpu.pipeline_mode<synchronous>, transform_indices = @transform_3, window_bounds = array<i64: 5, 2, 84, 80>}, {pipeline_mode = #tpu.pipeline_mode<synchronous>, transform_indices = @transform_4, window_bounds = array<i64: 1, 80>}, {pipeline_mode = #tpu.pipeline_mode<synchronous>, transform_indices = @transform_5, window_bounds = array<i64: 5, 80, 120>}, {pipeline_mode = #tpu.pipeline_mode<synchronous>, transform_indices = @transform_6, window_bounds = array<i64: 1, 120>}, {pipeline_mode = #tpu.pipeline_mode<synchronous>, transform_indices = @transform_7, window_bounds = array<i64: 120, 84>}, {pipeline_mode = #tpu.pipeline_mode<synchronous>, transform_indices = @transform_8, window_bounds = array<i64: 1, 84>}, {pipeline_mode = #tpu.pipeline_mode<synchronous>, transform_indices = @transform_9, window_bounds = array<i64: 84, 10>}, {pipeline_mode = #tpu.pipeline_mode<synchronous>, transform_indices = @transform_10, window_bounds = array<i64: 1, 10>}, {transform_indices = @transform_11, window_bounds = array<i64: 1, 1, 10>}]} {
    %c0 = arith.constant 0 : index
    %c0_0 = arith.constant 0 : index
    %c0_1 = arith.constant 0 : index
    %c0_2 = arith.constant 0 : index
    %0 = vector.load %arg1[%c0, %c0_0, %c0_1, %c0_2] : memref<1x4x8x96xf32, #tpu.memory_space<vmem>>, vector<1x1x7x96xf32>
    %1 = vector.shape_cast %0 : vector<1x1x7x96xf32> to vector<7x96xf32>
    %2 = arith.truncf %1 : vector<7x96xf32> to vector<7x96xbf16>
    %c0_3 = arith.constant 0 : index
    %c1 = arith.constant 1 : index
    %c0_4 = arith.constant 0 : index
    %c0_5 = arith.constant 0 : index
    %3 = vector.load %arg1[%c0_3, %c1, %c0_4, %c0_5] : memref<1x4x8x96xf32, #tpu.memory_space<vmem>>, vector<1x1x7x96xf32>
    %4 = vector.shape_cast %3 : vector<1x1x7x96xf32> to vector<7x96xf32>
    %5 = arith.truncf %4 : vector<7x96xf32> to vector<7x96xbf16>
    %c0_6 = arith.constant 0 : index
    %c2 = arith.constant 2 : index
    %c0_7 = arith.constant 0 : index
    %c0_8 = arith.constant 0 : index
    %6 = vector.load %arg1[%c0_6, %c2, %c0_7, %c0_8] : memref<1x4x8x96xf32, #tpu.memory_space<vmem>>, vector<1x1x7x96xf32>
    %7 = vector.shape_cast %6 : vector<1x1x7x96xf32> to vector<7x96xf32>
    %8 = arith.truncf %7 : vector<7x96xf32> to vector<7x96xbf16>
    %c0_9 = arith.constant 0 : index
    %c3 = arith.constant 3 : index
    %c0_10 = arith.constant 0 : index
    %c0_11 = arith.constant 0 : index
    %9 = vector.load %arg1[%c0_9, %c3, %c0_10, %c0_11] : memref<1x4x8x96xf32, #tpu.memory_space<vmem>>, vector<1x1x7x96xf32>
    %10 = vector.shape_cast %9 : vector<1x1x7x96xf32> to vector<7x96xf32>
    %11 = arith.truncf %10 : vector<7x96xf32> to vector<7x96xbf16>
    %c0_12 = arith.constant 0 : index
    %c0_13 = arith.constant 0 : index
    %c1_14 = arith.constant 1 : index
    %c0_15 = arith.constant 0 : index
    %12 = vector.load %arg1[%c0_12, %c0_13, %c1_14, %c0_15] : memref<1x4x8x96xf32, #tpu.memory_space<vmem>>, vector<1x1x7x96xf32>
    %13 = vector.shape_cast %12 : vector<1x1x7x96xf32> to vector<7x96xf32>
    %14 = arith.truncf %13 : vector<7x96xf32> to vector<7x96xbf16>
    %c0_16 = arith.constant 0 : index
    %c1_17 = arith.constant 1 : index
    %c1_18 = arith.constant 1 : index
    %c0_19 = arith.constant 0 : index
    %15 = vector.load %arg1[%c0_16, %c1_17, %c1_18, %c0_19] : memref<1x4x8x96xf32, #tpu.memory_space<vmem>>, vector<1x1x7x96xf32>
    %16 = vector.shape_cast %15 : vector<1x1x7x96xf32> to vector<7x96xf32>
    %17 = arith.truncf %16 : vector<7x96xf32> to vector<7x96xbf16>
    %c0_20 = arith.constant 0 : index
    %c2_21 = arith.constant 2 : index
    %c1_22 = arith.constant 1 : index
    %c0_23 = arith.constant 0 : index
    %18 = vector.load %arg1[%c0_20, %c2_21, %c1_22, %c0_23] : memref<1x4x8x96xf32, #tpu.memory_space<vmem>>, vector<1x1x7x96xf32>
    %19 = vector.shape_cast %18 : vector<1x1x7x96xf32> to vector<7x96xf32>
    %20 = arith.truncf %19 : vector<7x96xf32> to vector<7x96xbf16>
    %c0_24 = arith.constant 0 : index
    %c3_25 = arith.constant 3 : index
    %c1_26 = arith.constant 1 : index
    %c0_27 = arith.constant 0 : index
    %21 = vector.load %arg1[%c0_24, %c3_25, %c1_26, %c0_27] : memref<1x4x8x96xf32, #tpu.memory_space<vmem>>, vector<1x1x7x96xf32>
    %22 = vector.shape_cast %21 : vector<1x1x7x96xf32> to vector<7x96xf32>
    %23 = arith.truncf %22 : vector<7x96xf32> to vector<7x96xbf16>
    %c0_28 = arith.constant 0 : index
    %c0_29 = arith.constant 0 : index
    %c0_30 = arith.constant 0 : index
    %c0_31 = arith.constant 0 : index
    %24 = vector.load %arg2[%c0_28, %c0_29, %c0_30, %c0_31] : memref<5x2x96x84xbf16, #tpu.memory_space<vmem>>, vector<1x1x96x84xbf16>
    %25 = vector.shape_cast %24 : vector<1x1x96x84xbf16> to vector<96x84xbf16>
    %cst = arith.constant dense<0.000000e+00> : vector<7x84xf32>
    %26 = tpu.matmul %2, %25, %cst {dimension_numbers = #tpu.dot_dimension_numbers<[1], [0], [0], [1], [0, 0, 1, 1], [], []>} : vector<7x96xbf16>, vector<96x84xbf16>, vector<7x84xf32> -> vector<7x84xf32>
    %c1_32 = arith.constant 1 : index
    %c0_33 = arith.constant 0 : index
    %c0_34 = arith.constant 0 : index
    %c0_35 = arith.constant 0 : index
    %27 = vector.load %arg2[%c1_32, %c0_33, %c0_34, %c0_35] : memref<5x2x96x84xbf16, #tpu.memory_space<vmem>>, vector<1x1x96x84xbf16>
    %28 = vector.shape_cast %27 : vector<1x1x96x84xbf16> to vector<96x84xbf16>
    %cst_36 = arith.constant dense<0.000000e+00> : vector<7x84xf32>
    %29 = tpu.matmul %5, %28, %cst_36 {dimension_numbers = #tpu.dot_dimension_numbers<[1], [0], [0], [1], [0, 0, 1, 1], [], []>} : vector<7x96xbf16>, vector<96x84xbf16>, vector<7x84xf32> -> vector<7x84xf32>
    %30 = arith.addf %26, %29 : vector<7x84xf32>
    %c2_37 = arith.constant 2 : index
    %c0_38 = arith.constant 0 : index
    %c0_39 = arith.constant 0 : index
    %c0_40 = arith.constant 0 : index
    %31 = vector.load %arg2[%c2_37, %c0_38, %c0_39, %c0_40] : memref<5x2x96x84xbf16, #tpu.memory_space<vmem>>, vector<1x1x96x84xbf16>
    %32 = vector.shape_cast %31 : vector<1x1x96x84xbf16> to vector<96x84xbf16>
    %cst_41 = arith.constant dense<0.000000e+00> : vector<7x84xf32>
    %33 = tpu.matmul %8, %32, %cst_41 {dimension_numbers = #tpu.dot_dimension_numbers<[1], [0], [0], [1], [0, 0, 1, 1], [], []>} : vector<7x96xbf16>, vector<96x84xbf16>, vector<7x84xf32> -> vector<7x84xf32>
    %34 = arith.addf %30, %33 : vector<7x84xf32>
    %c3_42 = arith.constant 3 : index
    %c0_43 = arith.constant 0 : index
    %c0_44 = arith.constant 0 : index
    %c0_45 = arith.constant 0 : index
    %35 = vector.load %arg2[%c3_42, %c0_43, %c0_44, %c0_45] : memref<5x2x96x84xbf16, #tpu.memory_space<vmem>>, vector<1x1x96x84xbf16>
    %36 = vector.shape_cast %35 : vector<1x1x96x84xbf16> to vector<96x84xbf16>
    %cst_46 = arith.constant dense<0.000000e+00> : vector<7x84xf32>
    %37 = tpu.matmul %11, %36, %cst_46 {dimension_numbers = #tpu.dot_dimension_numbers<[1], [0], [0], [1], [0, 0, 1, 1], [], []>} : vector<7x96xbf16>, vector<96x84xbf16>, vector<7x84xf32> -> vector<7x84xf32>
    %38 = arith.addf %34, %37 : vector<7x84xf32>
    %c4 = arith.constant 4 : index
    %c0_47 = arith.constant 0 : index
    %c0_48 = arith.constant 0 : index
    %c0_49 = arith.constant 0 : index
    %39 = vector.load %arg2[%c4, %c0_47, %c0_48, %c0_49] : memref<5x2x96x84xbf16, #tpu.memory_space<vmem>>, vector<1x1x96x84xbf16>
    %40 = vector.shape_cast %39 : vector<1x1x96x84xbf16> to vector<96x84xbf16>
    %cst_50 = arith.constant dense<0.000000e+00> : vector<7x84xf32>
    %41 = tpu.matmul %14, %40, %cst_50 {dimension_numbers = #tpu.dot_dimension_numbers<[1], [0], [0], [1], [0, 0, 1, 1], [], []>} : vector<7x96xbf16>, vector<96x84xbf16>, vector<7x84xf32> -> vector<7x84xf32>
    %42 = arith.addf %38, %41 : vector<7x84xf32>
    %c0_51 = arith.constant 0 : index
    %c1_52 = arith.constant 1 : index
    %c0_53 = arith.constant 0 : index
    %c0_54 = arith.constant 0 : index
    %43 = vector.load %arg2[%c0_51, %c1_52, %c0_53, %c0_54] : memref<5x2x96x84xbf16, #tpu.memory_space<vmem>>, vector<1x1x96x84xbf16>
    %44 = vector.shape_cast %43 : vector<1x1x96x84xbf16> to vector<96x84xbf16>
    %cst_55 = arith.constant dense<0.000000e+00> : vector<7x84xf32>
    %45 = tpu.matmul %2, %44, %cst_55 {dimension_numbers = #tpu.dot_dimension_numbers<[1], [0], [0], [1], [0, 0, 1, 1], [], []>} : vector<7x96xbf16>, vector<96x84xbf16>, vector<7x84xf32> -> vector<7x84xf32>
    %c1_56 = arith.constant 1 : index
    %c1_57 = arith.constant 1 : index
    %c0_58 = arith.constant 0 : index
    %c0_59 = arith.constant 0 : index
    %46 = vector.load %arg2[%c1_56, %c1_57, %c0_58, %c0_59] : memref<5x2x96x84xbf16, #tpu.memory_space<vmem>>, vector<1x1x96x84xbf16>
    %47 = vector.shape_cast %46 : vector<1x1x96x84xbf16> to vector<96x84xbf16>
    %cst_60 = arith.constant dense<0.000000e+00> : vector<7x84xf32>
    %48 = tpu.matmul %5, %47, %cst_60 {dimension_numbers = #tpu.dot_dimension_numbers<[1], [0], [0], [1], [0, 0, 1, 1], [], []>} : vector<7x96xbf16>, vector<96x84xbf16>, vector<7x84xf32> -> vector<7x84xf32>
    %49 = arith.addf %45, %48 : vector<7x84xf32>
    %c2_61 = arith.constant 2 : index
    %c1_62 = arith.constant 1 : index
    %c0_63 = arith.constant 0 : index
    %c0_64 = arith.constant 0 : index
    %50 = vector.load %arg2[%c2_61, %c1_62, %c0_63, %c0_64] : memref<5x2x96x84xbf16, #tpu.memory_space<vmem>>, vector<1x1x96x84xbf16>
    %51 = vector.shape_cast %50 : vector<1x1x96x84xbf16> to vector<96x84xbf16>
    %cst_65 = arith.constant dense<0.000000e+00> : vector<7x84xf32>
    %52 = tpu.matmul %8, %51, %cst_65 {dimension_numbers = #tpu.dot_dimension_numbers<[1], [0], [0], [1], [0, 0, 1, 1], [], []>} : vector<7x96xbf16>, vector<96x84xbf16>, vector<7x84xf32> -> vector<7x84xf32>
    %53 = arith.addf %49, %52 : vector<7x84xf32>
    %c3_66 = arith.constant 3 : index
    %c1_67 = arith.constant 1 : index
    %c0_68 = arith.constant 0 : index
    %c0_69 = arith.constant 0 : index
    %54 = vector.load %arg2[%c3_66, %c1_67, %c0_68, %c0_69] : memref<5x2x96x84xbf16, #tpu.memory_space<vmem>>, vector<1x1x96x84xbf16>
    %55 = vector.shape_cast %54 : vector<1x1x96x84xbf16> to vector<96x84xbf16>
    %cst_70 = arith.constant dense<0.000000e+00> : vector<7x84xf32>
    %56 = tpu.matmul %11, %55, %cst_70 {dimension_numbers = #tpu.dot_dimension_numbers<[1], [0], [0], [1], [0, 0, 1, 1], [], []>} : vector<7x96xbf16>, vector<96x84xbf16>, vector<7x84xf32> -> vector<7x84xf32>
    %57 = arith.addf %53, %56 : vector<7x84xf32>
    %c4_71 = arith.constant 4 : index
    %c1_72 = arith.constant 1 : index
    %c0_73 = arith.constant 0 : index
    %c0_74 = arith.constant 0 : index
    %58 = vector.load %arg2[%c4_71, %c1_72, %c0_73, %c0_74] : memref<5x2x96x84xbf16, #tpu.memory_space<vmem>>, vector<1x1x96x84xbf16>
    %59 = vector.shape_cast %58 : vector<1x1x96x84xbf16> to vector<96x84xbf16>
    %cst_75 = arith.constant dense<0.000000e+00> : vector<7x84xf32>
    %60 = tpu.matmul %14, %59, %cst_75 {dimension_numbers = #tpu.dot_dimension_numbers<[1], [0], [0], [1], [0, 0, 1, 1], [], []>} : vector<7x96xbf16>, vector<96x84xbf16>, vector<7x84xf32> -> vector<7x84xf32>
    %61 = arith.addf %57, %60 : vector<7x84xf32>
    %c0_76 = arith.constant 0 : index
    %c0_77 = arith.constant 0 : index
    %c0_78 = arith.constant 0 : index
    %c0_79 = arith.constant 0 : index
    %62 = vector.load %arg2[%c0_76, %c0_77, %c0_78, %c0_79] : memref<5x2x96x84xbf16, #tpu.memory_space<vmem>>, vector<1x1x96x84xbf16>
    %63 = vector.shape_cast %62 : vector<1x1x96x84xbf16> to vector<96x84xbf16>
    %cst_80 = arith.constant dense<0.000000e+00> : vector<7x84xf32>
    %64 = tpu.matmul %5, %63, %cst_80 {dimension_numbers = #tpu.dot_dimension_numbers<[1], [0], [0], [1], [0, 0, 1, 1], [], []>} : vector<7x96xbf16>, vector<96x84xbf16>, vector<7x84xf32> -> vector<7x84xf32>
    %c1_81 = arith.constant 1 : index
    %c0_82 = arith.constant 0 : index
    %c0_83 = arith.constant 0 : index
    %c0_84 = arith.constant 0 : index
    %65 = vector.load %arg2[%c1_81, %c0_82, %c0_83, %c0_84] : memref<5x2x96x84xbf16, #tpu.memory_space<vmem>>, vector<1x1x96x84xbf16>
    %66 = vector.shape_cast %65 : vector<1x1x96x84xbf16> to vector<96x84xbf16>
    %cst_85 = arith.constant dense<0.000000e+00> : vector<7x84xf32>
    %67 = tpu.matmul %8, %66, %cst_85 {dimension_numbers = #tpu.dot_dimension_numbers<[1], [0], [0], [1], [0, 0, 1, 1], [], []>} : vector<7x96xbf16>, vector<96x84xbf16>, vector<7x84xf32> -> vector<7x84xf32>
    %68 = arith.addf %64, %67 : vector<7x84xf32>
    %c2_86 = arith.constant 2 : index
    %c0_87 = arith.constant 0 : index
    %c0_88 = arith.constant 0 : index
    %c0_89 = arith.constant 0 : index
    %69 = vector.load %arg2[%c2_86, %c0_87, %c0_88, %c0_89] : memref<5x2x96x84xbf16, #tpu.memory_space<vmem>>, vector<1x1x96x84xbf16>
    %70 = vector.shape_cast %69 : vector<1x1x96x84xbf16> to vector<96x84xbf16>
    %cst_90 = arith.constant dense<0.000000e+00> : vector<7x84xf32>
    %71 = tpu.matmul %11, %70, %cst_90 {dimension_numbers = #tpu.dot_dimension_numbers<[1], [0], [0], [1], [0, 0, 1, 1], [], []>} : vector<7x96xbf16>, vector<96x84xbf16>, vector<7x84xf32> -> vector<7x84xf32>
    %72 = arith.addf %68, %71 : vector<7x84xf32>
    %c3_91 = arith.constant 3 : index
    %c0_92 = arith.constant 0 : index
    %c0_93 = arith.constant 0 : index
    %c0_94 = arith.constant 0 : index
    %73 = vector.load %arg2[%c3_91, %c0_92, %c0_93, %c0_94] : memref<5x2x96x84xbf16, #tpu.memory_space<vmem>>, vector<1x1x96x84xbf16>
    %74 = vector.shape_cast %73 : vector<1x1x96x84xbf16> to vector<96x84xbf16>
    %cst_95 = arith.constant dense<0.000000e+00> : vector<7x84xf32>
    %75 = tpu.matmul %14, %74, %cst_95 {dimension_numbers = #tpu.dot_dimension_numbers<[1], [0], [0], [1], [0, 0, 1, 1], [], []>} : vector<7x96xbf16>, vector<96x84xbf16>, vector<7x84xf32> -> vector<7x84xf32>
    %76 = arith.addf %72, %75 : vector<7x84xf32>
    %c4_96 = arith.constant 4 : index
    %c0_97 = arith.constant 0 : index
    %c0_98 = arith.constant 0 : index
    %c0_99 = arith.constant 0 : index
    %77 = vector.load %arg2[%c4_96, %c0_97, %c0_98, %c0_99] : memref<5x2x96x84xbf16, #tpu.memory_space<vmem>>, vector<1x1x96x84xbf16>
    %78 = vector.shape_cast %77 : vector<1x1x96x84xbf16> to vector<96x84xbf16>
    %cst_100 = arith.constant dense<0.000000e+00> : vector<7x84xf32>
    %79 = tpu.matmul %17, %78, %cst_100 {dimension_numbers = #tpu.dot_dimension_numbers<[1], [0], [0], [1], [0, 0, 1, 1], [], []>} : vector<7x96xbf16>, vector<96x84xbf16>, vector<7x84xf32> -> vector<7x84xf32>
    %80 = arith.addf %76, %79 : vector<7x84xf32>
    %c0_101 = arith.constant 0 : index
    %c1_102 = arith.constant 1 : index
    %c0_103 = arith.constant 0 : index
    %c0_104 = arith.constant 0 : index
    %81 = vector.load %arg2[%c0_101, %c1_102, %c0_103, %c0_104] : memref<5x2x96x84xbf16, #tpu.memory_space<vmem>>, vector<1x1x96x84xbf16>
    %82 = vector.shape_cast %81 : vector<1x1x96x84xbf16> to vector<96x84xbf16>
    %cst_105 = arith.constant dense<0.000000e+00> : vector<7x84xf32>
    %83 = tpu.matmul %5, %82, %cst_105 {dimension_numbers = #tpu.dot_dimension_numbers<[1], [0], [0], [1], [0, 0, 1, 1], [], []>} : vector<7x96xbf16>, vector<96x84xbf16>, vector<7x84xf32> -> vector<7x84xf32>
    %c1_106 = arith.constant 1 : index
    %c1_107 = arith.constant 1 : index
    %c0_108 = arith.constant 0 : index
    %c0_109 = arith.constant 0 : index
    %84 = vector.load %arg2[%c1_106, %c1_107, %c0_108, %c0_109] : memref<5x2x96x84xbf16, #tpu.memory_space<vmem>>, vector<1x1x96x84xbf16>
    %85 = vector.shape_cast %84 : vector<1x1x96x84xbf16> to vector<96x84xbf16>
    %cst_110 = arith.constant dense<0.000000e+00> : vector<7x84xf32>
    %86 = tpu.matmul %8, %85, %cst_110 {dimension_numbers = #tpu.dot_dimension_numbers<[1], [0], [0], [1], [0, 0, 1, 1], [], []>} : vector<7x96xbf16>, vector<96x84xbf16>, vector<7x84xf32> -> vector<7x84xf32>
    %87 = arith.addf %83, %86 : vector<7x84xf32>
    %c2_111 = arith.constant 2 : index
    %c1_112 = arith.constant 1 : index
    %c0_113 = arith.constant 0 : index
    %c0_114 = arith.constant 0 : index
    %88 = vector.load %arg2[%c2_111, %c1_112, %c0_113, %c0_114] : memref<5x2x96x84xbf16, #tpu.memory_space<vmem>>, vector<1x1x96x84xbf16>
    %89 = vector.shape_cast %88 : vector<1x1x96x84xbf16> to vector<96x84xbf16>
    %cst_115 = arith.constant dense<0.000000e+00> : vector<7x84xf32>
    %90 = tpu.matmul %11, %89, %cst_115 {dimension_numbers = #tpu.dot_dimension_numbers<[1], [0], [0], [1], [0, 0, 1, 1], [], []>} : vector<7x96xbf16>, vector<96x84xbf16>, vector<7x84xf32> -> vector<7x84xf32>
    %91 = arith.addf %87, %90 : vector<7x84xf32>
    %c3_116 = arith.constant 3 : index
    %c1_117 = arith.constant 1 : index
    %c0_118 = arith.constant 0 : index
    %c0_119 = arith.constant 0 : index
    %92 = vector.load %arg2[%c3_116, %c1_117, %c0_118, %c0_119] : memref<5x2x96x84xbf16, #tpu.memory_space<vmem>>, vector<1x1x96x84xbf16>
    %93 = vector.shape_cast %92 : vector<1x1x96x84xbf16> to vector<96x84xbf16>
    %cst_120 = arith.constant dense<0.000000e+00> : vector<7x84xf32>
    %94 = tpu.matmul %14, %93, %cst_120 {dimension_numbers = #tpu.dot_dimension_numbers<[1], [0], [0], [1], [0, 0, 1, 1], [], []>} : vector<7x96xbf16>, vector<96x84xbf16>, vector<7x84xf32> -> vector<7x84xf32>
    %95 = arith.addf %91, %94 : vector<7x84xf32>
    %c4_121 = arith.constant 4 : index
    %c1_122 = arith.constant 1 : index
    %c0_123 = arith.constant 0 : index
    %c0_124 = arith.constant 0 : index
    %96 = vector.load %arg2[%c4_121, %c1_122, %c0_123, %c0_124] : memref<5x2x96x84xbf16, #tpu.memory_space<vmem>>, vector<1x1x96x84xbf16>
    %97 = vector.shape_cast %96 : vector<1x1x96x84xbf16> to vector<96x84xbf16>
    %cst_125 = arith.constant dense<0.000000e+00> : vector<7x84xf32>
    %98 = tpu.matmul %17, %97, %cst_125 {dimension_numbers = #tpu.dot_dimension_numbers<[1], [0], [0], [1], [0, 0, 1, 1], [], []>} : vector<7x96xbf16>, vector<96x84xbf16>, vector<7x84xf32> -> vector<7x84xf32>
    %99 = arith.addf %95, %98 : vector<7x84xf32>
    %100 = arith.maximumf %42, %61 : vector<7x84xf32>
    %101 = arith.maximumf %80, %99 : vector<7x84xf32>
    %102 = arith.maximumf %100, %101 : vector<7x84xf32>
    %c0_126 = arith.constant 0 : index
    %c0_127 = arith.constant 0 : index
    %103 = vector.load %arg3[%c0_126, %c0_127] : memref<1x84xf32, #tpu.memory_space<vmem>>, vector<1x84xf32>
    %104 = vector.broadcast %103 : vector<1x84xf32> to vector<7x84xf32>
    %105 = arith.addf %102, %104 : vector<7x84xf32>
    %cst_128 = arith.constant 0.000000e+00 : f32
    %106 = vector.broadcast %cst_128 : f32 to vector<7x84xf32>
    %107 = arith.maximumf %105, %106 : vector<7x84xf32>
    %c0_129 = arith.constant 0 : index
    %c0_130 = arith.constant 0 : index
    %c0_131 = arith.constant 0 : index
    %c0_132 = arith.constant 0 : index
    %108 = vector.load %arg2[%c0_129, %c0_130, %c0_131, %c0_132] : memref<5x2x96x84xbf16, #tpu.memory_space<vmem>>, vector<1x1x96x84xbf16>
    %109 = vector.shape_cast %108 : vector<1x1x96x84xbf16> to vector<96x84xbf16>
    %cst_133 = arith.constant dense<0.000000e+00> : vector<7x84xf32>
    %110 = tpu.matmul %8, %109, %cst_133 {dimension_numbers = #tpu.dot_dimension_numbers<[1], [0], [0], [1], [0, 0, 1, 1], [], []>} : vector<7x96xbf16>, vector<96x84xbf16>, vector<7x84xf32> -> vector<7x84xf32>
    %c1_134 = arith.constant 1 : index
    %c0_135 = arith.constant 0 : index
    %c0_136 = arith.constant 0 : index
    %c0_137 = arith.constant 0 : index
    %111 = vector.load %arg2[%c1_134, %c0_135, %c0_136, %c0_137] : memref<5x2x96x84xbf16, #tpu.memory_space<vmem>>, vector<1x1x96x84xbf16>
    %112 = vector.shape_cast %111 : vector<1x1x96x84xbf16> to vector<96x84xbf16>
    %cst_138 = arith.constant dense<0.000000e+00> : vector<7x84xf32>
    %113 = tpu.matmul %11, %112, %cst_138 {dimension_numbers = #tpu.dot_dimension_numbers<[1], [0], [0], [1], [0, 0, 1, 1], [], []>} : vector<7x96xbf16>, vector<96x84xbf16>, vector<7x84xf32> -> vector<7x84xf32>
    %114 = arith.addf %110, %113 : vector<7x84xf32>
    %c2_139 = arith.constant 2 : index
    %c0_140 = arith.constant 0 : index
    %c0_141 = arith.constant 0 : index
    %c0_142 = arith.constant 0 : index
    %115 = vector.load %arg2[%c2_139, %c0_140, %c0_141, %c0_142] : memref<5x2x96x84xbf16, #tpu.memory_space<vmem>>, vector<1x1x96x84xbf16>
    %116 = vector.shape_cast %115 : vector<1x1x96x84xbf16> to vector<96x84xbf16>
    %cst_143 = arith.constant dense<0.000000e+00> : vector<7x84xf32>
    %117 = tpu.matmul %14, %116, %cst_143 {dimension_numbers = #tpu.dot_dimension_numbers<[1], [0], [0], [1], [0, 0, 1, 1], [], []>} : vector<7x96xbf16>, vector<96x84xbf16>, vector<7x84xf32> -> vector<7x84xf32>
    %118 = arith.addf %114, %117 : vector<7x84xf32>
    %c3_144 = arith.constant 3 : index
    %c0_145 = arith.constant 0 : index
    %c0_146 = arith.constant 0 : index
    %c0_147 = arith.constant 0 : index
    %119 = vector.load %arg2[%c3_144, %c0_145, %c0_146, %c0_147] : memref<5x2x96x84xbf16, #tpu.memory_space<vmem>>, vector<1x1x96x84xbf16>
    %120 = vector.shape_cast %119 : vector<1x1x96x84xbf16> to vector<96x84xbf16>
    %cst_148 = arith.constant dense<0.000000e+00> : vector<7x84xf32>
    %121 = tpu.matmul %17, %120, %cst_148 {dimension_numbers = #tpu.dot_dimension_numbers<[1], [0], [0], [1], [0, 0, 1, 1], [], []>} : vector<7x96xbf16>, vector<96x84xbf16>, vector<7x84xf32> -> vector<7x84xf32>
    %122 = arith.addf %118, %121 : vector<7x84xf32>
    %c4_149 = arith.constant 4 : index
    %c0_150 = arith.constant 0 : index
    %c0_151 = arith.constant 0 : index
    %c0_152 = arith.constant 0 : index
    %123 = vector.load %arg2[%c4_149, %c0_150, %c0_151, %c0_152] : memref<5x2x96x84xbf16, #tpu.memory_space<vmem>>, vector<1x1x96x84xbf16>
    %124 = vector.shape_cast %123 : vector<1x1x96x84xbf16> to vector<96x84xbf16>
    %cst_153 = arith.constant dense<0.000000e+00> : vector<7x84xf32>
    %125 = tpu.matmul %20, %124, %cst_153 {dimension_numbers = #tpu.dot_dimension_numbers<[1], [0], [0], [1], [0, 0, 1, 1], [], []>} : vector<7x96xbf16>, vector<96x84xbf16>, vector<7x84xf32> -> vector<7x84xf32>
    %126 = arith.addf %122, %125 : vector<7x84xf32>
    %c0_154 = arith.constant 0 : index
    %c1_155 = arith.constant 1 : index
    %c0_156 = arith.constant 0 : index
    %c0_157 = arith.constant 0 : index
    %127 = vector.load %arg2[%c0_154, %c1_155, %c0_156, %c0_157] : memref<5x2x96x84xbf16, #tpu.memory_space<vmem>>, vector<1x1x96x84xbf16>
    %128 = vector.shape_cast %127 : vector<1x1x96x84xbf16> to vector<96x84xbf16>
    %cst_158 = arith.constant dense<0.000000e+00> : vector<7x84xf32>
    %129 = tpu.matmul %8, %128, %cst_158 {dimension_numbers = #tpu.dot_dimension_numbers<[1], [0], [0], [1], [0, 0, 1, 1], [], []>} : vector<7x96xbf16>, vector<96x84xbf16>, vector<7x84xf32> -> vector<7x84xf32>
    %c1_159 = arith.constant 1 : index
    %c1_160 = arith.constant 1 : index
    %c0_161 = arith.constant 0 : index
    %c0_162 = arith.constant 0 : index
    %130 = vector.load %arg2[%c1_159, %c1_160, %c0_161, %c0_162] : memref<5x2x96x84xbf16, #tpu.memory_space<vmem>>, vector<1x1x96x84xbf16>
    %131 = vector.shape_cast %130 : vector<1x1x96x84xbf16> to vector<96x84xbf16>
    %cst_163 = arith.constant dense<0.000000e+00> : vector<7x84xf32>
    %132 = tpu.matmul %11, %131, %cst_163 {dimension_numbers = #tpu.dot_dimension_numbers<[1], [0], [0], [1], [0, 0, 1, 1], [], []>} : vector<7x96xbf16>, vector<96x84xbf16>, vector<7x84xf32> -> vector<7x84xf32>
    %133 = arith.addf %129, %132 : vector<7x84xf32>
    %c2_164 = arith.constant 2 : index
    %c1_165 = arith.constant 1 : index
    %c0_166 = arith.constant 0 : index
    %c0_167 = arith.constant 0 : index
    %134 = vector.load %arg2[%c2_164, %c1_165, %c0_166, %c0_167] : memref<5x2x96x84xbf16, #tpu.memory_space<vmem>>, vector<1x1x96x84xbf16>
    %135 = vector.shape_cast %134 : vector<1x1x96x84xbf16> to vector<96x84xbf16>
    %cst_168 = arith.constant dense<0.000000e+00> : vector<7x84xf32>
    %136 = tpu.matmul %14, %135, %cst_168 {dimension_numbers = #tpu.dot_dimension_numbers<[1], [0], [0], [1], [0, 0, 1, 1], [], []>} : vector<7x96xbf16>, vector<96x84xbf16>, vector<7x84xf32> -> vector<7x84xf32>
    %137 = arith.addf %133, %136 : vector<7x84xf32>
    %c3_169 = arith.constant 3 : index
    %c1_170 = arith.constant 1 : index
    %c0_171 = arith.constant 0 : index
    %c0_172 = arith.constant 0 : index
    %138 = vector.load %arg2[%c3_169, %c1_170, %c0_171, %c0_172] : memref<5x2x96x84xbf16, #tpu.memory_space<vmem>>, vector<1x1x96x84xbf16>
    %139 = vector.shape_cast %138 : vector<1x1x96x84xbf16> to vector<96x84xbf16>
    %cst_173 = arith.constant dense<0.000000e+00> : vector<7x84xf32>
    %140 = tpu.matmul %17, %139, %cst_173 {dimension_numbers = #tpu.dot_dimension_numbers<[1], [0], [0], [1], [0, 0, 1, 1], [], []>} : vector<7x96xbf16>, vector<96x84xbf16>, vector<7x84xf32> -> vector<7x84xf32>
    %141 = arith.addf %137, %140 : vector<7x84xf32>
    %c4_174 = arith.constant 4 : index
    %c1_175 = arith.constant 1 : index
    %c0_176 = arith.constant 0 : index
    %c0_177 = arith.constant 0 : index
    %142 = vector.load %arg2[%c4_174, %c1_175, %c0_176, %c0_177] : memref<5x2x96x84xbf16, #tpu.memory_space<vmem>>, vector<1x1x96x84xbf16>
    %143 = vector.shape_cast %142 : vector<1x1x96x84xbf16> to vector<96x84xbf16>
    %cst_178 = arith.constant dense<0.000000e+00> : vector<7x84xf32>
    %144 = tpu.matmul %20, %143, %cst_178 {dimension_numbers = #tpu.dot_dimension_numbers<[1], [0], [0], [1], [0, 0, 1, 1], [], []>} : vector<7x96xbf16>, vector<96x84xbf16>, vector<7x84xf32> -> vector<7x84xf32>
    %145 = arith.addf %141, %144 : vector<7x84xf32>
    %c0_179 = arith.constant 0 : index
    %c0_180 = arith.constant 0 : index
    %c0_181 = arith.constant 0 : index
    %c0_182 = arith.constant 0 : index
    %146 = vector.load %arg2[%c0_179, %c0_180, %c0_181, %c0_182] : memref<5x2x96x84xbf16, #tpu.memory_space<vmem>>, vector<1x1x96x84xbf16>
    %147 = vector.shape_cast %146 : vector<1x1x96x84xbf16> to vector<96x84xbf16>
    %cst_183 = arith.constant dense<0.000000e+00> : vector<7x84xf32>
    %148 = tpu.matmul %11, %147, %cst_183 {dimension_numbers = #tpu.dot_dimension_numbers<[1], [0], [0], [1], [0, 0, 1, 1], [], []>} : vector<7x96xbf16>, vector<96x84xbf16>, vector<7x84xf32> -> vector<7x84xf32>
    %c1_184 = arith.constant 1 : index
    %c0_185 = arith.constant 0 : index
    %c0_186 = arith.constant 0 : index
    %c0_187 = arith.constant 0 : index
    %149 = vector.load %arg2[%c1_184, %c0_185, %c0_186, %c0_187] : memref<5x2x96x84xbf16, #tpu.memory_space<vmem>>, vector<1x1x96x84xbf16>
    %150 = vector.shape_cast %149 : vector<1x1x96x84xbf16> to vector<96x84xbf16>
    %cst_188 = arith.constant dense<0.000000e+00> : vector<7x84xf32>
    %151 = tpu.matmul %14, %150, %cst_188 {dimension_numbers = #tpu.dot_dimension_numbers<[1], [0], [0], [1], [0, 0, 1, 1], [], []>} : vector<7x96xbf16>, vector<96x84xbf16>, vector<7x84xf32> -> vector<7x84xf32>
    %152 = arith.addf %148, %151 : vector<7x84xf32>
    %c2_189 = arith.constant 2 : index
    %c0_190 = arith.constant 0 : index
    %c0_191 = arith.constant 0 : index
    %c0_192 = arith.constant 0 : index
    %153 = vector.load %arg2[%c2_189, %c0_190, %c0_191, %c0_192] : memref<5x2x96x84xbf16, #tpu.memory_space<vmem>>, vector<1x1x96x84xbf16>
    %154 = vector.shape_cast %153 : vector<1x1x96x84xbf16> to vector<96x84xbf16>
    %cst_193 = arith.constant dense<0.000000e+00> : vector<7x84xf32>
    %155 = tpu.matmul %17, %154, %cst_193 {dimension_numbers = #tpu.dot_dimension_numbers<[1], [0], [0], [1], [0, 0, 1, 1], [], []>} : vector<7x96xbf16>, vector<96x84xbf16>, vector<7x84xf32> -> vector<7x84xf32>
    %156 = arith.addf %152, %155 : vector<7x84xf32>
    %c3_194 = arith.constant 3 : index
    %c0_195 = arith.constant 0 : index
    %c0_196 = arith.constant 0 : index
    %c0_197 = arith.constant 0 : index
    %157 = vector.load %arg2[%c3_194, %c0_195, %c0_196, %c0_197] : memref<5x2x96x84xbf16, #tpu.memory_space<vmem>>, vector<1x1x96x84xbf16>
    %158 = vector.shape_cast %157 : vector<1x1x96x84xbf16> to vector<96x84xbf16>
    %cst_198 = arith.constant dense<0.000000e+00> : vector<7x84xf32>
    %159 = tpu.matmul %20, %158, %cst_198 {dimension_numbers = #tpu.dot_dimension_numbers<[1], [0], [0], [1], [0, 0, 1, 1], [], []>} : vector<7x96xbf16>, vector<96x84xbf16>, vector<7x84xf32> -> vector<7x84xf32>
    %160 = arith.addf %156, %159 : vector<7x84xf32>
    %c4_199 = arith.constant 4 : index
    %c0_200 = arith.constant 0 : index
    %c0_201 = arith.constant 0 : index
    %c0_202 = arith.constant 0 : index
    %161 = vector.load %arg2[%c4_199, %c0_200, %c0_201, %c0_202] : memref<5x2x96x84xbf16, #tpu.memory_space<vmem>>, vector<1x1x96x84xbf16>
    %162 = vector.shape_cast %161 : vector<1x1x96x84xbf16> to vector<96x84xbf16>
    %cst_203 = arith.constant dense<0.000000e+00> : vector<7x84xf32>
    %163 = tpu.matmul %23, %162, %cst_203 {dimension_numbers = #tpu.dot_dimension_numbers<[1], [0], [0], [1], [0, 0, 1, 1], [], []>} : vector<7x96xbf16>, vector<96x84xbf16>, vector<7x84xf32> -> vector<7x84xf32>
    %164 = arith.addf %160, %163 : vector<7x84xf32>
    %c0_204 = arith.constant 0 : index
    %c1_205 = arith.constant 1 : index
    %c0_206 = arith.constant 0 : index
    %c0_207 = arith.constant 0 : index
    %165 = vector.load %arg2[%c0_204, %c1_205, %c0_206, %c0_207] : memref<5x2x96x84xbf16, #tpu.memory_space<vmem>>, vector<1x1x96x84xbf16>
    %166 = vector.shape_cast %165 : vector<1x1x96x84xbf16> to vector<96x84xbf16>
    %cst_208 = arith.constant dense<0.000000e+00> : vector<7x84xf32>
    %167 = tpu.matmul %11, %166, %cst_208 {dimension_numbers = #tpu.dot_dimension_numbers<[1], [0], [0], [1], [0, 0, 1, 1], [], []>} : vector<7x96xbf16>, vector<96x84xbf16>, vector<7x84xf32> -> vector<7x84xf32>
    %c1_209 = arith.constant 1 : index
    %c1_210 = arith.constant 1 : index
    %c0_211 = arith.constant 0 : index
    %c0_212 = arith.constant 0 : index
    %168 = vector.load %arg2[%c1_209, %c1_210, %c0_211, %c0_212] : memref<5x2x96x84xbf16, #tpu.memory_space<vmem>>, vector<1x1x96x84xbf16>
    %169 = vector.shape_cast %168 : vector<1x1x96x84xbf16> to vector<96x84xbf16>
    %cst_213 = arith.constant dense<0.000000e+00> : vector<7x84xf32>
    %170 = tpu.matmul %14, %169, %cst_213 {dimension_numbers = #tpu.dot_dimension_numbers<[1], [0], [0], [1], [0, 0, 1, 1], [], []>} : vector<7x96xbf16>, vector<96x84xbf16>, vector<7x84xf32> -> vector<7x84xf32>
    %171 = arith.addf %167, %170 : vector<7x84xf32>
    %c2_214 = arith.constant 2 : index
    %c1_215 = arith.constant 1 : index
    %c0_216 = arith.constant 0 : index
    %c0_217 = arith.constant 0 : index
    %172 = vector.load %arg2[%c2_214, %c1_215, %c0_216, %c0_217] : memref<5x2x96x84xbf16, #tpu.memory_space<vmem>>, vector<1x1x96x84xbf16>
    %173 = vector.shape_cast %172 : vector<1x1x96x84xbf16> to vector<96x84xbf16>
    %cst_218 = arith.constant dense<0.000000e+00> : vector<7x84xf32>
    %174 = tpu.matmul %17, %173, %cst_218 {dimension_numbers = #tpu.dot_dimension_numbers<[1], [0], [0], [1], [0, 0, 1, 1], [], []>} : vector<7x96xbf16>, vector<96x84xbf16>, vector<7x84xf32> -> vector<7x84xf32>
    %175 = arith.addf %171, %174 : vector<7x84xf32>
    %c3_219 = arith.constant 3 : index
    %c1_220 = arith.constant 1 : index
    %c0_221 = arith.constant 0 : index
    %c0_222 = arith.constant 0 : index
    %176 = vector.load %arg2[%c3_219, %c1_220, %c0_221, %c0_222] : memref<5x2x96x84xbf16, #tpu.memory_space<vmem>>, vector<1x1x96x84xbf16>
    %177 = vector.shape_cast %176 : vector<1x1x96x84xbf16> to vector<96x84xbf16>
    %cst_223 = arith.constant dense<0.000000e+00> : vector<7x84xf32>
    %178 = tpu.matmul %20, %177, %cst_223 {dimension_numbers = #tpu.dot_dimension_numbers<[1], [0], [0], [1], [0, 0, 1, 1], [], []>} : vector<7x96xbf16>, vector<96x84xbf16>, vector<7x84xf32> -> vector<7x84xf32>
    %179 = arith.addf %175, %178 : vector<7x84xf32>
    %c4_224 = arith.constant 4 : index
    %c1_225 = arith.constant 1 : index
    %c0_226 = arith.constant 0 : index
    %c0_227 = arith.constant 0 : index
    %180 = vector.load %arg2[%c4_224, %c1_225, %c0_226, %c0_227] : memref<5x2x96x84xbf16, #tpu.memory_space<vmem>>, vector<1x1x96x84xbf16>
    %181 = vector.shape_cast %180 : vector<1x1x96x84xbf16> to vector<96x84xbf16>
    %cst_228 = arith.constant dense<0.000000e+00> : vector<7x84xf32>
    %182 = tpu.matmul %23, %181, %cst_228 {dimension_numbers = #tpu.dot_dimension_numbers<[1], [0], [0], [1], [0, 0, 1, 1], [], []>} : vector<7x96xbf16>, vector<96x84xbf16>, vector<7x84xf32> -> vector<7x84xf32>
    %183 = arith.addf %179, %182 : vector<7x84xf32>
    %184 = arith.maximumf %126, %145 : vector<7x84xf32>
    %185 = arith.maximumf %164, %183 : vector<7x84xf32>
    %186 = arith.maximumf %184, %185 : vector<7x84xf32>
    %c0_229 = arith.constant 0 : index
    %c0_230 = arith.constant 0 : index
    %187 = vector.load %arg3[%c0_229, %c0_230] : memref<1x84xf32, #tpu.memory_space<vmem>>, vector<1x84xf32>
    %188 = vector.broadcast %187 : vector<1x84xf32> to vector<7x84xf32>
    %189 = arith.addf %186, %188 : vector<7x84xf32>
    %cst_231 = arith.constant 0.000000e+00 : f32
    %190 = vector.broadcast %cst_231 : f32 to vector<7x84xf32>
    %191 = arith.maximumf %189, %190 : vector<7x84xf32>
    %192 = vector.extract_strided_slice %107 {offsets = [0, 0], sizes = [5, 84], strides = [1, 1]} : vector<7x84xf32> to vector<5x84xf32>
    %193 = arith.truncf %192 : vector<5x84xf32> to vector<5x84xbf16>
    %194 = vector.extract_strided_slice %191 {offsets = [0, 0], sizes = [5, 84], strides = [1, 1]} : vector<7x84xf32> to vector<5x84xf32>
    %195 = arith.truncf %194 : vector<5x84xf32> to vector<5x84xbf16>
    %196 = vector.extract_strided_slice %107 {offsets = [1, 0], sizes = [5, 84], strides = [1, 1]} : vector<7x84xf32> to vector<5x84xf32>
    %197 = arith.truncf %196 : vector<5x84xf32> to vector<5x84xbf16>
    %198 = vector.extract_strided_slice %191 {offsets = [1, 0], sizes = [5, 84], strides = [1, 1]} : vector<7x84xf32> to vector<5x84xf32>
    %199 = arith.truncf %198 : vector<5x84xf32> to vector<5x84xbf16>
    %200 = vector.extract_strided_slice %107 {offsets = [2, 0], sizes = [5, 84], strides = [1, 1]} : vector<7x84xf32> to vector<5x84xf32>
    %201 = arith.truncf %200 : vector<5x84xf32> to vector<5x84xbf16>
    %202 = vector.extract_strided_slice %191 {offsets = [2, 0], sizes = [5, 84], strides = [1, 1]} : vector<7x84xf32> to vector<5x84xf32>
    %203 = arith.truncf %202 : vector<5x84xf32> to vector<5x84xbf16>
    %c0_232 = arith.constant 0 : index
    %c0_233 = arith.constant 0 : index
    %c0_234 = arith.constant 0 : index
    %c0_235 = arith.constant 0 : index
    %204 = vector.load %arg4[%c0_232, %c0_233, %c0_234, %c0_235] : memref<5x2x84x80xbf16, #tpu.memory_space<vmem>>, vector<1x1x84x80xbf16>
    %205 = vector.shape_cast %204 : vector<1x1x84x80xbf16> to vector<84x80xbf16>
    %cst_236 = arith.constant dense<0.000000e+00> : vector<5x80xf32>
    %206 = tpu.matmul %193, %205, %cst_236 {dimension_numbers = #tpu.dot_dimension_numbers<[1], [0], [0], [1], [0, 0, 1, 1], [], []>} : vector<5x84xbf16>, vector<84x80xbf16>, vector<5x80xf32> -> vector<5x80xf32>
    %c1_237 = arith.constant 1 : index
    %c0_238 = arith.constant 0 : index
    %c0_239 = arith.constant 0 : index
    %c0_240 = arith.constant 0 : index
    %207 = vector.load %arg4[%c1_237, %c0_238, %c0_239, %c0_240] : memref<5x2x84x80xbf16, #tpu.memory_space<vmem>>, vector<1x1x84x80xbf16>
    %208 = vector.shape_cast %207 : vector<1x1x84x80xbf16> to vector<84x80xbf16>
    %cst_241 = arith.constant dense<0.000000e+00> : vector<5x80xf32>
    %209 = tpu.matmul %195, %208, %cst_241 {dimension_numbers = #tpu.dot_dimension_numbers<[1], [0], [0], [1], [0, 0, 1, 1], [], []>} : vector<5x84xbf16>, vector<84x80xbf16>, vector<5x80xf32> -> vector<5x80xf32>
    %210 = arith.addf %206, %209 : vector<5x80xf32>
    %c2_242 = arith.constant 2 : index
    %c0_243 = arith.constant 0 : index
    %c0_244 = arith.constant 0 : index
    %c0_245 = arith.constant 0 : index
    %211 = vector.load %arg4[%c2_242, %c0_243, %c0_244, %c0_245] : memref<5x2x84x80xbf16, #tpu.memory_space<vmem>>, vector<1x1x84x80xbf16>
    %212 = vector.shape_cast %211 : vector<1x1x84x80xbf16> to vector<84x80xbf16>
    %cst_246 = arith.constant dense<0.000000e+00> : vector<5x80xf32>
    %213 = tpu.matmul %197, %212, %cst_246 {dimension_numbers = #tpu.dot_dimension_numbers<[1], [0], [0], [1], [0, 0, 1, 1], [], []>} : vector<5x84xbf16>, vector<84x80xbf16>, vector<5x80xf32> -> vector<5x80xf32>
    %214 = arith.addf %210, %213 : vector<5x80xf32>
    %c3_247 = arith.constant 3 : index
    %c0_248 = arith.constant 0 : index
    %c0_249 = arith.constant 0 : index
    %c0_250 = arith.constant 0 : index
    %215 = vector.load %arg4[%c3_247, %c0_248, %c0_249, %c0_250] : memref<5x2x84x80xbf16, #tpu.memory_space<vmem>>, vector<1x1x84x80xbf16>
    %216 = vector.shape_cast %215 : vector<1x1x84x80xbf16> to vector<84x80xbf16>
    %cst_251 = arith.constant dense<0.000000e+00> : vector<5x80xf32>
    %217 = tpu.matmul %199, %216, %cst_251 {dimension_numbers = #tpu.dot_dimension_numbers<[1], [0], [0], [1], [0, 0, 1, 1], [], []>} : vector<5x84xbf16>, vector<84x80xbf16>, vector<5x80xf32> -> vector<5x80xf32>
    %218 = arith.addf %214, %217 : vector<5x80xf32>
    %c4_252 = arith.constant 4 : index
    %c0_253 = arith.constant 0 : index
    %c0_254 = arith.constant 0 : index
    %c0_255 = arith.constant 0 : index
    %219 = vector.load %arg4[%c4_252, %c0_253, %c0_254, %c0_255] : memref<5x2x84x80xbf16, #tpu.memory_space<vmem>>, vector<1x1x84x80xbf16>
    %220 = vector.shape_cast %219 : vector<1x1x84x80xbf16> to vector<84x80xbf16>
    %cst_256 = arith.constant dense<0.000000e+00> : vector<5x80xf32>
    %221 = tpu.matmul %201, %220, %cst_256 {dimension_numbers = #tpu.dot_dimension_numbers<[1], [0], [0], [1], [0, 0, 1, 1], [], []>} : vector<5x84xbf16>, vector<84x80xbf16>, vector<5x80xf32> -> vector<5x80xf32>
    %222 = arith.addf %218, %221 : vector<5x80xf32>
    %c0_257 = arith.constant 0 : index
    %c1_258 = arith.constant 1 : index
    %c0_259 = arith.constant 0 : index
    %c0_260 = arith.constant 0 : index
    %223 = vector.load %arg4[%c0_257, %c1_258, %c0_259, %c0_260] : memref<5x2x84x80xbf16, #tpu.memory_space<vmem>>, vector<1x1x84x80xbf16>
    %224 = vector.shape_cast %223 : vector<1x1x84x80xbf16> to vector<84x80xbf16>
    %cst_261 = arith.constant dense<0.000000e+00> : vector<5x80xf32>
    %225 = tpu.matmul %193, %224, %cst_261 {dimension_numbers = #tpu.dot_dimension_numbers<[1], [0], [0], [1], [0, 0, 1, 1], [], []>} : vector<5x84xbf16>, vector<84x80xbf16>, vector<5x80xf32> -> vector<5x80xf32>
    %c1_262 = arith.constant 1 : index
    %c1_263 = arith.constant 1 : index
    %c0_264 = arith.constant 0 : index
    %c0_265 = arith.constant 0 : index
    %226 = vector.load %arg4[%c1_262, %c1_263, %c0_264, %c0_265] : memref<5x2x84x80xbf16, #tpu.memory_space<vmem>>, vector<1x1x84x80xbf16>
    %227 = vector.shape_cast %226 : vector<1x1x84x80xbf16> to vector<84x80xbf16>
    %cst_266 = arith.constant dense<0.000000e+00> : vector<5x80xf32>
    %228 = tpu.matmul %195, %227, %cst_266 {dimension_numbers = #tpu.dot_dimension_numbers<[1], [0], [0], [1], [0, 0, 1, 1], [], []>} : vector<5x84xbf16>, vector<84x80xbf16>, vector<5x80xf32> -> vector<5x80xf32>
    %229 = arith.addf %225, %228 : vector<5x80xf32>
    %c2_267 = arith.constant 2 : index
    %c1_268 = arith.constant 1 : index
    %c0_269 = arith.constant 0 : index
    %c0_270 = arith.constant 0 : index
    %230 = vector.load %arg4[%c2_267, %c1_268, %c0_269, %c0_270] : memref<5x2x84x80xbf16, #tpu.memory_space<vmem>>, vector<1x1x84x80xbf16>
    %231 = vector.shape_cast %230 : vector<1x1x84x80xbf16> to vector<84x80xbf16>
    %cst_271 = arith.constant dense<0.000000e+00> : vector<5x80xf32>
    %232 = tpu.matmul %197, %231, %cst_271 {dimension_numbers = #tpu.dot_dimension_numbers<[1], [0], [0], [1], [0, 0, 1, 1], [], []>} : vector<5x84xbf16>, vector<84x80xbf16>, vector<5x80xf32> -> vector<5x80xf32>
    %233 = arith.addf %229, %232 : vector<5x80xf32>
    %c3_272 = arith.constant 3 : index
    %c1_273 = arith.constant 1 : index
    %c0_274 = arith.constant 0 : index
    %c0_275 = arith.constant 0 : index
    %234 = vector.load %arg4[%c3_272, %c1_273, %c0_274, %c0_275] : memref<5x2x84x80xbf16, #tpu.memory_space<vmem>>, vector<1x1x84x80xbf16>
    %235 = vector.shape_cast %234 : vector<1x1x84x80xbf16> to vector<84x80xbf16>
    %cst_276 = arith.constant dense<0.000000e+00> : vector<5x80xf32>
    %236 = tpu.matmul %199, %235, %cst_276 {dimension_numbers = #tpu.dot_dimension_numbers<[1], [0], [0], [1], [0, 0, 1, 1], [], []>} : vector<5x84xbf16>, vector<84x80xbf16>, vector<5x80xf32> -> vector<5x80xf32>
    %237 = arith.addf %233, %236 : vector<5x80xf32>
    %c4_277 = arith.constant 4 : index
    %c1_278 = arith.constant 1 : index
    %c0_279 = arith.constant 0 : index
    %c0_280 = arith.constant 0 : index
    %238 = vector.load %arg4[%c4_277, %c1_278, %c0_279, %c0_280] : memref<5x2x84x80xbf16, #tpu.memory_space<vmem>>, vector<1x1x84x80xbf16>
    %239 = vector.shape_cast %238 : vector<1x1x84x80xbf16> to vector<84x80xbf16>
    %cst_281 = arith.constant dense<0.000000e+00> : vector<5x80xf32>
    %240 = tpu.matmul %201, %239, %cst_281 {dimension_numbers = #tpu.dot_dimension_numbers<[1], [0], [0], [1], [0, 0, 1, 1], [], []>} : vector<5x84xbf16>, vector<84x80xbf16>, vector<5x80xf32> -> vector<5x80xf32>
    %241 = arith.addf %237, %240 : vector<5x80xf32>
    %c0_282 = arith.constant 0 : index
    %c0_283 = arith.constant 0 : index
    %c0_284 = arith.constant 0 : index
    %c0_285 = arith.constant 0 : index
    %242 = vector.load %arg4[%c0_282, %c0_283, %c0_284, %c0_285] : memref<5x2x84x80xbf16, #tpu.memory_space<vmem>>, vector<1x1x84x80xbf16>
    %243 = vector.shape_cast %242 : vector<1x1x84x80xbf16> to vector<84x80xbf16>
    %cst_286 = arith.constant dense<0.000000e+00> : vector<5x80xf32>
    %244 = tpu.matmul %195, %243, %cst_286 {dimension_numbers = #tpu.dot_dimension_numbers<[1], [0], [0], [1], [0, 0, 1, 1], [], []>} : vector<5x84xbf16>, vector<84x80xbf16>, vector<5x80xf32> -> vector<5x80xf32>
    %c1_287 = arith.constant 1 : index
    %c0_288 = arith.constant 0 : index
    %c0_289 = arith.constant 0 : index
    %c0_290 = arith.constant 0 : index
    %245 = vector.load %arg4[%c1_287, %c0_288, %c0_289, %c0_290] : memref<5x2x84x80xbf16, #tpu.memory_space<vmem>>, vector<1x1x84x80xbf16>
    %246 = vector.shape_cast %245 : vector<1x1x84x80xbf16> to vector<84x80xbf16>
    %cst_291 = arith.constant dense<0.000000e+00> : vector<5x80xf32>
    %247 = tpu.matmul %197, %246, %cst_291 {dimension_numbers = #tpu.dot_dimension_numbers<[1], [0], [0], [1], [0, 0, 1, 1], [], []>} : vector<5x84xbf16>, vector<84x80xbf16>, vector<5x80xf32> -> vector<5x80xf32>
    %248 = arith.addf %244, %247 : vector<5x80xf32>
    %c2_292 = arith.constant 2 : index
    %c0_293 = arith.constant 0 : index
    %c0_294 = arith.constant 0 : index
    %c0_295 = arith.constant 0 : index
    %249 = vector.load %arg4[%c2_292, %c0_293, %c0_294, %c0_295] : memref<5x2x84x80xbf16, #tpu.memory_space<vmem>>, vector<1x1x84x80xbf16>
    %250 = vector.shape_cast %249 : vector<1x1x84x80xbf16> to vector<84x80xbf16>
    %cst_296 = arith.constant dense<0.000000e+00> : vector<5x80xf32>
    %251 = tpu.matmul %199, %250, %cst_296 {dimension_numbers = #tpu.dot_dimension_numbers<[1], [0], [0], [1], [0, 0, 1, 1], [], []>} : vector<5x84xbf16>, vector<84x80xbf16>, vector<5x80xf32> -> vector<5x80xf32>
    %252 = arith.addf %248, %251 : vector<5x80xf32>
    %c3_297 = arith.constant 3 : index
    %c0_298 = arith.constant 0 : index
    %c0_299 = arith.constant 0 : index
    %c0_300 = arith.constant 0 : index
    %253 = vector.load %arg4[%c3_297, %c0_298, %c0_299, %c0_300] : memref<5x2x84x80xbf16, #tpu.memory_space<vmem>>, vector<1x1x84x80xbf16>
    %254 = vector.shape_cast %253 : vector<1x1x84x80xbf16> to vector<84x80xbf16>
    %cst_301 = arith.constant dense<0.000000e+00> : vector<5x80xf32>
    %255 = tpu.matmul %201, %254, %cst_301 {dimension_numbers = #tpu.dot_dimension_numbers<[1], [0], [0], [1], [0, 0, 1, 1], [], []>} : vector<5x84xbf16>, vector<84x80xbf16>, vector<5x80xf32> -> vector<5x80xf32>
    %256 = arith.addf %252, %255 : vector<5x80xf32>
    %c4_302 = arith.constant 4 : index
    %c0_303 = arith.constant 0 : index
    %c0_304 = arith.constant 0 : index
    %c0_305 = arith.constant 0 : index
    %257 = vector.load %arg4[%c4_302, %c0_303, %c0_304, %c0_305] : memref<5x2x84x80xbf16, #tpu.memory_space<vmem>>, vector<1x1x84x80xbf16>
    %258 = vector.shape_cast %257 : vector<1x1x84x80xbf16> to vector<84x80xbf16>
    %cst_306 = arith.constant dense<0.000000e+00> : vector<5x80xf32>
    %259 = tpu.matmul %203, %258, %cst_306 {dimension_numbers = #tpu.dot_dimension_numbers<[1], [0], [0], [1], [0, 0, 1, 1], [], []>} : vector<5x84xbf16>, vector<84x80xbf16>, vector<5x80xf32> -> vector<5x80xf32>
    %260 = arith.addf %256, %259 : vector<5x80xf32>
    %c0_307 = arith.constant 0 : index
    %c1_308 = arith.constant 1 : index
    %c0_309 = arith.constant 0 : index
    %c0_310 = arith.constant 0 : index
    %261 = vector.load %arg4[%c0_307, %c1_308, %c0_309, %c0_310] : memref<5x2x84x80xbf16, #tpu.memory_space<vmem>>, vector<1x1x84x80xbf16>
    %262 = vector.shape_cast %261 : vector<1x1x84x80xbf16> to vector<84x80xbf16>
    %cst_311 = arith.constant dense<0.000000e+00> : vector<5x80xf32>
    %263 = tpu.matmul %195, %262, %cst_311 {dimension_numbers = #tpu.dot_dimension_numbers<[1], [0], [0], [1], [0, 0, 1, 1], [], []>} : vector<5x84xbf16>, vector<84x80xbf16>, vector<5x80xf32> -> vector<5x80xf32>
    %c1_312 = arith.constant 1 : index
    %c1_313 = arith.constant 1 : index
    %c0_314 = arith.constant 0 : index
    %c0_315 = arith.constant 0 : index
    %264 = vector.load %arg4[%c1_312, %c1_313, %c0_314, %c0_315] : memref<5x2x84x80xbf16, #tpu.memory_space<vmem>>, vector<1x1x84x80xbf16>
    %265 = vector.shape_cast %264 : vector<1x1x84x80xbf16> to vector<84x80xbf16>
    %cst_316 = arith.constant dense<0.000000e+00> : vector<5x80xf32>
    %266 = tpu.matmul %197, %265, %cst_316 {dimension_numbers = #tpu.dot_dimension_numbers<[1], [0], [0], [1], [0, 0, 1, 1], [], []>} : vector<5x84xbf16>, vector<84x80xbf16>, vector<5x80xf32> -> vector<5x80xf32>
    %267 = arith.addf %263, %266 : vector<5x80xf32>
    %c2_317 = arith.constant 2 : index
    %c1_318 = arith.constant 1 : index
    %c0_319 = arith.constant 0 : index
    %c0_320 = arith.constant 0 : index
    %268 = vector.load %arg4[%c2_317, %c1_318, %c0_319, %c0_320] : memref<5x2x84x80xbf16, #tpu.memory_space<vmem>>, vector<1x1x84x80xbf16>
    %269 = vector.shape_cast %268 : vector<1x1x84x80xbf16> to vector<84x80xbf16>
    %cst_321 = arith.constant dense<0.000000e+00> : vector<5x80xf32>
    %270 = tpu.matmul %199, %269, %cst_321 {dimension_numbers = #tpu.dot_dimension_numbers<[1], [0], [0], [1], [0, 0, 1, 1], [], []>} : vector<5x84xbf16>, vector<84x80xbf16>, vector<5x80xf32> -> vector<5x80xf32>
    %271 = arith.addf %267, %270 : vector<5x80xf32>
    %c3_322 = arith.constant 3 : index
    %c1_323 = arith.constant 1 : index
    %c0_324 = arith.constant 0 : index
    %c0_325 = arith.constant 0 : index
    %272 = vector.load %arg4[%c3_322, %c1_323, %c0_324, %c0_325] : memref<5x2x84x80xbf16, #tpu.memory_space<vmem>>, vector<1x1x84x80xbf16>
    %273 = vector.shape_cast %272 : vector<1x1x84x80xbf16> to vector<84x80xbf16>
    %cst_326 = arith.constant dense<0.000000e+00> : vector<5x80xf32>
    %274 = tpu.matmul %201, %273, %cst_326 {dimension_numbers = #tpu.dot_dimension_numbers<[1], [0], [0], [1], [0, 0, 1, 1], [], []>} : vector<5x84xbf16>, vector<84x80xbf16>, vector<5x80xf32> -> vector<5x80xf32>
    %275 = arith.addf %271, %274 : vector<5x80xf32>
    %c4_327 = arith.constant 4 : index
    %c1_328 = arith.constant 1 : index
    %c0_329 = arith.constant 0 : index
    %c0_330 = arith.constant 0 : index
    %276 = vector.load %arg4[%c4_327, %c1_328, %c0_329, %c0_330] : memref<5x2x84x80xbf16, #tpu.memory_space<vmem>>, vector<1x1x84x80xbf16>
    %277 = vector.shape_cast %276 : vector<1x1x84x80xbf16> to vector<84x80xbf16>
    %cst_331 = arith.constant dense<0.000000e+00> : vector<5x80xf32>
    %278 = tpu.matmul %203, %277, %cst_331 {dimension_numbers = #tpu.dot_dimension_numbers<[1], [0], [0], [1], [0, 0, 1, 1], [], []>} : vector<5x84xbf16>, vector<84x80xbf16>, vector<5x80xf32> -> vector<5x80xf32>
    %279 = arith.addf %275, %278 : vector<5x80xf32>
    %280 = arith.maximumf %222, %241 : vector<5x80xf32>
    %281 = arith.maximumf %260, %279 : vector<5x80xf32>
    %282 = arith.maximumf %280, %281 : vector<5x80xf32>
    %c0_332 = arith.constant 0 : index
    %c0_333 = arith.constant 0 : index
    %283 = vector.load %arg5[%c0_332, %c0_333] : memref<1x80xf32, #tpu.memory_space<vmem>>, vector<1x80xf32>
    %284 = vector.broadcast %283 : vector<1x80xf32> to vector<5x80xf32>
    %285 = arith.addf %282, %284 : vector<5x80xf32>
    %cst_334 = arith.constant 0.000000e+00 : f32
    %286 = vector.broadcast %cst_334 : f32 to vector<5x80xf32>
    %287 = arith.maximumf %285, %286 : vector<5x80xf32>
    %288 = arith.truncf %287 : vector<5x80xf32> to vector<5x80xbf16>
    %289 = vector.extract_strided_slice %288 {offsets = [0, 0], sizes = [1, 80], strides = [1, 1]} : vector<5x80xbf16> to vector<1x80xbf16>
    %c0_335 = arith.constant 0 : index
    %c0_336 = arith.constant 0 : index
    %c0_337 = arith.constant 0 : index
    %290 = vector.load %arg6[%c0_335, %c0_336, %c0_337] : memref<5x80x120xbf16, #tpu.memory_space<vmem>>, vector<1x80x120xbf16>
    %291 = vector.shape_cast %290 : vector<1x80x120xbf16> to vector<80x120xbf16>
    %cst_338 = arith.constant dense<0.000000e+00> : vector<1x120xf32>
    %292 = tpu.matmul %289, %291, %cst_338 {dimension_numbers = #tpu.dot_dimension_numbers<[1], [0], [0], [1], [0, 0, 1, 1], [], []>} : vector<1x80xbf16>, vector<80x120xbf16>, vector<1x120xf32> -> vector<1x120xf32>
    %293 = vector.extract_strided_slice %288 {offsets = [1, 0], sizes = [1, 80], strides = [1, 1]} : vector<5x80xbf16> to vector<1x80xbf16>
    %c1_339 = arith.constant 1 : index
    %c0_340 = arith.constant 0 : index
    %c0_341 = arith.constant 0 : index
    %294 = vector.load %arg6[%c1_339, %c0_340, %c0_341] : memref<5x80x120xbf16, #tpu.memory_space<vmem>>, vector<1x80x120xbf16>
    %295 = vector.shape_cast %294 : vector<1x80x120xbf16> to vector<80x120xbf16>
    %cst_342 = arith.constant dense<0.000000e+00> : vector<1x120xf32>
    %296 = tpu.matmul %293, %295, %cst_342 {dimension_numbers = #tpu.dot_dimension_numbers<[1], [0], [0], [1], [0, 0, 1, 1], [], []>} : vector<1x80xbf16>, vector<80x120xbf16>, vector<1x120xf32> -> vector<1x120xf32>
    %297 = arith.addf %292, %296 : vector<1x120xf32>
    %298 = vector.extract_strided_slice %288 {offsets = [2, 0], sizes = [1, 80], strides = [1, 1]} : vector<5x80xbf16> to vector<1x80xbf16>
    %c2_343 = arith.constant 2 : index
    %c0_344 = arith.constant 0 : index
    %c0_345 = arith.constant 0 : index
    %299 = vector.load %arg6[%c2_343, %c0_344, %c0_345] : memref<5x80x120xbf16, #tpu.memory_space<vmem>>, vector<1x80x120xbf16>
    %300 = vector.shape_cast %299 : vector<1x80x120xbf16> to vector<80x120xbf16>
    %cst_346 = arith.constant dense<0.000000e+00> : vector<1x120xf32>
    %301 = tpu.matmul %298, %300, %cst_346 {dimension_numbers = #tpu.dot_dimension_numbers<[1], [0], [0], [1], [0, 0, 1, 1], [], []>} : vector<1x80xbf16>, vector<80x120xbf16>, vector<1x120xf32> -> vector<1x120xf32>
    %302 = arith.addf %297, %301 : vector<1x120xf32>
    %303 = vector.extract_strided_slice %288 {offsets = [3, 0], sizes = [1, 80], strides = [1, 1]} : vector<5x80xbf16> to vector<1x80xbf16>
    %c3_347 = arith.constant 3 : index
    %c0_348 = arith.constant 0 : index
    %c0_349 = arith.constant 0 : index
    %304 = vector.load %arg6[%c3_347, %c0_348, %c0_349] : memref<5x80x120xbf16, #tpu.memory_space<vmem>>, vector<1x80x120xbf16>
    %305 = vector.shape_cast %304 : vector<1x80x120xbf16> to vector<80x120xbf16>
    %cst_350 = arith.constant dense<0.000000e+00> : vector<1x120xf32>
    %306 = tpu.matmul %303, %305, %cst_350 {dimension_numbers = #tpu.dot_dimension_numbers<[1], [0], [0], [1], [0, 0, 1, 1], [], []>} : vector<1x80xbf16>, vector<80x120xbf16>, vector<1x120xf32> -> vector<1x120xf32>
    %307 = arith.addf %302, %306 : vector<1x120xf32>
    %308 = vector.extract_strided_slice %288 {offsets = [4, 0], sizes = [1, 80], strides = [1, 1]} : vector<5x80xbf16> to vector<1x80xbf16>
    %c4_351 = arith.constant 4 : index
    %c0_352 = arith.constant 0 : index
    %c0_353 = arith.constant 0 : index
    %309 = vector.load %arg6[%c4_351, %c0_352, %c0_353] : memref<5x80x120xbf16, #tpu.memory_space<vmem>>, vector<1x80x120xbf16>
    %310 = vector.shape_cast %309 : vector<1x80x120xbf16> to vector<80x120xbf16>
    %cst_354 = arith.constant dense<0.000000e+00> : vector<1x120xf32>
    %311 = tpu.matmul %308, %310, %cst_354 {dimension_numbers = #tpu.dot_dimension_numbers<[1], [0], [0], [1], [0, 0, 1, 1], [], []>} : vector<1x80xbf16>, vector<80x120xbf16>, vector<1x120xf32> -> vector<1x120xf32>
    %312 = arith.addf %307, %311 : vector<1x120xf32>
    %c0_355 = arith.constant 0 : index
    %c0_356 = arith.constant 0 : index
    %313 = vector.load %arg7[%c0_355, %c0_356] : memref<1x120xf32, #tpu.memory_space<vmem>>, vector<1x120xf32>
    %314 = arith.addf %312, %313 : vector<1x120xf32>
    %cst_357 = arith.constant 0.000000e+00 : f32
    %315 = vector.broadcast %cst_357 : f32 to vector<1x120xf32>
    %316 = arith.maximumf %314, %315 : vector<1x120xf32>
    %317 = arith.truncf %316 : vector<1x120xf32> to vector<1x120xbf16>
    %c0_358 = arith.constant 0 : index
    %c0_359 = arith.constant 0 : index
    %318 = vector.load %arg8[%c0_358, %c0_359] : memref<120x84xbf16, #tpu.memory_space<vmem>>, vector<120x84xbf16>
    %cst_360 = arith.constant dense<0.000000e+00> : vector<1x84xf32>
    %319 = tpu.matmul %317, %318, %cst_360 {dimension_numbers = #tpu.dot_dimension_numbers<[1], [0], [0], [1], [0, 0, 1, 1], [], []>} : vector<1x120xbf16>, vector<120x84xbf16>, vector<1x84xf32> -> vector<1x84xf32>
    %c0_361 = arith.constant 0 : index
    %c0_362 = arith.constant 0 : index
    %320 = vector.load %arg9[%c0_361, %c0_362] : memref<1x84xf32, #tpu.memory_space<vmem>>, vector<1x84xf32>
    %321 = arith.addf %319, %320 : vector<1x84xf32>
    %cst_363 = arith.constant 0.000000e+00 : f32
    %322 = vector.broadcast %cst_363 : f32 to vector<1x84xf32>
    %323 = arith.maximumf %321, %322 : vector<1x84xf32>
    %324 = arith.truncf %323 : vector<1x84xf32> to vector<1x84xbf16>
    %c0_364 = arith.constant 0 : index
    %c0_365 = arith.constant 0 : index
    %325 = vector.load %arg10[%c0_364, %c0_365] : memref<84x10xbf16, #tpu.memory_space<vmem>>, vector<84x10xbf16>
    %cst_366 = arith.constant dense<0.000000e+00> : vector<1x10xf32>
    %326 = tpu.matmul %324, %325, %cst_366 {dimension_numbers = #tpu.dot_dimension_numbers<[1], [0], [0], [1], [0, 0, 1, 1], [], []>} : vector<1x84xbf16>, vector<84x10xbf16>, vector<1x10xf32> -> vector<1x10xf32>
    %c0_367 = arith.constant 0 : index
    %c0_368 = arith.constant 0 : index
    %327 = vector.load %arg11[%c0_367, %c0_368] : memref<1x10xf32, #tpu.memory_space<vmem>>, vector<1x10xf32>
    %328 = arith.addf %326, %327 : vector<1x10xf32>
    %c0_369 = arith.constant 0 : index
    %c0_370 = arith.constant 0 : index
    %c0_371 = arith.constant 0 : index
    %329 = vector.load %arg12[%c0_369, %c0_370, %c0_371] : memref<1x1x10xf32, #tpu.memory_space<vmem>>, vector<1x1x10xf32>
    %330 = vector.shape_cast %329 : vector<1x1x10xf32> to vector<1x10xf32>
    %331 = vector.shape_cast %328 : vector<1x10xf32> to vector<1x1x10xf32>
    tpu.vector_store %arg12[%c0_369, %c0_370, %c0_371], %331 {strides = array<i32>} : memref<1x1x10xf32, #tpu.memory_space<vmem>>, vector<1x1x10xf32>,
    return
  }
  func.func @transform_0(%arg0: i32) -> (i32, i32, i32, i32) {
    %c0_i32 = arith.constant 0 : i32
    %c0_i32_0 = arith.constant 0 : i32
    %c0_i32_1 = arith.constant 0 : i32
    %c0_i32_2 = arith.constant 0 : i32
    return %arg0, %c0_i32, %c0_i32_0, %c0_i32_1 : i32, i32, i32, i32
  }
  func.func @transform_1(%arg0: i32) -> (i32, i32, i32, i32) {
    %c0_i32 = arith.constant 0 : i32
    %c0_i32_0 = arith.constant 0 : i32
    %c0_i32_1 = arith.constant 0 : i32
    %c0_i32_2 = arith.constant 0 : i32
    %c0_i32_3 = arith.constant 0 : i32
    return %c0_i32, %c0_i32_0, %c0_i32_1, %c0_i32_2 : i32, i32, i32, i32
  }
  func.func @transform_2(%arg0: i32) -> (i32, i32) {
    %c0_i32 = arith.constant 0 : i32
    %c0_i32_0 = arith.constant 0 : i32
    %c0_i32_1 = arith.constant 0 : i32
    return %c0_i32, %c0_i32_0 : i32, i32
  }
  func.func @transform_3(%arg0: i32) -> (i32, i32, i32, i32) {
    %c0_i32 = arith.constant 0 : i32
    %c0_i32_0 = arith.constant 0 : i32
    %c0_i32_1 = arith.constant 0 : i32
    %c0_i32_2 = arith.constant 0 : i32
    %c0_i32_3 = arith.constant 0 : i32
    return %c0_i32, %c0_i32_0, %c0_i32_1, %c0_i32_2 : i32, i32, i32, i32
  }
  func.func @transform_4(%arg0: i32) -> (i32, i32) {
    %c0_i32 = arith.constant 0 : i32
    %c0_i32_0 = arith.constant 0 : i32
    %c0_i32_1 = arith.constant 0 : i32
    return %c0_i32, %c0_i32_0 : i32, i32
  }
  func.func @transform_5(%arg0: i32) -> (i32, i32, i32) {
    %c0_i32 = arith.constant 0 : i32
    %c0_i32_0 = arith.constant 0 : i32
    %c0_i32_1 = arith.constant 0 : i32
    %c0_i32_2 = arith.constant 0 : i32
    return %c0_i32, %c0_i32_0, %c0_i32_1 : i32, i32, i32
  }
  func.func @transform_6(%arg0: i32) -> (i32, i32) {
    %c0_i32 = arith.constant 0 : i32
    %c0_i32_0 = arith.constant 0 : i32
    %c0_i32_1 = arith.constant 0 : i32
    return %c0_i32, %c0_i32_0 : i32, i32
  }
  func.func @transform_7(%arg0: i32) -> (i32, i32) {
    %c0_i32 = arith.constant 0 : i32
    %c0_i32_0 = arith.constant 0 : i32
    %c0_i32_1 = arith.constant 0 : i32
    return %c0_i32, %c0_i32_0 : i32, i32
  }
  func.func @transform_8(%arg0: i32) -> (i32, i32) {
    %c0_i32 = arith.constant 0 : i32
    %c0_i32_0 = arith.constant 0 : i32
    %c0_i32_1 = arith.constant 0 : i32
    return %c0_i32, %c0_i32_0 : i32, i32
  }
  func.func @transform_9(%arg0: i32) -> (i32, i32) {
    %c0_i32 = arith.constant 0 : i32
    %c0_i32_0 = arith.constant 0 : i32
    %c0_i32_1 = arith.constant 0 : i32
    return %c0_i32, %c0_i32_0 : i32, i32
  }
  func.func @transform_10(%arg0: i32) -> (i32, i32) {
    %c0_i32 = arith.constant 0 : i32
    %c0_i32_0 = arith.constant 0 : i32
    %c0_i32_1 = arith.constant 0 : i32
    return %c0_i32, %c0_i32_0 : i32, i32
  }
  func.func @transform_11(%arg0: i32) -> (i32, i32, i32) {
    %c0_i32 = arith.constant 0 : i32
    %c0_i32_0 = arith.constant 0 : i32
    %c0_i32_1 = arith.constant 0 : i32
    return %arg0, %c0_i32, %c0_i32_0 : i32, i32, i32
  }
}

</mosaic_0001>

<bundles_post_ra>
// kernel: net_forward.1
= control target key start
LH: loop header
LB: loop body
LE: loop exit
PB: predicated region body
PF: predicated region fallthrough
CT: control target
= control target key end

     0   :  { %16 = vsyncpa [#allocation3], 0  ;;  %s9300_s0 = inlined_call_operand.vmem [shape: f32[2,4,8,96], index: 0, kind: input, shape index: {}]   ;;  %s9301_s1 = inlined_call_operand.vmem [shape: bf16[5,2,96,84], index: 1, kind: input, shape index: {}]   ;;  %s9302_s2 = inlined_call_operand.vmem [shape: f32[1,84], index: 2, kind: input, shape index: {}]   ;;  %s9303_s3 = inlined_call_operand.vmem [shape: bf16[5,2,84,80], index: 3, kind: input, shape index: {}]   ;;  %s9304_s4 = inlined_call_operand.vmem [shape: f32[1,80], index: 4, kind: input, shape index: {}]   ;;  %s9305_s5 = inlined_call_operand.vmem [shape: bf16[5,80,120], index: 5, kind: input, shape index: {}]   ;;  %s9306_s6 = inlined_call_operand.vmem [shape: f32[1,120], index: 6, kind: input, shape index: {}]   ;;  %s9307_s7 = inlined_call_operand.vmem [shape: bf16[120,84], index: 7, kind: input, shape index: {}]   ;;  %s9308_s8 = inlined_call_operand.vmem [shape: f32[1,84], index: 8, kind: input, shape index: {}]   ;;  %s9309_s9 = inlined_call_operand.vmem [shape: bf16[84,10], index: 9, kind: input, shape index: {}]   ;;  %s9310_s10 = inlined_call_operand.vmem [shape: f32[1,10], index: 10, kind: input, shape index: {}]   ;;  %s9311_s11 = inlined_call_operand.hbm [shape: f32[2,1,10], index: 11, kind: output, shape index: {}]  }
   0x1   :  { %18 = vsyncpa [#allocation3 + $0x1], 0  ;;  %s7203_s17 = smov 0   ;;  %s7205_s18 = smov 0  }
   0x2   :  { %s7207_s19 = smov 0   ;;  %s7209_s20 = smov 0  }
   0x3 LB: > { %s7224_s21 = sadd.s32 4294967295, %s7138_s20   ;;  %s4606_s22 = sadd.s32 4294967294, %s7138_s20   ;;  %s7138_s20 = sphi %s7209_s20, %s9333_s20   ;;  %s7134_s19 = sphi %s7207_s19, %s9332_s19   ;;  %s7130_s18 = sphi %s7205_s18, %s9331_s18   ;;  %s7126_s17 = sphi %s7203_s17, %s9330_s17  }
   0x4   : > { %s7228_s23 = sadd.s32 1, %s7138_s20   ;;  %s267_s24 = sadd.s32 1, %s7134_s19 }
   0x5   : > { %s264_s25 = ssub.s32 %s7138_s20, %s7228_s23  ;;  %p277_p0 = scmp.ne.s32.totalorder %s7134_s19, %s7130_s18 }
   0x6   : > { %p265_p1 = scmp.eq.s32.totalorder %s264_s25, 0  ;;  %p278_p2 = scmp.eq.s32.totalorder %s7224_s21, 1 }
   0x7   : > { %p283_p3 = scmp.ne.s32.totalorder %s7130_s18, %s7126_s17  ;;  %p284_p4 = scmp.eq.s32.totalorder %s4606_s22, 1 }
   0x8   : > { %s7239_s26 = scalar_select %p265_p1, %s7134_s19, %s267_s24  }
   0x9   : > { %p7241_p5 = por %p278_p2, %p277_p0  ;;  %p7245_p6 = por %p284_p4, %p283_p3 }
   0xa   : > { %p4609_p7 = scmp.ge.s32.totalorder %s7138_s20, 1  ;;  %p340_p8 = scmp.lt.s32.totalorder %s7138_s20, 3 }
   0xc   : > { %p341_p9 = pnand %p4609_p7, %p340_p8 }
   0xe   : > { %344 = sbr.rel (%p341_p9) target bundleno = 1871 (0x74f), region = 64 }
  0x15   : > { %v6862_v0 = vld [vmem:[%s9301_s1 + $0x60] sm:$0xff]   ;;  %v7140_v1 = vmov 0.0   ;;  %v6863_v2 = vld [vmem:[%s9301_s1 + $0x90] sm:$0xff]   ;;  %v6864_v3 = vld [vmem:[%s9301_s1 + $0x68] sm:$0xff]   ;;  %vm7141_vm0 = vmmov 0   ;;  %p379_p10 = scmp.lt.s32.totalorder %s7224_s21, 1 }
  0x16   : > { %5563 = vmatprep.subr.bf16.mxu0 %v7140_v1  ;;  %5643 = vmatprep.subr.bf16.mxu1 %v7140_v1  ;;  %v6865_v4 = vld [vmem:[%s9301_s1 + $0x98] sm:$0xff]   ;;  %v7275_v5 = vld [vmem:[%s9301_s1 + $0x70] sm:$0xff]   ;;  %v7281_v6 = vld [vmem:[%s9301_s1 + $0xa0] sm:$0xff]   ;;  %vm465_vm1 = vcmask 785408   ;;  %vm2621_vm2 = vcmask 1041408   ;;  %vm2617_vm3 = vcmask 687104  }
  0x17   : > { %5564 = vmatpush3.bf16.msra.mxu0 %v6862_v0  ;;  %5575 = vmatprep.mubr.msk.bf16.mxu0 %vm7141_vm0, %v7140_v1  ;;  %s380_s12 = scalar_select %p379_p10, %s7224_s21, 1  ;;  %v7289_v7 = vld [vmem:[%s9301_s1 + $0x78] sm:$0xff]   ;;  %v7296_v8 = vld [vmem:[%s9301_s1 + $0xa8] sm:$0xff]   ;;  %v7303_v9 = vld [vmem:[%s9301_s1 + $0x80] sm:$0xff]   ;;  %vm3955_vm4 = vcmask 654336   ;;  %vm4399_vm5 = vcmask 1043456  }
  0x18   : > { %5644 = vmatpush3.bf16.msra.mxu1 %v6863_v2  ;;  %5565 = vmatprep.subr.bf16.mxu0 %v7140_v1  ;;  %v7310_v10 = vld [vmem:[%s9301_s1 + $0xb0] sm:$0xff]   ;;  %v7321_v11 = vld [vmem:[%s9301_s1 + $0x88] sm:$0xff]   ;;  %v7330_v13 = vld [vmem:[%s9301_s1 + $0xb8] sm:$0xff]   ;;  %vm4395_vm6 = vcmask 982016   ;;  %s377_s14 = sand.u32 1, %s7130_s18   ;;  %s5093_s24 = sshll.u32 %s7224_s21, 4 }
  0x19   : > { %5645 = vmatprep.subr.bf16.mxu1 %v7140_v1  ;;  %5655 = vmatprep.mubr.msk.bf16.mxu1 %vm7141_vm0, %v7140_v1  ;;  %s5096_s22 = sshll.u32 %s380_s12, 5  ;;  %v7339_v15 = vld [vmem:[%s9301_s1] sm:$0xff]   ;;  %v7346_v16 = vld [vmem:[%s9301_s1 + $0x30] sm:$0xff]   ;;  %v7357_v17 = vld [vmem:[%s9301_s1 + $0x8] sm:$0xff]   ;;  %s378_s25 = scalar_lea.vmem [#allocation2], %s377_s14  ;;  %vm4536_vm7 = vcmask 73728  }
  0x1a   : > { %s7315_s12 = scalar_lea.vmem %s9300_s0, %s5096_s22  ;;  %v7364_v18 = vld [vmem:[%s9301_s1 + $0x38] sm:$0xff]   ;;  %v7375_v19 = vld [vmem:[%s9301_s1 + $0x10] sm:$0xff]   ;;  %v7382_v20 = vld [vmem:[%s9301_s1 + $0x40] sm:$0xff]   ;;  %s4551_s22 = sshll.u32 %s378_s25, 4  ;;  %s9260_s22 = int_to_ptr.vmem [resolvable:$true] %s4551_s22 }
  0x1b   : > { %5566 = vmatpush3.bf16.msra.mxu0 %v6864_v3  ;;  %v4612_v12 = vld [vmem:[%s7315_s12 + $0x8] sm:$0x7f]  ;;  %v7389_v21 = vld [vmem:[%s9301_s1 + $0x18] sm:$0xff]   ;;  %v7403_v23 = vld [vmem:[%s9301_s1 + $0x20] sm:$0xff]   ;;  %s9258_s30 = scalar_lea.hbm %s9311_s11, %s5093_s24  ;;  %s4539_s21 = scalar_lea.sflag [#allocation3], %s377_s14 }
  0x1c   : > { %5646 = vmatpush3.bf16.msra.mxu1 %v6865_v4  ;;  %5567 = vmatprep.subr.bf16.mxu0 %v7140_v1  ;;  %v7333_v14 = vpack.c.bf16 %v4612_v12, %v4612_v12  ;;  %v7396_v22 = vld [vmem:[%s9301_s1 + $0x48] sm:$0xff]   ;;  %v7410_v24 = vld [vmem:[%s9301_s1 + $0x50] sm:$0xff]   ;;  %v385_v26 = vld [vmem:[%s7315_s12] sm:$0x7f]  ;;  %s7076_s13 = scalar_lea.vmem %s9260_s22, 16  ;;  %s7142_s15 = smov [#allocation2]  }
  0x1d   : > { %5647 = vmatprep.subr.bf16.mxu1 %v7140_v1  ;;  %v7416_v25 = vld [vmem:[%s9301_s1 + $0x28] sm:$0xff]   ;;  %v7425_v27 = vld [vmem:[%s9301_s1 + $0x58] sm:$0xff]   ;;  %v386_v28 = vpack.c.bf16 %v385_v26, %v385_v26  ;;  %v7432_v29 = vld [vmem:[%s9301_s1 + $0xc0] sm:$0xff]   ;;  %p7077_p11 = scmp.ne.s32.totalorder %s9260_s22, %s7076_s13  ;;  %s7080_s16 = sshll.u32 %s7142_s15, 4  ;;  %s7081_s16 = int_to_ptr.vmem [resolvable:$false] %s7080_s16 }
  0x1e   : > { %v7439_v30 = vld [vmem:[%s9301_s1 + $0xf0] sm:$0xff]   ;;  %v7448_v31 = vld [vmem:[%s9301_s1 + $0xc8] sm:$0xff]   ;;  %v7455_v32 = vld [vmem:[%s9301_s1 + $0xf8] sm:$0xff]   ;;  %s7082_s29 = scalar_lea.vmem %s7081_s16, 32  ;;  %p7083_p0 = scmp.lt.s32.totalorder %s9260_s22, %s7081_s16 }
  0x1f   : > { %5568 = vmatpush3.bf16.msra.mxu0 %v7275_v5  ;;  %v7466_v33 = vld [vmem:[%s9301_s1 + $0xd0] sm:$0xff]   ;;  %v7473_v34 = vld [vmem:[%s9301_s1 + $0x100] sm:$0xff]   ;;  %v7480_v35 = vld [vmem:[%s9301_s1 + $0xd8] sm:$0xff]   ;;  %p7078_p12 = pnand %p7077_p11, %p7241_p5  ;;  %p7084_p1 = scmp.lt.s32.totalorder %s7082_s29, %s7076_s13 }
  0x20   : > { %5648 = vmatpush3.bf16.msra.mxu1 %v7281_v6  ;;  %5569 = vmatprep.subr.bf16.mxu0 %v7140_v1  ;;  %v7487_v36 = vld [vmem:[%s9301_s1 + $0x108] sm:$0xff]   ;;  %v7493_v37 = vld [vmem:[%s9301_s1 + $0xe0] sm:$0xff]   ;;  %v7498_v38 = vld [vmem:[%s9301_s1 + $0x110] sm:$0xff]  }
  0x21   : > { %5649 = vmatprep.subr.bf16.mxu1 %v7140_v1  ;;  %v7507_v39 = vld [vmem:[%s9301_s1 + $0xe8] sm:$0xff]   ;;  %v4613_v40 = vld [vmem:[%s7315_s12 + $0x10] sm:$0x7f]  ;;  %v7513_v41 = vld [vmem:[%s9301_s1 + $0x118] sm:$0xff]   ;;  %p7079_p13 = pneg %p7078_p12  ;;  %p7085_p2 = por %p7084_p1, %p7083_p0 }
  0x22   : > { %v7522_v42 = vld [vmem:[%s9301_s1 + $0x120] sm:$0xff]   ;;  %v7524_v43 = vpack.c.bf16 %v4613_v40, %v4613_v40  ;;  %v7529_v44 = vld [vmem:[%s9301_s1 + $0x150] sm:$0xff]   ;;  %v7538_v45 = vld [vmem:[%s9301_s1 + $0x128] sm:$0xff]  }
  0x23   : > { %5570 = vmatpush3.bf16.msra.mxu0 %v7289_v7  ;;  %v7545_v46 = vld [vmem:[%s9301_s1 + $0x158] sm:$0xff]   ;;  %v7556_v47 = vld [vmem:[%s9301_s1 + $0x130] sm:$0xff]   ;;  %v7563_v48 = vld [vmem:[%s9301_s1 + $0x160] sm:$0xff]   ;;  %p7086_p3 = pnand %p7085_p2, %p7079_p13 }
  0x24   : > { %5650 = vmatpush3.bf16.msra.mxu1 %v7296_v8  ;;  %5571 = vmatprep.subr.bf16.mxu0 %v7140_v1  ;;  %v7574_v49 = vld [vmem:[%s9301_s1 + $0x138] sm:$0xff]   ;;  %v7579_v50 = vld [vmem:[%s9301_s1 + $0x168] sm:$0xff]   ;;  %v7588_v51 = vld [vmem:[%s9301_s1 + $0x140] sm:$0xff]  }
  0x25   : > { %5651 = vmatprep.subr.bf16.mxu1 %v7140_v1  ;;  %v7593_v52 = vld [vmem:[%s9301_s1 + $0x170] sm:$0xff]   ;;  %v7602_v53 = vld [vmem:[%s9301_s1 + $0x148] sm:$0xff]   ;;  %v4614_v54 = vld [vmem:[%s7315_s12 + $0x18] sm:$0x7f] }
  0x26   : > { %v7608_v55 = vld [vmem:[%s9301_s1 + $0x178] sm:$0xff]   ;;  %v7617_v56 = vld [vmem:[%s9301_s1 + $0x180] sm:$0xff]   ;;  %v7619_v57 = vpack.c.bf16 %v4614_v54, %v4614_v54  ;;  %v7624_v58 = vld [vmem:[%s9301_s1 + $0x1b0] sm:$0xff]  }
  0x27   : > { %5572 = vmatpush3.bf16.msra.mxu0 %v7303_v9  ;;  %v7633_v59 = vld [vmem:[%s9301_s1 + $0x188] sm:$0xff]   ;;  %v7640_v60 = vld [vmem:[%s9301_s1 + $0x1b8] sm:$0xff]   ;;  %v7651_v61 = vld [vmem:[%s9301_s1 + $0x190] sm:$0xff]  }
  0x28   : > { %5652 = vmatpush3.bf16.msra.mxu1 %v7310_v10  ;;  %5573 = vmatprep.subr.bf16.mxu0 %v7140_v1  ;;  %v7658_v62 = vld [vmem:[%s9301_s1 + $0x1c0] sm:$0xff]   ;;  %v7669_v63 = vld [vmem:[%s9301_s1 + $0x198] sm:$0xff]   ;;  %v7674_v0 = vld [vmem:[%s9301_s1 + $0x1c8] sm:$0xff]  }
  0x29   : > { %5653 = vmatprep.subr.bf16.mxu1 %v7140_v1  ;;  %v7683_v2 = vld [vmem:[%s9301_s1 + $0x1a0] sm:$0xff]   ;;  %v7691_v3 = vld [vmem:[%s9301_s1 + $0x1d0] sm:$0xff]   ;;  %v7697_v4 = vld [vmem:[%s9301_s1 + $0x1a8] sm:$0xff]  }
  0x2a   : > { %v396_v12 = vld [vmem:[%s7315_s12 + $0x1] sm:$0x7f]  ;;  %v7703_v26 = vld [vmem:[%s9301_s1 + $0x1d8] sm:$0xff]   ;;  %v7728_v54 = vld [vmem:[%s9301_s1 + $0x90] sm:$0xff]  }
  0x2b   : > { %5574 = vmatpush3.bf16.msra.mxu0 %v7321_v11  ;;  %v7722_v40 = vld [vmem:[%s9301_s1 + $0x60] sm:$0xff]   ;;  %9320 = vst [vmem:[#allocation5_spill] sm:$0xff] %v7728_v54 }
  0x2c   : > { %5654 = vmatpush3.bf16.msra.mxu1 %v7330_v13  ;;  %5579 = vmatprep.subr.bf16.mxu0 %v7140_v1 }
  0x2d   : > { %5659 = vmatprep.subr.bf16.mxu1 %v7140_v1 }
  0x2e   : > { %5576 = vmatmul.mubr.msk.bf16.vlgmr.msra.gmra.mrb[0].mxu0 %vm465_vm1, %v7333_v14 }
  0x2f   : > { %5580 = vmatpush3.bf16.msra.mxu0 %v7339_v15  ;;  %5656 = vmatmul.mubr.msk.bf16.vlgmr.msra.gmra.mrb[0].mxu1 %vm465_vm1, %v7333_v14 }
  0x30   : > { %5660 = vmatpush3.bf16.msra.mxu1 %v7346_v16  ;;  %5581 = vmatprep.subr.bf16.mxu0 %v7140_v1 }
  0x31   : > { %5661 = vmatprep.subr.bf16.mxu1 %v7140_v1  ;;  %5591 = vmatprep.mubr.msk.bf16.mxu0 %vm7141_vm0, %v7140_v1 }
  0x32   : > { %5671 = vmatprep.mubr.msk.bf16.mxu1 %vm7141_vm0, %v7140_v1 }
  0x33   : > { %5582 = vmatpush3.bf16.msra.mxu0 %v7357_v17 }
  0x34   : > { %5662 = vmatpush3.bf16.msra.mxu1 %v7364_v18  ;;  %5583 = vmatprep.subr.bf16.mxu0 %v7140_v1 }
  0x35   : > { %5663 = vmatprep.subr.bf16.mxu1 %v7140_v1 }
  0x37   : > { %5584 = vmatpush3.bf16.msra.mxu0 %v7375_v19 }
  0x38   : > { %5664 = vmatpush3.bf16.msra.mxu1 %v7382_v20  ;;  %5585 = vmatprep.subr.bf16.mxu0 %v7140_v1 }
  0x39   : > { %5665 = vmatprep.subr.bf16.mxu1 %v7140_v1 }
  0x3b   : > { %5586 = vmatpush3.bf16.msra.mxu0 %v7389_v21 }
  0x3c   : > { %5666 = vmatpush3.bf16.msra.mxu1 %v7396_v22  ;;  %5587 = vmatprep.subr.bf16.mxu0 %v7140_v1 }
  0x3d   : > { %5667 = vmatprep.subr.bf16.mxu1 %v7140_v1 }
  0x3f   : > { %5588 = vmatpush3.bf16.msra.mxu0 %v7403_v23 }
  0x40   : > { %5668 = vmatpush3.bf16.msra.mxu1 %v7410_v24  ;;  %5589 = vmatprep.subr.bf16.mxu0 %v7140_v1 }
  0x41   : > { %5669 = vmatprep.subr.bf16.mxu1 %v7140_v1 }
  0x43   : > { %5590 = vmatpush3.bf16.msra.mxu0 %v7416_v25 }
  0x44   : > { %5670 = vmatpush3.bf16.msra.mxu1 %v7425_v27  ;;  %5595 = vmatprep.subr.bf16.mxu0 %v7140_v1 }
  0x45   : > { %5675 = vmatprep.subr.bf16.mxu1 %v7140_v1 }
  0x46   : > { %5592 = vmatmul.mubr.msk.bf16.vlgmr.msra.gmra.mrb[0].mxu0 %vm465_vm1, %v386_v28 }
  0x47   : > { %5596 = vmatpush3.bf16.msra.mxu0 %v7432_v29  ;;  %5672 = vmatmul.mubr.msk.bf16.vlgmr.msra.gmra.mrb[0].mxu1 %vm465_vm1, %v386_v28  ;;  %v7709_v28 = vpack.c.bf16 %v396_v12, %v396_v12  ;;  %v7740_v12 = vld [vmem:[%s9301_s1 + $0x68] sm:$0xff]  }
  0x48   : > { %5676 = vmatpush3.bf16.msra.mxu1 %v7439_v30  ;;  %5597 = vmatprep.subr.bf16.mxu0 %v7140_v1 }
  0x49   : > { %5677 = vmatprep.subr.bf16.mxu1 %v7140_v1  ;;  %5607 = vmatprep.mubr.msk.bf16.mxu0 %vm7141_vm0, %v7140_v1 }
  0x4a   : > { %5687 = vmatprep.mubr.msk.bf16.mxu1 %vm7141_vm0, %v7140_v1 }
  0x4b   : > { %5598 = vmatpush3.bf16.msra.mxu0 %v7448_v31 }
  0x4c   : > { %5678 = vmatpush3.bf16.msra.mxu1 %v7455_v32  ;;  %5599 = vmatprep.subr.bf16.mxu0 %v7140_v1 }
  0x4d   : > { %5679 = vmatprep.subr.bf16.mxu1 %v7140_v1 }
  0x4f   : > { %5600 = vmatpush3.bf16.msra.mxu0 %v7466_v33 }
  0x50   : > { %5680 = vmatpush3.bf16.msra.mxu1 %v7473_v34  ;;  %5601 = vmatprep.subr.bf16.mxu0 %v7140_v1 }
  0x51   : > { %5681 = vmatprep.subr.bf16.mxu1 %v7140_v1 }
  0x53   : > { %5602 = vmatpush3.bf16.msra.mxu0 %v7480_v35 }
  0x54   : > { %5682 = vmatpush3.bf16.msra.mxu1 %v7487_v36  ;;  %5603 = vmatprep.subr.bf16.mxu0 %v7140_v1 }
  0x55   : > { %5683 = vmatprep.subr.bf16.mxu1 %v7140_v1 }
  0x57   : > { %5604 = vmatpush3.bf16.msra.mxu0 %v7493_v37 }
  0x58   : > { %5684 = vmatpush3.bf16.msra.mxu1 %v7498_v38  ;;  %5605 = vmatprep.subr.bf16.mxu0 %v7140_v1 }
  0x59   : > { %5685 = vmatprep.subr.bf16.mxu1 %v7140_v1 }
  0x5b   : > { %5606 = vmatpush3.bf16.msra.mxu0 %v7507_v39 }
  0x5c   : > { %5686 = vmatpush3.bf16.msra.mxu1 %v7513_v41  ;;  %5611 = vmatprep.subr.bf16.mxu0 %v7140_v1 }
  0x5d   : > { %5691 = vmatprep.subr.bf16.mxu1 %v7140_v1 }
  0x5e   : > { %5608 = vmatmul.mubr.msk.bf16.vlgmr.msra.gmra.mrb[0].mxu0 %vm465_vm1, %v7524_v43 }
  0x5f   : > { %5612 = vmatpush3.bf16.msra.mxu0 %v7522_v42  ;;  %5688 = vmatmul.mubr.msk.bf16.vlgmr.msra.gmra.mrb[0].mxu1 %vm465_vm1, %v7524_v43 }
  0x60   : > { %5692 = vmatpush3.bf16.msra.mxu1 %v7529_v44  ;;  %5613 = vmatprep.subr.bf16.mxu0 %v7140_v1 }
  0x61   : > { %5693 = vmatprep.subr.bf16.mxu1 %v7140_v1  ;;  %5623 = vmatprep.mubr.msk.bf16.mxu0 %vm7141_vm0, %v7140_v1 }
  0x62   : > { %5703 = vmatprep.mubr.msk.bf16.mxu1 %vm7141_vm0, %v7140_v1 }
  0x63   : > { %5614 = vmatpush3.bf16.msra.mxu0 %v7538_v45 }
  0x64   : > { %5694 = vmatpush3.bf16.msra.mxu1 %v7545_v46  ;;  %5615 = vmatprep.subr.bf16.mxu0 %v7140_v1 }
  0x65   : > { %5695 = vmatprep.subr.bf16.mxu1 %v7140_v1 }
  0x67   : > { %5616 = vmatpush3.bf16.msra.mxu0 %v7556_v47 }
  0x68   : > { %5696 = vmatpush3.bf16.msra.mxu1 %v7563_v48  ;;  %5617 = vmatprep.subr.bf16.mxu0 %v7140_v1 }
  0x69   : > { %5697 = vmatprep.subr.bf16.mxu1 %v7140_v1 }
  0x6b   : > { %5618 = vmatpush3.bf16.msra.mxu0 %v7574_v49 }
  0x6c   : > { %5698 = vmatpush3.bf16.msra.mxu1 %v7579_v50  ;;  %5619 = vmatprep.subr.bf16.mxu0 %v7140_v1 }
  0x6d   : > { %5699 = vmatprep.subr.bf16.mxu1 %v7140_v1 }
  0x6f   : > { %5620 = vmatpush3.bf16.msra.mxu0 %v7588_v51 }
  0x70   : > { %5700 = vmatpush3.bf16.msra.mxu1 %v7593_v52  ;;  %5621 = vmatprep.subr.bf16.mxu0 %v7140_v1 }
  0x71   : > { %5701 = vmatprep.subr.bf16.mxu1 %v7140_v1 }
  0x73   : > { %5622 = vmatpush3.bf16.msra.mxu0 %v7602_v53 }
  0x74   : > { %5702 = vmatpush3.bf16.msra.mxu1 %v7608_v55  ;;  %5627 = vmatprep.subr.bf16.mxu0 %v7140_v1 }
  0x75   : > { %5707 = vmatprep.subr.bf16.mxu1 %v7140_v1 }
  0x76   : > { %5624 = vmatmul.mubr.msk.bf16.vlgmr.msra.gmra.mrb[0].mxu0 %vm465_vm1, %v7619_v57 }
  0x77   : > { %5628 = vmatpush3.bf16.msra.mxu0 %v7617_v56  ;;  %5704 = vmatmul.mubr.msk.bf16.vlgmr.msra.gmra.mrb[0].mxu1 %vm465_vm1, %v7619_v57 }
  0x78   : > { %5708 = vmatpush3.bf16.msra.mxu1 %v7624_v58  ;;  %5629 = vmatprep.subr.bf16.mxu0 %v7140_v1 }
  0x79   : > { %5709 = vmatprep.subr.bf16.mxu1 %v7140_v1  ;;  %5639 = vmatprep.mubr.msk.bf16.mxu0 %vm7141_vm0, %v7140_v1 }
  0x7a   : > { %5719 = vmatprep.mubr.msk.bf16.mxu1 %vm7141_vm0, %v7140_v1 }
  0x7b   : > { %5630 = vmatpush3.bf16.msra.mxu0 %v7633_v59 }
  0x7c   : > { %5710 = vmatpush3.bf16.msra.mxu1 %v7640_v60  ;;  %5631 = vmatprep.subr.bf16.mxu0 %v7140_v1 }
  0x7d   : > { %5711 = vmatprep.subr.bf16.mxu1 %v7140_v1 }
  0x7f   : > { %5632 = vmatpush3.bf16.msra.mxu0 %v7651_v61 }
  0x80   : > { %5712 = vmatpush3.bf16.msra.mxu1 %v7658_v62  ;;  %5633 = vmatprep.subr.bf16.mxu0 %v7140_v1 }
  0x81   : > { %5713 = vmatprep.subr.bf16.mxu1 %v7140_v1 }
  0x83   : > { %5634 = vmatpush3.bf16.msra.mxu0 %v7669_v63 }
  0x84   : > { %5714 = vmatpush3.bf16.msra.mxu1 %v7674_v0  ;;  %5635 = vmatprep.subr.bf16.mxu0 %v7140_v1 }
  0x85   : > { %5715 = vmatprep.subr.bf16.mxu1 %v7140_v1 }
  0x87   : > { %5636 = vmatpush3.bf16.msra.mxu0 %v7683_v2 }
  0x88   : > { %5716 = vmatpush3.bf16.msra.mxu1 %v7691_v3  ;;  %5637 = vmatprep.subr.bf16.mxu0 %v7140_v1 }
  0x89   : > { %5717 = vmatprep.subr.bf16.mxu1 %v7140_v1 }
  0x8b   : > { %5638 = vmatpush3.bf16.msra.mxu0 %v7697_v4 }
  0x8c   : > { %5718 = vmatpush3.bf16.msra.mxu1 %v7703_v26  ;;  %5723 = vmatprep.subr.bf16.mxu0 %v7140_v1 }
  0x8d   : > { %5803 = vmatprep.subr.bf16.mxu1 %v7140_v1 }
  0x8e   : > { %5640 = vmatmul.mubr.msk.bf16.vlgmr.msra.gmra.mrb[0].mxu0 %vm465_vm1, %v7709_v28 }
  0x8f   : > { %5720 = vmatmul.mubr.msk.bf16.vlgmr.msra.gmra.mrb[0].mxu1 %vm465_vm1, %v7709_v28  ;;  %5724 = vmatpush3.bf16.msra.mxu0 %v7722_v40 }
  0x90   : > { %5804 = vmatpush3.bf16.msra.mxu1 %v7728_v54  ;;  %5725 = vmatprep.subr.bf16.mxu0 %v7140_v1  ;;  %v7746_v54 = vld [vmem:[%s9301_s1 + $0x98] sm:$0xff]  }
  0x91   : > { %5805 = vmatprep.subr.bf16.mxu1 %v7140_v1  ;;  %5735 = vmatprep.mubr.msk.bf16.mxu0 %vm7141_vm0, %v7140_v1 }
  0x92   : > { %5815 = vmatprep.mubr.msk.bf16.mxu1 %vm7141_vm0, %v7140_v1 }
  0x93   : > { %5726 = vmatpush3.bf16.msra.mxu0 %v7740_v12 }
  0x94   : > { %5806 = vmatpush3.bf16.msra.mxu1 %v7746_v54  ;;  %5727 = vmatprep.subr.bf16.mxu0 %v7140_v1 }
  0x95   : > { %5807 = vmatprep.subr.bf16.mxu1 %v7140_v1 }
  0x97   : > { %5728 = vmatpush3.bf16.msra.mxu0 %v7275_v5  ;;  %v4615_v5 = vld [vmem:[%s7315_s12 + $0x9] sm:$0x7f] }
  0x98   : > { %5808 = vmatpush3.bf16.msra.mxu1 %v7281_v6  ;;  %5729 = vmatprep.subr.bf16.mxu0 %v7140_v1  ;;  %v7892_v6 = vpack.c.bf16 %v4615_v5, %v4615_v5  ;;  %v8115_v5 = vld [vmem:[%s9301_s1 + $0xd8] sm:$0xff]  }
  0x99   : > { %5809 = vmatprep.subr.bf16.mxu1 %v7140_v1 }
  0x9b   : > { %5730 = vmatpush3.bf16.msra.mxu0 %v7289_v7  ;;  %v9321_v7 = vld [vmem:[#allocation5_spill] sm:$0xff] }
  0x9c   : > { %5810 = vmatpush3.bf16.msra.mxu1 %v7296_v8  ;;  %5731 = vmatprep.subr.bf16.mxu0 %v7140_v1  ;;  %v7917_v8 = vld [vmem:[%s9301_s1 + $0x70] sm:$0xff]  }
  0x9d   : > { %5811 = vmatprep.subr.bf16.mxu1 %v7140_v1 }
  0x9f   : > { %5732 = vmatpush3.bf16.msra.mxu0 %v7303_v9  ;;  %v7923_v9 = vld [vmem:[%s9301_s1 + $0xa0] sm:$0xff]  }
  0xa0   : > { %5812 = vmatpush3.bf16.msra.mxu1 %v7310_v10  ;;  %5733 = vmatprep.subr.bf16.mxu0 %v7140_v1  ;;  %v7931_v10 = vld [vmem:[%s9301_s1 + $0x78] sm:$0xff]  }
  0xa1   : > { %5813 = vmatprep.subr.bf16.mxu1 %v7140_v1 }
  0xa3   : > { %5734 = vmatpush3.bf16.msra.mxu0 %v7321_v11  ;;  %v7937_v11 = vld [vmem:[%s9301_s1 + $0xa8] sm:$0xff]  }
  0xa4   : > { %5814 = vmatpush3.bf16.msra.mxu1 %v7330_v13  ;;  %5739 = vmatprep.subr.bf16.mxu0 %v7140_v1  ;;  %v7945_v13 = vld [vmem:[%s9301_s1 + $0x80] sm:$0xff]  }
  0xa5   : > { %5819 = vmatprep.subr.bf16.mxu1 %v7140_v1 }
  0xa6   : > { %5736 = vmatmul.mubr.msk.bf16.vlgmr.msra.gmra.mrb[4].mxu0 %vm465_vm1, %v7524_v43 }
  0xa7   : > { %5740 = vmatpush3.bf16.msra.mxu0 %v7339_v15  ;;  %5816 = vmatmul.mubr.msk.bf16.vlgmr.msra.gmra.mrb[4].mxu1 %vm465_vm1, %v7524_v43  ;;  %v7959_v15 = vld [vmem:[%s9301_s1 + $0x88] sm:$0xff]  }
  0xa8   : > { %5820 = vmatpush3.bf16.msra.mxu1 %v7346_v16  ;;  %5741 = vmatprep.subr.bf16.mxu0 %v7140_v1  ;;  %v7965_v16 = vld [vmem:[%s9301_s1 + $0xb8] sm:$0xff]  }
  0xa9   : > { %5821 = vmatprep.subr.bf16.mxu1 %v7140_v1  ;;  %5751 = vmatprep.mubr.msk.bf16.mxu0 %vm7141_vm0, %v7140_v1 }
  0xaa   : > { %5831 = vmatprep.mubr.msk.bf16.mxu1 %vm7141_vm0, %v7140_v1 }
  0xab   : > { %5742 = vmatpush3.bf16.msra.mxu0 %v7357_v17  ;;  %v7975_v17 = vld [vmem:[%s9301_s1] sm:$0xff]  }
  0xac   : > { %5822 = vmatpush3.bf16.msra.mxu1 %v7364_v18  ;;  %5743 = vmatprep.subr.bf16.mxu0 %v7140_v1  ;;  %v7983_v18 = vld [vmem:[%s9301_s1 + $0x30] sm:$0xff]  }
  0xad   : > { %5823 = vmatprep.subr.bf16.mxu1 %v7140_v1 }
  0xaf   : > { %5744 = vmatpush3.bf16.msra.mxu0 %v7375_v19  ;;  %v7995_v19 = vld [vmem:[%s9301_s1 + $0x8] sm:$0xff]  }
  0xb0   : > { %5824 = vmatpush3.bf16.msra.mxu1 %v7382_v20  ;;  %5745 = vmatprep.subr.bf16.mxu0 %v7140_v1  ;;  %v8001_v20 = vld [vmem:[%s9301_s1 + $0x38] sm:$0xff]  }
  0xb1   : > { %5825 = vmatprep.subr.bf16.mxu1 %v7140_v1 }
  0xb3   : > { %5746 = vmatpush3.bf16.msra.mxu0 %v7389_v21  ;;  %v8009_v21 = vld [vmem:[%s9301_s1 + $0x10] sm:$0xff]  }
  0xb4   : > { %5826 = vmatpush3.bf16.msra.mxu1 %v7396_v22  ;;  %5747 = vmatprep.subr.bf16.mxu0 %v7140_v1  ;;  %v8015_v22 = vld [vmem:[%s9301_s1 + $0x40] sm:$0xff]  }
  0xb5   : > { %5827 = vmatprep.subr.bf16.mxu1 %v7140_v1 }
  0xb7   : > { %5748 = vmatpush3.bf16.msra.mxu0 %v7403_v23  ;;  %v8023_v23 = vld [vmem:[%s9301_s1 + $0x18] sm:$0xff]  }
  0xb8   : > { %5828 = vmatpush3.bf16.msra.mxu1 %v7410_v24  ;;  %5749 = vmatprep.subr.bf16.mxu0 %v7140_v1  ;;  %v8029_v24 = vld [vmem:[%s9301_s1 + $0x48] sm:$0xff]  }
  0xb9   : > { %5829 = vmatprep.subr.bf16.mxu1 %v7140_v1 }
  0xbb   : > { %5750 = vmatpush3.bf16.msra.mxu0 %v7416_v25  ;;  %v8037_v25 = vld [vmem:[%s9301_s1 + $0x20] sm:$0xff]  }
  0xbc   : > { %5830 = vmatpush3.bf16.msra.mxu1 %v7425_v27  ;;  %5755 = vmatprep.subr.bf16.mxu0 %v7140_v1  ;;  %v8043_v27 = vld [vmem:[%s9301_s1 + $0x50] sm:$0xff]  }
  0xbd   : > { %5835 = vmatprep.subr.bf16.mxu1 %v7140_v1 }
  0xbe   : > { %5752 = vmatmul.mubr.msk.bf16.vlgmr.msra.gmra.mrb[4].mxu0 %vm465_vm1, %v7333_v14 }
  0xbf   : > { %5756 = vmatpush3.bf16.msra.mxu0 %v7432_v29  ;;  %5832 = vmatmul.mubr.msk.bf16.vlgmr.msra.gmra.mrb[4].mxu1 %vm465_vm1, %v7333_v14  ;;  %v7951_v14 = vld [vmem:[%s9301_s1 + $0xb0] sm:$0xff]   ;;  %v8051_v29 = vld [vmem:[%s9301_s1 + $0x28] sm:$0xff]  }
  0xc0   : > { %5836 = vmatpush3.bf16.msra.mxu1 %v7439_v30  ;;  %5757 = vmatprep.subr.bf16.mxu0 %v7140_v1  ;;  %v8057_v30 = vld [vmem:[%s9301_s1 + $0x58] sm:$0xff]  }
  0xc1   : > { %5837 = vmatprep.subr.bf16.mxu1 %v7140_v1  ;;  %5767 = vmatprep.mubr.msk.bf16.mxu0 %vm7141_vm0, %v7140_v1 }
  0xc2   : > { %5847 = vmatprep.mubr.msk.bf16.mxu1 %vm7141_vm0, %v7140_v1 }
  0xc3   : > { %5758 = vmatpush3.bf16.msra.mxu0 %v7448_v31  ;;  %v8067_v31 = vld [vmem:[%s9301_s1 + $0xc0] sm:$0xff]  }
  0xc4   : > { %5838 = vmatpush3.bf16.msra.mxu1 %v7455_v32  ;;  %5759 = vmatprep.subr.bf16.mxu0 %v7140_v1  ;;  %v8075_v32 = vld [vmem:[%s9301_s1 + $0xf0] sm:$0xff]  }
  0xc5   : > { %5839 = vmatprep.subr.bf16.mxu1 %v7140_v1 }
  0xc7   : > { %5760 = vmatpush3.bf16.msra.mxu0 %v7466_v33  ;;  %v8087_v33 = vld [vmem:[%s9301_s1 + $0xc8] sm:$0xff]  }
  0xc8   : > { %5840 = vmatpush3.bf16.msra.mxu1 %v7473_v34  ;;  %5761 = vmatprep.subr.bf16.mxu0 %v7140_v1  ;;  %v8093_v34 = vld [vmem:[%s9301_s1 + $0xf8] sm:$0xff]  }
  0xc9   : > { %5841 = vmatprep.subr.bf16.mxu1 %v7140_v1 }
  0xcb   : > { %5762 = vmatpush3.bf16.msra.mxu0 %v7480_v35  ;;  %v8101_v35 = vld [vmem:[%s9301_s1 + $0xd0] sm:$0xff]  }
  0xcc   : > { %5842 = vmatpush3.bf16.msra.mxu1 %v7487_v36  ;;  %5763 = vmatprep.subr.bf16.mxu0 %v7140_v1 }
  0xcd   : > { %5843 = vmatprep.subr.bf16.mxu1 %v7140_v1 }
  0xcf   : > { %5764 = vmatpush3.bf16.msra.mxu0 %v7493_v37 }
  0xd0   : > { %5844 = vmatpush3.bf16.msra.mxu1 %v7498_v38  ;;  %5765 = vmatprep.subr.bf16.mxu0 %v7140_v1 }
  0xd1   : > { %5845 = vmatprep.subr.bf16.mxu1 %v7140_v1 }
  0xd3   : > { %5766 = vmatpush3.bf16.msra.mxu0 %v7507_v39 }
  0xd4   : > { %5846 = vmatpush3.bf16.msra.mxu1 %v7513_v41  ;;  %5771 = vmatprep.subr.bf16.mxu0 %v7140_v1 }
  0xd5   : > { %5851 = vmatprep.subr.bf16.mxu1 %v7140_v1 }
  0xd6   : > { %5768 = vmatmul.mubr.msk.bf16.vlgmr.msra.gmra.mrb[4].mxu0 %vm465_vm1, %v7619_v57 }
  0xd7   : > { %5772 = vmatpush3.bf16.msra.mxu0 %v7522_v42  ;;  %5848 = vmatmul.mubr.msk.bf16.vlgmr.msra.gmra.mrb[4].mxu1 %vm465_vm1, %v7619_v57 }
  0xd8   : > { %5852 = vmatpush3.bf16.msra.mxu1 %v7529_v44  ;;  %5773 = vmatprep.subr.bf16.mxu0 %v7140_v1 }
  0xd9   : > { %5853 = vmatprep.subr.bf16.mxu1 %v7140_v1  ;;  %5783 = vmatprep.mubr.msk.bf16.mxu0 %vm7141_vm0, %v7140_v1 }
  0xda   : > { %5863 = vmatprep.mubr.msk.bf16.mxu1 %vm7141_vm0, %v7140_v1 }
  0xdb   : > { %5774 = vmatpush3.bf16.msra.mxu0 %v7538_v45 }
  0xdc   : > { %5854 = vmatpush3.bf16.msra.mxu1 %v7545_v46  ;;  %5775 = vmatprep.subr.bf16.mxu0 %v7140_v1 }
  0xdd   : > { %5855 = vmatprep.subr.bf16.mxu1 %v7140_v1 }
  0xdf   : > { %5776 = vmatpush3.bf16.msra.mxu0 %v7556_v47 }
  0xe0   : > { %5856 = vmatpush3.bf16.msra.mxu1 %v7563_v48  ;;  %5777 = vmatprep.subr.bf16.mxu0 %v7140_v1 }
  0xe1   : > { %5857 = vmatprep.subr.bf16.mxu1 %v7140_v1 }
  0xe3   : > { %5778 = vmatpush3.bf16.msra.mxu0 %v7574_v49 }
  0xe4   : > { %5858 = vmatpush3.bf16.msra.mxu1 %v7579_v50  ;;  %5779 = vmatprep.subr.bf16.mxu0 %v7140_v1 }
  0xe5   : > { %5859 = vmatprep.subr.bf16.mxu1 %v7140_v1 }
  0xe7   : > { %5780 = vmatpush3.bf16.msra.mxu0 %v7588_v51 }
  0xe8   : > { %5860 = vmatpush3.bf16.msra.mxu1 %v7593_v52  ;;  %5781 = vmatprep.subr.bf16.mxu0 %v7140_v1 }
  0xe9   : > { %5861 = vmatprep.subr.bf16.mxu1 %v7140_v1 }
  0xeb   : > { %5782 = vmatpush3.bf16.msra.mxu0 %v7602_v53 }
  0xec   : > { %5862 = vmatpush3.bf16.msra.mxu1 %v7608_v55  ;;  %5787 = vmatprep.subr.bf16.mxu0 %v7140_v1 }
  0xed   : > { %5867 = vmatprep.subr.bf16.mxu1 %v7140_v1 }
  0xee   : > { %5784 = vmatmul.mubr.msk.bf16.vlgmr.msra.gmra.mrb[4].mxu0 %vm465_vm1, %v7709_v28 }
  0xef   : > { %5788 = vmatpush3.bf16.msra.mxu0 %v7617_v56  ;;  %5864 = vmatmul.mubr.msk.bf16.vlgmr.msra.gmra.mrb[4].mxu1 %vm465_vm1, %v7709_v28 }
  0xf0   : > { %5868 = vmatpush3.bf16.msra.mxu1 %v7624_v58  ;;  %5789 = vmatprep.subr.bf16.mxu0 %v7140_v1 }
  0xf1   : > { %5869 = vmatprep.subr.bf16.mxu1 %v7140_v1  ;;  %5799 = vmatprep.mubr.msk.bf16.mxu0 %vm7141_vm0, %v7140_v1 }
  0xf2   : > { %5879 = vmatprep.mubr.msk.bf16.mxu1 %vm7141_vm0, %v7140_v1 }
  0xf3   : > { %5790 = vmatpush3.bf16.msra.mxu0 %v7633_v59 }
  0xf4   : > { %5870 = vmatpush3.bf16.msra.mxu1 %v7640_v60  ;;  %5791 = vmatprep.subr.bf16.mxu0 %v7140_v1 }
  0xf5   : > { %5871 = vmatprep.subr.bf16.mxu1 %v7140_v1 }
  0xf7   : > { %5792 = vmatpush3.bf16.msra.mxu0 %v7651_v61 }
  0xf8   : > { %5872 = vmatpush3.bf16.msra.mxu1 %v7658_v62  ;;  %5793 = vmatprep.subr.bf16.mxu0 %v7140_v1 }
  0xf9   : > { %5873 = vmatprep.subr.bf16.mxu1 %v7140_v1 }
  0xfb   : > { %5794 = vmatpush3.bf16.msra.mxu0 %v7669_v63 }
  0xfc   : > { %5874 = vmatpush3.bf16.msra.mxu1 %v7674_v0  ;;  %5795 = vmatprep.subr.bf16.mxu0 %v7140_v1 }
  0xfd   : > { %5875 = vmatprep.subr.bf16.mxu1 %v7140_v1 }
  0xff   : > { %5796 = vmatpush3.bf16.msra.mxu0 %v7683_v2 }
 0x100   : > { %5876 = vmatpush3.bf16.msra.mxu1 %v7691_v3  ;;  %5797 = vmatprep.subr.bf16.mxu0 %v7140_v1 }
 0x101   : > { %5877 = vmatprep.subr.bf16.mxu1 %v7140_v1 }
 0x103   : > { %5798 = vmatpush3.bf16.msra.mxu0 %v7697_v4 }
 0x104   : > { %5878 = vmatpush3.bf16.msra.mxu1 %v7703_v26  ;;  %5883 = vmatprep.subr.bf16.mxu0 %v7140_v1 }
 0x105   : > { %5963 = vmatprep.subr.bf16.mxu1 %v7140_v1 }
 0x106   : > { %5800 = vmatmul.mubr.msk.bf16.vlgmr.msra.gmra.mrb[4].mxu0 %vm465_vm1, %v7892_v6 }
 0x107   : > { %5880 = vmatmul.mubr.msk.bf16.vlgmr.msra.gmra.mrb[4].mxu1 %vm465_vm1, %v7892_v6  ;;  %5884 = vmatpush3.bf16.msra.mxu0 %v7722_v40 }
 0x108   : > { %5964 = vmatpush3.bf16.msra.mxu1 %v9321_v7  ;;  %5885 = vmatprep.subr.bf16.mxu0 %v7140_v1 }
 0x109   : > { %5965 = vmatprep.subr.bf16.mxu1 %v7140_v1  ;;  %5895 = vmatprep.mubr.msk.bf16.mxu0 %vm7141_vm0, %v7140_v1 }
 0x10a   : > { %5975 = vmatprep.mubr.msk.bf16.mxu1 %vm7141_vm0, %v7140_v1 }
 0x10b   : > { %5886 = vmatpush3.bf16.msra.mxu0 %v7740_v12 }
 0x10c   : > { %5966 = vmatpush3.bf16.msra.mxu1 %v7746_v54  ;;  %5887 = vmatprep.subr.bf16.mxu0 %v7140_v1 }
 0x10d   : > { %5967 = vmatprep.subr.bf16.mxu1 %v7140_v1 }
 0x10f   : > { %5888 = vmatpush3.bf16.msra.mxu0 %v7917_v8 }
 0x110   : > { %5968 = vmatpush3.bf16.msra.mxu1 %v7923_v9  ;;  %5889 = vmatprep.subr.bf16.mxu0 %v7140_v1 }
 0x111   : > { %5969 = vmatprep.subr.bf16.mxu1 %v7140_v1 }
 0x113   : > { %5890 = vmatpush3.bf16.msra.mxu0 %v7931_v10 }
 0x114   : > { %5970 = vmatpush3.bf16.msra.mxu1 %v7937_v11  ;;  %5891 = vmatprep.subr.bf16.mxu0 %v7140_v1 }
 0x115   : > { %5971 = vmatprep.subr.bf16.mxu1 %v7140_v1 }
 0x117   : > { %5892 = vmatpush3.bf16.msra.mxu0 %v7945_v13 }
 0x118   : > { %5972 = vmatpush3.bf16.msra.mxu1 %v7951_v14  ;;  %5893 = vmatprep.subr.bf16.mxu0 %v7140_v1 }
 0x119   : > { %5973 = vmatprep.subr.bf16.mxu1 %v7140_v1 }
 0x11b   : > { %5894 = vmatpush3.bf16.msra.mxu0 %v7959_v15 }
 0x11c   : > { %5974 = vmatpush3.bf16.msra.mxu1 %v7965_v16  ;;  %5899 = vmatprep.subr.bf16.mxu0 %v7140_v1 }
 0x11d   : > { %5979 = vmatprep.subr.bf16.mxu1 %v7140_v1 }
 0x11e   : > { %5896 = vmatmul.mubr.msk.bf16.vlgmr.msra.gmra.mrb[8].mxu0 %vm465_vm1, %v7619_v57 }
 0x11f   : > { %5900 = vmatpush3.bf16.msra.mxu0 %v7975_v17  ;;  %5976 = vmatmul.mubr.msk.bf16.vlgmr.msra.gmra.mrb[8].mxu1 %vm465_vm1, %v7619_v57 }
 0x120   : > { %5980 = vmatpush3.bf16.msra.mxu1 %v7983_v18  ;;  %5901 = vmatprep.subr.bf16.mxu0 %v7140_v1 }
 0x121   : > { %5981 = vmatprep.subr.bf16.mxu1 %v7140_v1  ;;  %5911 = vmatprep.mubr.msk.bf16.mxu0 %vm7141_vm0, %v7140_v1 }
 0x122   : > { %5991 = vmatprep.mubr.msk.bf16.mxu1 %vm7141_vm0, %v7140_v1 }
 0x123   : > { %5902 = vmatpush3.bf16.msra.mxu0 %v7995_v19 }
 0x124   : > { %5982 = vmatpush3.bf16.msra.mxu1 %v8001_v20  ;;  %5903 = vmatprep.subr.bf16.mxu0 %v7140_v1 }
 0x125   : > { %5983 = vmatprep.subr.bf16.mxu1 %v7140_v1 }
 0x127   : > { %5904 = vmatpush3.bf16.msra.mxu0 %v8009_v21 }
 0x128   : > { %5984 = vmatpush3.bf16.msra.mxu1 %v8015_v22  ;;  %5905 = vmatprep.subr.bf16.mxu0 %v7140_v1 }
 0x129   : > { %5985 = vmatprep.subr.bf16.mxu1 %v7140_v1 }
 0x12b   : > { %5906 = vmatpush3.bf16.msra.mxu0 %v8023_v23 }
 0x12c   : > { %5986 = vmatpush3.bf16.msra.mxu1 %v8029_v24  ;;  %5907 = vmatprep.subr.bf16.mxu0 %v7140_v1 }
 0x12d   : > { %5987 = vmatprep.subr.bf16.mxu1 %v7140_v1 }
 0x12f   : > { %5908 = vmatpush3.bf16.msra.mxu0 %v8037_v25 }
 0x130   : > { %5988 = vmatpush3.bf16.msra.mxu1 %v8043_v27  ;;  %5909 = vmatprep.subr.bf16.mxu0 %v7140_v1 }
 0x131   : > { %5989 = vmatprep.subr.bf16.mxu1 %v7140_v1 }
 0x133   : > { %5910 = vmatpush3.bf16.msra.mxu0 %v8051_v29 }
 0x134   : > { %5990 = vmatpush3.bf16.msra.mxu1 %v8057_v30  ;;  %5915 = vmatprep.subr.bf16.mxu0 %v7140_v1 }
 0x135   : > { %5995 = vmatprep.subr.bf16.mxu1 %v7140_v1 }
 0x136   : > { %5912 = vmatmul.mubr.msk.bf16.vlgmr.msra.gmra.mrb[8].mxu0 %vm465_vm1, %v7524_v43 }
 0x137   : > { %5916 = vmatpush3.bf16.msra.mxu0 %v8067_v31  ;;  %5992 = vmatmul.mubr.msk.bf16.vlgmr.msra.gmra.mrb[8].mxu1 %vm465_vm1, %v7524_v43  ;;  %v8107_v43 = vld [vmem:[%s9301_s1 + $0x100] sm:$0xff]  }
 0x138   : > { %5996 = vmatpush3.bf16.msra.mxu1 %v8075_v32  ;;  %5917 = vmatprep.subr.bf16.mxu0 %v7140_v1 }
 0x139   : > { %5997 = vmatprep.subr.bf16.mxu1 %v7140_v1  ;;  %5927 = vmatprep.mubr.msk.bf16.mxu0 %vm7141_vm0, %v7140_v1 }
 0x13a   : > { %6007 = vmatprep.mubr.msk.bf16.mxu1 %vm7141_vm0, %v7140_v1 }
 0x13b   : > { %5918 = vmatpush3.bf16.msra.mxu0 %v8087_v33 }
 0x13c   : > { %5998 = vmatpush3.bf16.msra.mxu1 %v8093_v34  ;;  %5919 = vmatprep.subr.bf16.mxu0 %v7140_v1 }
 0x13d   : > { %5999 = vmatprep.subr.bf16.mxu1 %v7140_v1 }
 0x13f   : > { %5920 = vmatpush3.bf16.msra.mxu0 %v8101_v35 }
 0x140   : > { %6000 = vmatpush3.bf16.msra.mxu1 %v8107_v43  ;;  %5921 = vmatprep.subr.bf16.mxu0 %v7140_v1 }
 0x141   : > { %6001 = vmatprep.subr.bf16.mxu1 %v7140_v1 }
 0x143   : > { %5922 = vmatpush3.bf16.msra.mxu0 %v8115_v5 }
 0x144   : > { %6002 = vmatpush3.bf16.msra.mxu1 %v7487_v36  ;;  %5923 = vmatprep.subr.bf16.mxu0 %v7140_v1 }
 0x145   : > { %6003 = vmatprep.subr.bf16.mxu1 %v7140_v1 }
 0x147   : > { %5924 = vmatpush3.bf16.msra.mxu0 %v7493_v37 }
 0x148   : > { %6004 = vmatpush3.bf16.msra.mxu1 %v7498_v38  ;;  %5925 = vmatprep.subr.bf16.mxu0 %v7140_v1 }
 0x149   : > { %6005 = vmatprep.subr.bf16.mxu1 %v7140_v1 }
 0x14b   : > { %5926 = vmatpush3.bf16.msra.mxu0 %v7507_v39 }
 0x14c   : > { %6006 = vmatpush3.bf16.msra.mxu1 %v7513_v41  ;;  %5931 = vmatprep.subr.bf16.mxu0 %v7140_v1 }
 0x14d   : > { %6011 = vmatprep.subr.bf16.mxu1 %v7140_v1 }
 0x14e   : > { %5928 = vmatmul.mubr.msk.bf16.vlgmr.msra.gmra.mrb[8].mxu0 %vm465_vm1, %v7709_v28 }
 0x14f   : > { %5932 = vmatpush3.bf16.msra.mxu0 %v7522_v42  ;;  %6008 = vmatmul.mubr.msk.bf16.vlgmr.msra.gmra.mrb[8].mxu1 %vm465_vm1, %v7709_v28 }
 0x150   : > { %6012 = vmatpush3.bf16.msra.mxu1 %v7529_v44  ;;  %5933 = vmatprep.subr.bf16.mxu0 %v7140_v1 }
 0x151   : > { %6013 = vmatprep.subr.bf16.mxu1 %v7140_v1  ;;  %5943 = vmatprep.mubr.msk.bf16.mxu0 %vm7141_vm0, %v7140_v1 }
 0x152   : > { %6023 = vmatprep.mubr.msk.bf16.mxu1 %vm7141_vm0, %v7140_v1 }
 0x153   : > { %5934 = vmatpush3.bf16.msra.mxu0 %v7538_v45 }
 0x154   : > { %6014 = vmatpush3.bf16.msra.mxu1 %v7545_v46  ;;  %5935 = vmatprep.subr.bf16.mxu0 %v7140_v1 }
 0x155   : > { %6015 = vmatprep.subr.bf16.mxu1 %v7140_v1 }
 0x157   : > { %5936 = vmatpush3.bf16.msra.mxu0 %v7556_v47  ;;  %v4616_v47 = vld [vmem:[%s7315_s12 + $0x11] sm:$0x7f] }
 0x158   : > { %6016 = vmatpush3.bf16.msra.mxu1 %v7563_v48  ;;  %5937 = vmatprep.subr.bf16.mxu0 %v7140_v1  ;;  %v8196_v48 = vpack.c.bf16 %v4616_v47, %v4616_v47 }
 0x159   : > { %6017 = vmatprep.subr.bf16.mxu1 %v7140_v1 }
 0x15b   : > { %5938 = vmatpush3.bf16.msra.mxu0 %v7574_v49  ;;  %v7052_v49 = vld [vmem:[%s9301_s1 + $0x108] sm:$0xff]  }
 0x15c   : > { %6018 = vmatpush3.bf16.msra.mxu1 %v7579_v50  ;;  %5939 = vmatprep.subr.bf16.mxu0 %v7140_v1  ;;  %v7053_v50 = vld [vmem:[%s9301_s1 + $0xe0] sm:$0xff]  }
 0x15d   : > { %6019 = vmatprep.subr.bf16.mxu1 %v7140_v1 }
 0x15f   : > { %5940 = vmatpush3.bf16.msra.mxu0 %v7588_v51  ;;  %v7054_v51 = vld [vmem:[%s9301_s1 + $0x110] sm:$0xff]  }
 0x160   : > { %6020 = vmatpush3.bf16.msra.mxu1 %v7593_v52  ;;  %5941 = vmatprep.subr.bf16.mxu0 %v7140_v1  ;;  %v7055_v52 = vld [vmem:[%s9301_s1 + $0xe8] sm:$0xff]  }
 0x161   : > { %v8156_v36 = vpop.f32.mrb[0].mxu0  ;;  %6021 = vmatprep.subr.bf16.mxu1 %v7140_v1 }
 0x162   : > { %v8159_v37 = vpop.f32.mrb[0].mxu1  ;;  %v5641_v38 = vpop.f32.mrb[1].mxu0 }
 0x163   : > { %v1724_v39 = vmax.f32 %v8156_v36, %v8159_v37  ;;  %v5721_v41 = vpop.f32.mrb[1].mxu1  ;;  %v863_v42 = vpop.f32.mrb[2].mxu0  ;;  %5942 = vmatpush3.bf16.msra.mxu0 %v7602_v53  ;;  %v7056_v53 = vld [vmem:[%s9301_s1 + $0x118] sm:$0xff]  }
 0x164   : > { %v1311_v44 = vpop.f32.mrb[2].mxu1  ;;  %6022 = vmatpush3.bf16.msra.mxu1 %v7608_v55  ;;  %v5642_v45 = vpop.f32.mrb[3].mxu0  ;;  %5947 = vmatprep.subr.bf16.mxu0 %v7140_v1  ;;  %v7057_v55 = vld [vmem:[%s9301_s1 + $0x120] sm:$0xff]  }
 0x165   : > { %v5722_v46 = vpop.f32.mrb[3].mxu1  ;;  %6027 = vmatprep.subr.bf16.mxu1 %v7140_v1 }
 0x166   : > { %5944 = vmatmul.mubr.msk.bf16.vlgmr.msra.gmra.mrb[8].mxu0 %vm465_vm1, %v7892_v6 }
 0x167   : > { %5948 = vmatpush3.bf16.msra.mxu0 %v7617_v56  ;;  %6024 = vmatmul.mubr.msk.bf16.vlgmr.msra.gmra.mrb[8].mxu1 %vm465_vm1, %v7892_v6  ;;  %v7058_v56 = vld [vmem:[%s9301_s1 + $0x150] sm:$0xff]  }
 0x168   : > { %6028 = vmatpush3.bf16.msra.mxu1 %v7624_v58  ;;  %5949 = vmatprep.subr.bf16.mxu0 %v7140_v1  ;;  %v7060_v58 = vld [vmem:[%s9301_s1 + $0x158] sm:$0xff]  }
 0x169   : > { %6029 = vmatprep.subr.bf16.mxu1 %v7140_v1  ;;  %5959 = vmatprep.mubr.msk.bf16.mxu0 %vm7141_vm0, %v7140_v1 }
 0x16a   : > { %6039 = vmatprep.mubr.msk.bf16.mxu1 %vm7141_vm0, %v7140_v1 }
 0x16b   : > { %5950 = vmatpush3.bf16.msra.mxu0 %v7633_v59  ;;  %v7061_v59 = vld [vmem:[%s9301_s1 + $0x130] sm:$0xff]  }
 0x16c   : > { %6030 = vmatpush3.bf16.msra.mxu1 %v7640_v60  ;;  %5951 = vmatprep.subr.bf16.mxu0 %v7140_v1  ;;  %v7062_v60 = vld [vmem:[%s9301_s1 + $0x160] sm:$0xff]  }
 0x16d   : > { %6031 = vmatprep.subr.bf16.mxu1 %v7140_v1 }
 0x16f   : > { %5952 = vmatpush3.bf16.msra.mxu0 %v7651_v61  ;;  %v7063_v61 = vld [vmem:[%s9301_s1 + $0x138] sm:$0xff]  }
 0x170   : > { %6032 = vmatpush3.bf16.msra.mxu1 %v7658_v62  ;;  %5953 = vmatprep.subr.bf16.mxu0 %v7140_v1  ;;  %v7064_v62 = vld [vmem:[%s9301_s1 + $0x168] sm:$0xff]  }
 0x171   : > { %6033 = vmatprep.subr.bf16.mxu1 %v7140_v1 }
 0x173   : > { %5954 = vmatpush3.bf16.msra.mxu0 %v7669_v63  ;;  %v7065_v63 = vld [vmem:[%s9301_s1 + $0x140] sm:$0xff]  }
 0x174   : > { %6034 = vmatpush3.bf16.msra.mxu1 %v7674_v0  ;;  %5955 = vmatprep.subr.bf16.mxu0 %v7140_v1 }
 0x175   : > { %6035 = vmatprep.subr.bf16.mxu1 %v7140_v1 }
 0x177   : > { %5956 = vmatpush3.bf16.msra.mxu0 %v7683_v2 }
 0x178   : > { %6036 = vmatpush3.bf16.msra.mxu1 %v7691_v3  ;;  %5957 = vmatprep.subr.bf16.mxu0 %v7140_v1 }
 0x179   : > { %6037 = vmatprep.subr.bf16.mxu1 %v7140_v1 }
 0x17b   : > { %5958 = vmatpush3.bf16.msra.mxu0 %v7697_v4 }
 0x17c   : > { %6038 = vmatpush3.bf16.msra.mxu1 %v7703_v26  ;;  %6043 = vmatprep.subr.bf16.mxu0 %v7140_v1 }
 0x17d   : > { %6123 = vmatprep.subr.bf16.mxu1 %v7140_v1 }
 0x17e   : > { %5960 = vmatmul.mubr.msk.bf16.vlgmr.msra.gmra.mrb[8].mxu0 %vm465_vm1, %v8196_v48 }
 0x17f   : > { %6040 = vmatmul.mubr.msk.bf16.vlgmr.msra.gmra.mrb[8].mxu1 %vm465_vm1, %v8196_v48  ;;  %6044 = vmatpush3.bf16.msra.mxu0 %v7722_v40 }
 0x180   : > { %6124 = vmatpush3.bf16.msra.mxu1 %v9321_v7  ;;  %6045 = vmatprep.subr.bf16.mxu0 %v7140_v1 }
 0x181   : > { %6125 = vmatprep.subr.bf16.mxu1 %v7140_v1  ;;  %6055 = vmatprep.mubr.msk.bf16.mxu0 %vm7141_vm0, %v7140_v1 }
 0x182   : > { %6135 = vmatprep.mubr.msk.bf16.mxu1 %vm7141_vm0, %v7140_v1 }
 0x183   : > { %6046 = vmatpush3.bf16.msra.mxu0 %v7740_v12 }
 0x184   : > { %6126 = vmatpush3.bf16.msra.mxu1 %v7746_v54  ;;  %6047 = vmatprep.subr.bf16.mxu0 %v7140_v1 }
 0x185   : > { %6127 = vmatprep.subr.bf16.mxu1 %v7140_v1 }
 0x187   : > { %6048 = vmatpush3.bf16.msra.mxu0 %v7917_v8 }
 0x188   : > { %6128 = vmatpush3.bf16.msra.mxu1 %v7923_v9  ;;  %6049 = vmatprep.subr.bf16.mxu0 %v7140_v1  ;;  %v7067_v9 = vld [vmem:[%s9301_s1 + $0x148] sm:$0xff]  }
 0x189   : > { %6129 = vmatprep.subr.bf16.mxu1 %v7140_v1 }
 0x18b   : > { %6050 = vmatpush3.bf16.msra.mxu0 %v7931_v10 }
 0x18c   : > { %6130 = vmatpush3.bf16.msra.mxu1 %v7937_v11  ;;  %6051 = vmatprep.subr.bf16.mxu0 %v7140_v1  ;;  %v7068_v11 = vld [vmem:[%s9301_s1 + $0x178] sm:$0xff]  }
 0x18d   : > { %6131 = vmatprep.subr.bf16.mxu1 %v7140_v1 }
 0x18f   : > { %6052 = vmatpush3.bf16.msra.mxu0 %v7945_v13 }
 0x190   : > { %6132 = vmatpush3.bf16.msra.mxu1 %v7951_v14  ;;  %6053 = vmatprep.subr.bf16.mxu0 %v7140_v1 }
 0x191   : > { %6133 = vmatprep.subr.bf16.mxu1 %v7140_v1 }
 0x193   : > { %6054 = vmatpush3.bf16.msra.mxu0 %v7959_v15 }
 0x194   : > { %6134 = vmatpush3.bf16.msra.mxu1 %v7965_v16  ;;  %6059 = vmatprep.subr.bf16.mxu0 %v7140_v1  ;;  %v7069_v16 = vld [vmem:[%s9301_s1 + $0x180] sm:$0xff]  }
 0x195   : > { %6139 = vmatprep.subr.bf16.mxu1 %v7140_v1 }
 0x196   : > { %6056 = vmatmul.mubr.msk.bf16.vlgmr.msra.gmra.mrb[12].mxu0 %vm465_vm1, %v7709_v28 }
 0x197   : > { %6060 = vmatpush3.bf16.msra.mxu0 %v7975_v17  ;;  %6136 = vmatmul.mubr.msk.bf16.vlgmr.msra.gmra.mrb[12].mxu1 %vm465_vm1, %v7709_v28  ;;  %v7066_v28 = vld [vmem:[%s9301_s1 + $0x170] sm:$0xff]  }
 0x198   : > { %6140 = vmatpush3.bf16.msra.mxu1 %v7983_v18  ;;  %6061 = vmatprep.subr.bf16.mxu0 %v7140_v1  ;;  %v7070_v17 = vld [vmem:[%s9301_s1 + $0x1b0] sm:$0xff]   ;;  %v7071_v18 = vld [vmem:[%s9301_s1 + $0x188] sm:$0xff]  }
 0x199   : > { %6141 = vmatprep.subr.bf16.mxu1 %v7140_v1  ;;  %6071 = vmatprep.mubr.msk.bf16.mxu0 %vm7141_vm0, %v7140_v1 }
 0x19a   : > { %6151 = vmatprep.mubr.msk.bf16.mxu1 %vm7141_vm0, %v7140_v1 }
 0x19b   : > { %6062 = vmatpush3.bf16.msra.mxu0 %v7995_v19  ;;  %v7072_v19 = vld [vmem:[%s9301_s1 + $0x1b8] sm:$0xff]  }
 0x19c   : > { %6142 = vmatpush3.bf16.msra.mxu1 %v8001_v20  ;;  %6063 = vmatprep.subr.bf16.mxu0 %v7140_v1  ;;  %v7073_v20 = vld [vmem:[%s9301_s1 + $0x190] sm:$0xff]  }
 0x19d   : > { %6143 = vmatprep.subr.bf16.mxu1 %v7140_v1 }
 0x19f   : > { %6064 = vmatpush3.bf16.msra.mxu0 %v8009_v21  ;;  %v7074_v21 = vld [vmem:[%s9301_s1 + $0x1c0] sm:$0xff]  }
 0x1a0   : > { %6144 = vmatpush3.bf16.msra.mxu1 %v8015_v22  ;;  %6065 = vmatprep.subr.bf16.mxu0 %v7140_v1  ;;  %v7075_v22 = vld [vmem:[%s9301_s1 + $0x198] sm:$0xff]  }
 0x1a1   : > { %6145 = vmatprep.subr.bf16.mxu1 %v7140_v1 }
 0x1a3   : > { %6066 = vmatpush3.bf16.msra.mxu0 %v8023_v23  ;;  %v4617_v23 = vld [vmem:[%s7315_s12 + $0x19] sm:$0x7f] }
 0x1a4   : > { %6146 = vmatpush3.bf16.msra.mxu1 %v8029_v24  ;;  %6067 = vmatprep.subr.bf16.mxu0 %v7140_v1  ;;  %v403_v24 = vpack.c.bf16 %v4617_v23, %v4617_v23  ;;  %v8666_v23 = vld [vmem:[%s9303_s3 + $0xf4] sm:$0xff]  }
 0x1a5   : > { %6147 = vmatprep.subr.bf16.mxu1 %v7140_v1 }
 0x1a7   : > { %6068 = vmatpush3.bf16.msra.mxu0 %v8037_v25  ;;  %v8457_v25 = vld [vmem:[%s9303_s3 + $0x94] sm:$0xff]  }
 0x1a8   : > { %6148 = vmatpush3.bf16.msra.mxu1 %v8043_v27  ;;  %6069 = vmatprep.subr.bf16.mxu0 %v7140_v1  ;;  %v8464_v27 = vld [vmem:[%s9303_s3 + $0x70] sm:$0xff]  }
 0x1a9   : > { %6149 = vmatprep.subr.bf16.mxu1 %v7140_v1 }
 0x1ab   : > { %6070 = vmatpush3.bf16.msra.mxu0 %v8051_v29  ;;  %v8471_v29 = vld [vmem:[%s9303_s3 + $0x9c] sm:$0xff]  }
 0x1ac   : > { %6150 = vmatpush3.bf16.msra.mxu1 %v8057_v30  ;;  %6075 = vmatprep.subr.bf16.mxu0 %v7140_v1  ;;  %v8481_v30 = vld [vmem:[%s9303_s3 + $0x78] sm:$0xff]  }
 0x1ad   : > { %6155 = vmatprep.subr.bf16.mxu1 %v7140_v1 }
 0x1ae   : > { %6072 = vmatmul.mubr.msk.bf16.vlgmr.msra.gmra.mrb[12].mxu0 %vm465_vm1, %v7619_v57 }
 0x1af   : > { %6076 = vmatpush3.bf16.msra.mxu0 %v8067_v31  ;;  %6152 = vmatmul.mubr.msk.bf16.vlgmr.msra.gmra.mrb[12].mxu1 %vm465_vm1, %v7619_v57  ;;  %v7059_v57 = vld [vmem:[%s9301_s1 + $0x128] sm:$0xff]  }
 0x1b0   : > { %6156 = vmatpush3.bf16.msra.mxu1 %v8075_v32  ;;  %6077 = vmatprep.subr.bf16.mxu0 %v7140_v1  ;;  %v8486_v31 = vld [vmem:[%s9303_s3 + $0xa4] sm:$0xff]   ;;  %v6932_v32 = vld [vmem:[%s9303_s3 + $0x80] ss:$0 sps:$4 sm:$0x33]  }
 0x1b1   : > { %6157 = vmatprep.subr.bf16.mxu1 %v7140_v1  ;;  %6087 = vmatprep.mubr.msk.bf16.mxu0 %vm7141_vm0, %v7140_v1 }
 0x1b2   : > { %6167 = vmatprep.mubr.msk.bf16.mxu1 %vm7141_vm0, %v7140_v1 }
 0x1b3   : > { %6078 = vmatpush3.bf16.msra.mxu0 %v8087_v33  ;;  %v6933_v33 = vld [vmem:[%s9303_s3 + $0xac] ss:$0 sps:$4 sm:$0x33]  }
 0x1b4   : > { %6158 = vmatpush3.bf16.msra.mxu1 %v8093_v34  ;;  %6079 = vmatprep.subr.bf16.mxu0 %v7140_v1  ;;  %v8499_v34 = vsel %vm2621_vm2, %v6932_v32, 0  ;;  %v8680_v32 = vld [vmem:[%s9303_s3 + $0xfc] sm:$0xff]  }
 0x1b5   : > { %6159 = vmatprep.subr.bf16.mxu1 %v7140_v1 }
 0x1b7   : > { %6080 = vmatpush3.bf16.msra.mxu0 %v8101_v35  ;;  %v8502_v35 = vsel %vm2621_vm2, %v6933_v33, 0 }
 0x1b8   : > { %6160 = vmatpush3.bf16.msra.mxu1 %v8107_v43  ;;  %6081 = vmatprep.subr.bf16.mxu0 %v7140_v1 }
 0x1b9   : > { %6161 = vmatprep.subr.bf16.mxu1 %v7140_v1 }
 0x1bb   : > { %6082 = vmatpush3.bf16.msra.mxu0 %v8115_v5 }
 0x1bc   : > { %6162 = vmatpush3.bf16.msra.mxu1 %v7052_v49  ;;  %6083 = vmatprep.subr.bf16.mxu0 %v7140_v1 }
 0x1bd   : > { %6163 = vmatprep.subr.bf16.mxu1 %v7140_v1 }
 0x1bf   : > { %6084 = vmatpush3.bf16.msra.mxu0 %v7053_v50 }
 0x1c0   : > { %6164 = vmatpush3.bf16.msra.mxu1 %v7054_v51  ;;  %6085 = vmatprep.subr.bf16.mxu0 %v7140_v1 }
 0x1c1   : > { %6165 = vmatprep.subr.bf16.mxu1 %v7140_v1 }
 0x1c3   : > { %6086 = vmatpush3.bf16.msra.mxu0 %v7055_v52 }
 0x1c4   : > { %6166 = vmatpush3.bf16.msra.mxu1 %v7056_v53  ;;  %6091 = vmatprep.subr.bf16.mxu0 %v7140_v1 }
 0x1c5   : > { %6171 = vmatprep.subr.bf16.mxu1 %v7140_v1 }
 0x1c6   : > { %6088 = vmatmul.mubr.msk.bf16.vlgmr.msra.gmra.mrb[12].mxu0 %vm465_vm1, %v7892_v6 }
 0x1c7   : > { %6092 = vmatpush3.bf16.msra.mxu0 %v7057_v55  ;;  %6168 = vmatmul.mubr.msk.bf16.vlgmr.msra.gmra.mrb[12].mxu1 %vm465_vm1, %v7892_v6 }
 0x1c8   : > { %6172 = vmatpush3.bf16.msra.mxu1 %v7058_v56  ;;  %6093 = vmatprep.subr.bf16.mxu0 %v7140_v1  ;;  %v4806_v56 = vld [vmem:[%s9302_s2] ss:$0 sm:$0xff] }
 0x1c9   : > { %6173 = vmatprep.subr.bf16.mxu1 %v7140_v1  ;;  %6103 = vmatprep.mubr.msk.bf16.mxu0 %vm7141_vm0, %v7140_v1 }
 0x1ca   : > { %6183 = vmatprep.mubr.msk.bf16.mxu1 %vm7141_vm0, %v7140_v1 }
 0x1cb   : > { %6094 = vmatpush3.bf16.msra.mxu0 %v7059_v57 }
 0x1cc   : > { %6174 = vmatpush3.bf16.msra.mxu1 %v7060_v58  ;;  %6095 = vmatprep.subr.bf16.mxu0 %v7140_v1 }
 0x1cd   : > { %6175 = vmatprep.subr.bf16.mxu1 %v7140_v1 }
 0x1cf   : > { %6096 = vmatpush3.bf16.msra.mxu0 %v7061_v59  ;;  %v8514_v59 = vld [vmem:[%s9303_s3] sm:$0xff]  }
 0x1d0   : > { %6176 = vmatpush3.bf16.msra.mxu1 %v7062_v60  ;;  %6097 = vmatprep.subr.bf16.mxu0 %v7140_v1  ;;  %v8519_v60 = vld [vmem:[%s9303_s3 + $0x2c] sm:$0xff]  }
 0x1d1   : > { %6177 = vmatprep.subr.bf16.mxu1 %v7140_v1 }
 0x1d3   : > { %6098 = vmatpush3.bf16.msra.mxu0 %v7063_v61 }
 0x1d4   : > { %6178 = vmatpush3.bf16.msra.mxu1 %v7064_v62  ;;  %6099 = vmatprep.subr.bf16.mxu0 %v7140_v1  ;;  %v8532_v62 = vld [vmem:[%s9303_s3 + $0x8] sm:$0xff]  }
 0x1d5   : > { %6179 = vmatprep.subr.bf16.mxu1 %v7140_v1 }
 0x1d7   : > { %6100 = vmatpush3.bf16.msra.mxu0 %v7065_v63  ;;  %v8537_v63 = vld [vmem:[%s9303_s3 + $0x34] sm:$0xff]  }
 0x1d8   : > { %6180 = vmatpush3.bf16.msra.mxu1 %v7066_v28  ;;  %6101 = vmatprep.subr.bf16.mxu0 %v7140_v1  ;;  %v8550_v28 = vld [vmem:[%s9303_s3 + $0x10] sm:$0xff]  }
 0x1d9   : > { %v1514_v40 = vpop.f32.mrb[4].mxu0  ;;  %6181 = vmatprep.subr.bf16.mxu1 %v7140_v1 }
 0x1da   : > { %v1717_v54 = vpop.f32.mrb[4].mxu1  ;;  %v5801_v12 = vpop.f32.mrb[5].mxu0 }
 0x1db   : > { %v1725_v6 = vmax.f32 %v1514_v40, %v1717_v54  ;;  %v5881_v7 = vpop.f32.mrb[5].mxu1  ;;  %v1517_v8 = vpop.f32.mrb[6].mxu0  ;;  %6102 = vmatpush3.bf16.msra.mxu0 %v7067_v9  ;;  %v8555_v40 = vld [vmem:[%s9303_s3 + $0x3c] sm:$0xff]   ;;  %v8569_v12 = vld [vmem:[%s9303_s3 + $0x44] sm:$0xff]  }
 0x1dc   : > { %v1720_v10 = vpop.f32.mrb[6].mxu1  ;;  %6182 = vmatpush3.bf16.msra.mxu1 %v7068_v11  ;;  %v5802_v13 = vpop.f32.mrb[7].mxu0  ;;  %6107 = vmatprep.subr.bf16.mxu0 %v7140_v1  ;;  %v8564_v54 = vld [vmem:[%s9303_s3 + $0x18] sm:$0xff]   ;;  %v8583_v7 = vld [vmem:[%s9303_s3 + $0x4c] sm:$0xff]  }
 0x1dd   : > { %v8366_v14 = vmax.f32 %v1724_v39, %v1725_v6  ;;  %v5882_v15 = vpop.f32.mrb[7].mxu1  ;;  %6187 = vmatprep.subr.bf16.mxu1 %v7140_v1  ;;  %v8578_v6 = vld [vmem:[%s9303_s3 + $0x20] sm:$0xff]   ;;  %v6944_v9 = vld [vmem:[%s9303_s3 + $0x28] ss:$0 sps:$4 sm:$0x33]  }
 0x1de   : > { %6104 = vmatmul.mubr.msk.bf16.vlgmr.msra.gmra.mrb[12].mxu0 %vm465_vm1, %v8196_v48  ;;  %v6945_v10 = vld [vmem:[%s9303_s3 + $0x54] ss:$0 sps:$4 sm:$0x33]   ;;  %v8599_v13 = vsel %vm2621_vm2, %v6944_v9, 0 }
 0x1df   : > { %6108 = vmatpush3.bf16.msra.mxu0 %v7069_v16  ;;  %6184 = vmatmul.mubr.msk.bf16.vlgmr.msra.gmra.mrb[12].mxu1 %vm465_vm1, %v8196_v48  ;;  %v1734_v8 = vadd.f32 %v4806_v56, %v8366_v14  ;;  %v8602_v14 = vsel %vm2621_vm2, %v6945_v10, 0  ;;  %v8609_v15 = vld [vmem:[%s9303_s3 + $0xb0] sm:$0xff]   ;;  %v8614_v16 = vld [vmem:[%s9303_s3 + $0xdc] sm:$0xff]  }
 0x1e0   : > { %6188 = vmatpush3.bf16.msra.mxu1 %v7070_v17  ;;  %6109 = vmatprep.subr.bf16.mxu0 %v7140_v1  ;;  %v8805_v10 = vld [vmem:[%s9303_s3 + $0x160] sm:$0xff]  }
 0x1e1   : > { %6189 = vmatprep.subr.bf16.mxu1 %v7140_v1  ;;  %6119 = vmatprep.mubr.msk.bf16.mxu0 %vm7141_vm0, %v7140_v1  ;;  %v1735_v11 = vmax.f32 %v1734_v8, 0.0 }
 0x1e2   : > { %6199 = vmatprep.mubr.msk.bf16.mxu1 %vm7141_vm0, %v7140_v1 }
 0x1e3   : > { %6110 = vmatpush3.bf16.msra.mxu0 %v7071_v18  ;;  %v8616_v17 = vpack.c.bf16 %v1735_v11, %v1735_v11  ;;  %v8629_v18 = vld [vmem:[%s9303_s3 + $0xb8] sm:$0xff]   ;;  %v8810_v11 = vld [vmem:[%s9303_s3 + $0x18c] sm:$0xff]  }
 0x1e4   : > { %6190 = vmatpush3.bf16.msra.mxu1 %v7072_v19  ;;  %6111 = vmatprep.subr.bf16.mxu0 %v7140_v1  ;;  %v8634_v19 = vld [vmem:[%s9303_s3 + $0xe4] sm:$0xff]  }
 0x1e5   : > { %6191 = vmatprep.subr.bf16.mxu1 %v7140_v1  ;;  %v2758_v33 = vshll.u32 %v8616_v17, 16 }
 0x1e7   : > { %6112 = vmatpush3.bf16.msra.mxu0 %v7073_v20  ;;  %v8647_v20 = vld [vmem:[%s9303_s3 + $0xc0] sm:$0xff]  }
 0x1e8   : > { %6192 = vmatpush3.bf16.msra.mxu1 %v7074_v21  ;;  %6113 = vmatprep.subr.bf16.mxu0 %v7140_v1  ;;  %v8652_v21 = vld [vmem:[%s9303_s3 + $0xec] sm:$0xff]  }
 0x1e9   : > { %6193 = vmatprep.subr.bf16.mxu1 %v7140_v1 }
 0x1eb   : > { %6114 = vmatpush3.bf16.msra.mxu0 %v7075_v22  ;;  %v8661_v22 = vld [vmem:[%s9303_s3 + $0xc8] sm:$0xff]  }
 0x1ec   : > { %6194 = vmatpush3.bf16.msra.mxu1 %v7674_v0  ;;  %6115 = vmatprep.subr.bf16.mxu0 %v7140_v1  ;;  %v8416_v0 = vld [vmem:[%s9303_s3 + $0x58] sm:$0xff]  }
 0x1ed   : > { %6195 = vmatprep.subr.bf16.mxu1 %v7140_v1 }
 0x1ef   : > { %6116 = vmatpush3.bf16.msra.mxu0 %v7683_v2  ;;  %v8423_v2 = vld [vmem:[%s9303_s3 + $0x84] sm:$0xff]  }
 0x1f0   : > { %6196 = vmatpush3.bf16.msra.mxu1 %v7691_v3  ;;  %6117 = vmatprep.subr.bf16.mxu0 %v7140_v1  ;;  %v8432_v3 = vld [vmem:[%s9303_s3 + $0x60] sm:$0xff]  }
 0x1f1   : > { %6197 = vmatprep.subr.bf16.mxu1 %v7140_v1 }
 0x1f3   : > { %6118 = vmatpush3.bf16.msra.mxu0 %v7697_v4  ;;  %v8439_v4 = vld [vmem:[%s9303_s3 + $0x8c] sm:$0xff]  }
 0x1f4   : > { %6198 = vmatpush3.bf16.msra.mxu1 %v7703_v26  ;;  %6203 = vmatprep.subr.bf16.mxu0 %v7140_v1  ;;  %v8450_v26 = vld [vmem:[%s9303_s3 + $0x68] sm:$0xff]  }
 0x1f5   : > { %6283 = vmatprep.subr.bf16.mxu1 %v7140_v1 }
 0x1f6   : > { %6120 = vmatmul.mubr.msk.bf16.vlgmr.msra.gmra.mrb[12].mxu0 %vm465_vm1, %v403_v24 }
 0x1f7   : > { %6200 = vmatmul.mubr.msk.bf16.vlgmr.msra.gmra.mrb[12].mxu1 %vm465_vm1, %v403_v24  ;;  %6204 = vmatpush3.bf16.msra.mxu0 %v8416_v0  ;;  %v8675_v24 = vld [vmem:[%s9303_s3 + $0xd0] sm:$0xff]  }
 0x1f8   : > { %6284 = vmatpush3.bf16.msra.mxu1 %v8423_v2  ;;  %6205 = vmatprep.subr.bf16.mxu0 %v7140_v1 }
 0x1f9   : > { %6285 = vmatprep.subr.bf16.mxu1 %v7140_v1  ;;  %6215 = vmatprep.mubr.msk.bf16.mxu0 %vm7141_vm0, %v7140_v1 }
 0x1fa   : > { %6295 = vmatprep.mubr.msk.bf16.mxu1 %vm7141_vm0, %v7140_v1 }
 0x1fb   : > { %6206 = vmatpush3.bf16.msra.mxu0 %v8432_v3 }
 0x1fc   : > { %6286 = vmatpush3.bf16.msra.mxu1 %v8439_v4  ;;  %6207 = vmatprep.subr.bf16.mxu0 %v7140_v1 }
 0x1fd   : > { %6287 = vmatprep.subr.bf16.mxu1 %v7140_v1 }
 0x1ff   : > { %6208 = vmatpush3.bf16.msra.mxu0 %v8450_v26 }
 0x200   : > { %6288 = vmatpush3.bf16.msra.mxu1 %v8457_v25  ;;  %6209 = vmatprep.subr.bf16.mxu0 %v7140_v1 }
 0x201   : > { %6289 = vmatprep.subr.bf16.mxu1 %v7140_v1 }
 0x203   : > { %6210 = vmatpush3.bf16.msra.mxu0 %v8464_v27 }
 0x204   : > { %6290 = vmatpush3.bf16.msra.mxu1 %v8471_v29  ;;  %6211 = vmatprep.subr.bf16.mxu0 %v7140_v1 }
 0x205   : > { %6291 = vmatprep.subr.bf16.mxu1 %v7140_v1 }
 0x207   : > { %6212 = vmatpush3.bf16.msra.mxu0 %v8481_v30 }
 0x208   : > { %6292 = vmatpush3.bf16.msra.mxu1 %v8486_v31  ;;  %6213 = vmatprep.subr.bf16.mxu0 %v7140_v1 }
 0x209   : > { %6293 = vmatprep.subr.bf16.mxu1 %v7140_v1 }
 0x20b   : > { %6214 = vmatpush3.bf16.msra.mxu0 %v8499_v34 }
 0x20c   : > { %6294 = vmatpush3.bf16.msra.mxu1 %v8502_v35  ;;  %6219 = vmatprep.subr.bf16.mxu0 %v7140_v1 }
 0x20d   : > { %6299 = vmatprep.subr.bf16.mxu1 %v7140_v1 }
 0x251   : > { %v1935_v43 = vpop.f32.mrb[8].mxu0 }
 0x252   : > { %v2138_v5 = vpop.f32.mrb[8].mxu1  ;;  %v5961_v36 = vpop.f32.mrb[9].mxu0 }
 0x253   : > { %v2554_v37 = vmax.f32 %v1935_v43, %v2138_v5  ;;  %v6041_v38 = vpop.f32.mrb[9].mxu1  ;;  %v1938_v39 = vpop.f32.mrb[10].mxu0  ;;  %v6956_v43 = vld [vmem:[%s9303_s3 + $0xd8] ss:$0 sps:$4 sm:$0x33]  }
 0x254   : > { %v2141_v41 = vpop.f32.mrb[10].mxu1  ;;  %v5962_v42 = vpop.f32.mrb[11].mxu0  ;;  %v6957_v5 = vld [vmem:[%s9303_s3 + $0x104] ss:$0 sps:$4 sm:$0x33]   ;;  %v8696_v36 = vsel %vm2621_vm2, %v6956_v43, 0 }
 0x255   : > { %v6042_v44 = vpop.f32.mrb[11].mxu1  ;;  %v2760_v38 = vrot.slane %v2758_v33, 1  ;;  %v2756_v39 = vshrl.u32 %v8616_v17, 16  ;;  %v8707_v41 = vld [vmem:[%s9303_s3 + $0x108] sm:$0xff]   ;;  %v8712_v42 = vld [vmem:[%s9303_s3 + $0x134] sm:$0xff]  }
 0x256   : > { %v8825_v43 = vld [vmem:[%s9303_s3 + $0x168] sm:$0xff]  }
 0x257   : > { %v8714_v44 = vor.u32 %v2760_v38, %v2756_v39  ;;  %v8843_v38 = vld [vmem:[%s9303_s3 + $0x170] sm:$0xff]   ;;  %v8848_v39 = vld [vmem:[%s9303_s3 + $0x19c] sm:$0xff]  }
 0x258   : > { %9322 = vst [vmem:[#allocation5_spill] sm:$0xff] %v8843_v38  ;;  %9323 = vst [vmem:[#allocation6_spill] sm:$0xff] %v8848_v39 }
 0x2c9   : > { %v2344_v45 = vpop.f32.mrb[12].mxu0 }
 0x2ca   : > { %v2547_v46 = vpop.f32.mrb[12].mxu1  ;;  %v6121_v47 = vpop.f32.mrb[13].mxu0 }
 0x2cb   : > { %v2555_v48 = vmax.f32 %v2344_v45, %v2547_v46  ;;  %v6201_v49 = vpop.f32.mrb[13].mxu1  ;;  %v2347_v50 = vpop.f32.mrb[14].mxu0  ;;  %v8727_v45 = vld [vmem:[%s9303_s3 + $0x110] sm:$0xff]   ;;  %v8732_v46 = vld [vmem:[%s9303_s3 + $0x13c] sm:$0xff]  }
 0x2cc   : > { %v2550_v51 = vpop.f32.mrb[14].mxu1  ;;  %v6122_v52 = vpop.f32.mrb[15].mxu0  ;;  %v8745_v47 = vld [vmem:[%s9303_s3 + $0x118] sm:$0xff]   ;;  %v8759_v49 = vld [vmem:[%s9303_s3 + $0x120] sm:$0xff]   ;;  %v8764_v50 = vld [vmem:[%s9303_s3 + $0x14c] sm:$0xff]  }
 0x2cd   : > { %v2556_v53 = vmax.f32 %v2554_v37, %v2555_v48  ;;  %v6202_v55 = vpop.f32.mrb[15].mxu1  ;;  %v8699_v37 = vsel %vm2621_vm2, %v6957_v5, 0  ;;  %v8750_v48 = vld [vmem:[%s9303_s3 + $0x144] sm:$0xff]   ;;  %v8778_v52 = vld [vmem:[%s9303_s3 + $0x154] sm:$0xff]  }
 0x2ce   : > { %v8773_v51 = vld [vmem:[%s9303_s3 + $0x128] sm:$0xff]   ;;  %v6969_v55 = vld [vmem:[%s9303_s3 + $0x15c] ss:$0 sps:$4 sm:$0x33]   ;;  %v8830_v5 = vld [vmem:[%s9303_s3 + $0x194] sm:$0xff]  }
 0x2cf   : > { %v2557_v57 = vadd.f32 %v4806_v56, %v2556_v53  ;;  %v6968_v53 = vld [vmem:[%s9303_s3 + $0x130] ss:$0 sps:$4 sm:$0x33]  }
 0x2d1   : > { %v2558_v58 = vmax.f32 %v2557_v57, 0.0  ;;  %v8794_v57 = vsel %vm2621_vm2, %v6968_v53, 0  ;;  %v8857_v53 = vld [vmem:[%s9303_s3 + $0x178] sm:$0xff]  }
 0x2d2   : > { %9324 = vst [vmem:[#allocation7_spill] sm:$0xff] %v8857_v53 }
 0x2d3   : > { %v8521_v61 = vpack.c.bf16 %v2558_v58, %v2558_v58  ;;  %v8797_v58 = vsel %vm2621_vm2, %v6969_v55, 0  ;;  %v8862_v55 = vld [vmem:[%s9303_s3 + $0x1a4] sm:$0xff]  }
 0x2d4   : > { %9325 = vst [vmem:[#allocation8_spill] sm:$0xff] %v8862_v55 }
 0x2d5   : > { %6216 = vmatmul.mubr.msk.bf16.vlgmr.msra.gmra.mrb[16].mxu0 %vm2617_vm3, %v8521_v61  ;;  %6296 = vmatmul.mubr.msk.bf16.vlgmr.msra.gmra.mrb[16].mxu1 %vm2617_vm3, %v8521_v61  ;;  %v2856_v56 = vshll.u32 %v8521_v61, 16  ;;  %v2854_v9 = vshrl.u32 %v8521_v61, 16 }
 0x2d6   : > { %6220 = vmatpush3.bf16.msra.mxu0 %v8514_v59  ;;  %6300 = vmatpush3.bf16.msra.mxu1 %v8519_v60 }
 0x2d7   : > { %6221 = vmatprep.subr.bf16.mxu0 %v7140_v1  ;;  %6301 = vmatprep.subr.bf16.mxu1 %v7140_v1  ;;  %v2858_v8 = vrot.slane %v2856_v56, 1  ;;  %v8871_v56 = vld [vmem:[%s9303_s3 + $0x180] sm:$0xff]  }
 0x2d8   : > { %6231 = vmatprep.mubr.msk.bf16.mxu0 %vm7141_vm0, %v7140_v1  ;;  %6311 = vmatprep.mubr.msk.bf16.mxu1 %vm7141_vm0, %v7140_v1 }
 0x2d9   : > { %v8812_v33 = vor.u32 %v2858_v8, %v2854_v9  ;;  %v8876_v8 = vld [vmem:[%s9303_s3 + $0x1ac] sm:$0xff]   ;;  %v6980_v9 = vld [vmem:[%s9303_s3 + $0x188] ss:$0 sps:$4 sm:$0x33]  }
 0x2da   : > { %6222 = vmatpush3.bf16.msra.mxu0 %v8532_v62  ;;  %6302 = vmatpush3.bf16.msra.mxu1 %v8537_v63 }
 0x2db   : > { %6223 = vmatprep.subr.bf16.mxu0 %v7140_v1  ;;  %6303 = vmatprep.subr.bf16.mxu1 %v7140_v1 }
 0x2de   : > { %6224 = vmatpush3.bf16.msra.mxu0 %v8550_v28  ;;  %6304 = vmatpush3.bf16.msra.mxu1 %v8555_v40 }
 0x2df   : > { %6225 = vmatprep.subr.bf16.mxu0 %v7140_v1  ;;  %6305 = vmatprep.subr.bf16.mxu1 %v7140_v1 }
 0x2e2   : > { %6226 = vmatpush3.bf16.msra.mxu0 %v8564_v54  ;;  %6306 = vmatpush3.bf16.msra.mxu1 %v8569_v12 }
 0x2e3   : > { %6227 = vmatprep.subr.bf16.mxu0 %v7140_v1  ;;  %6307 = vmatprep.subr.bf16.mxu1 %v7140_v1 }
 0x2e6   : > { %6228 = vmatpush3.bf16.msra.mxu0 %v8578_v6  ;;  %6308 = vmatpush3.bf16.msra.mxu1 %v8583_v7 }
 0x2e7   : > { %6229 = vmatprep.subr.bf16.mxu0 %v7140_v1  ;;  %6309 = vmatprep.subr.bf16.mxu1 %v7140_v1 }
 0x2ea   : > { %6230 = vmatpush3.bf16.msra.mxu0 %v8599_v13  ;;  %6310 = vmatpush3.bf16.msra.mxu1 %v8602_v14 }
 0x2eb   : > { %6235 = vmatprep.subr.bf16.mxu0 %v7140_v1  ;;  %6315 = vmatprep.subr.bf16.mxu1 %v7140_v1 }
 0x2ed   : > { %6232 = vmatmul.mubr.msk.bf16.vlgmr.msra.gmra.mrb[16].mxu0 %vm2617_vm3, %v8616_v17  ;;  %6312 = vmatmul.mubr.msk.bf16.vlgmr.msra.gmra.mrb[16].mxu1 %vm2617_vm3, %v8616_v17 }
 0x2ee   : > { %6236 = vmatpush3.bf16.msra.mxu0 %v8609_v15  ;;  %6316 = vmatpush3.bf16.msra.mxu1 %v8614_v16 }
 0x2ef   : > { %6237 = vmatprep.subr.bf16.mxu0 %v7140_v1  ;;  %6317 = vmatprep.subr.bf16.mxu1 %v7140_v1 }
 0x2f0   : > { %6247 = vmatprep.mubr.msk.bf16.mxu0 %vm7141_vm0, %v7140_v1  ;;  %6327 = vmatprep.mubr.msk.bf16.mxu1 %vm7141_vm0, %v7140_v1 }
 0x2f2   : > { %6238 = vmatpush3.bf16.msra.mxu0 %v8629_v18  ;;  %6318 = vmatpush3.bf16.msra.mxu1 %v8634_v19 }
 0x2f3   : > { %6239 = vmatprep.subr.bf16.mxu0 %v7140_v1  ;;  %6319 = vmatprep.subr.bf16.mxu1 %v7140_v1 }
 0x2f6   : > { %6240 = vmatpush3.bf16.msra.mxu0 %v8647_v20  ;;  %6320 = vmatpush3.bf16.msra.mxu1 %v8652_v21 }
 0x2f7   : > { %6241 = vmatprep.subr.bf16.mxu0 %v7140_v1  ;;  %6321 = vmatprep.subr.bf16.mxu1 %v7140_v1 }
 0x2fa   : > { %6242 = vmatpush3.bf16.msra.mxu0 %v8661_v22  ;;  %6322 = vmatpush3.bf16.msra.mxu1 %v8666_v23 }
 0x2fb   : > { %6243 = vmatprep.subr.bf16.mxu0 %v7140_v1  ;;  %6323 = vmatprep.subr.bf16.mxu1 %v7140_v1 }
 0x2fe   : > { %6244 = vmatpush3.bf16.msra.mxu0 %v8675_v24  ;;  %6324 = vmatpush3.bf16.msra.mxu1 %v8680_v32 }
 0x2ff   : > { %6245 = vmatprep.subr.bf16.mxu0 %v7140_v1  ;;  %6325 = vmatprep.subr.bf16.mxu1 %v7140_v1 }
 0x302   : > { %6246 = vmatpush3.bf16.msra.mxu0 %v8696_v36  ;;  %6326 = vmatpush3.bf16.msra.mxu1 %v8699_v37 }
 0x303   : > { %6251 = vmatprep.subr.bf16.mxu0 %v7140_v1  ;;  %6331 = vmatprep.subr.bf16.mxu1 %v7140_v1 }
 0x305   : > { %6248 = vmatmul.mubr.msk.bf16.vlgmr.msra.gmra.mrb[16].mxu0 %vm2617_vm3, %v8714_v44  ;;  %6328 = vmatmul.mubr.msk.bf16.vlgmr.msra.gmra.mrb[16].mxu1 %vm2617_vm3, %v8714_v44 }
 0x306   : > { %6252 = vmatpush3.bf16.msra.mxu0 %v8707_v41  ;;  %6332 = vmatpush3.bf16.msra.mxu1 %v8712_v42 }
 0x307   : > { %6253 = vmatprep.subr.bf16.mxu0 %v7140_v1  ;;  %6333 = vmatprep.subr.bf16.mxu1 %v7140_v1 }
 0x308   : > { %6263 = vmatprep.mubr.msk.bf16.mxu0 %vm7141_vm0, %v7140_v1  ;;  %6343 = vmatprep.mubr.msk.bf16.mxu1 %vm7141_vm0, %v7140_v1 }
 0x30a   : > { %6254 = vmatpush3.bf16.msra.mxu0 %v8727_v45  ;;  %6334 = vmatpush3.bf16.msra.mxu1 %v8732_v46 }
 0x30b   : > { %6255 = vmatprep.subr.bf16.mxu0 %v7140_v1  ;;  %6335 = vmatprep.subr.bf16.mxu1 %v7140_v1 }
 0x30e   : > { %6256 = vmatpush3.bf16.msra.mxu0 %v8745_v47  ;;  %6336 = vmatpush3.bf16.msra.mxu1 %v8750_v48 }
 0x30f   : > { %6257 = vmatprep.subr.bf16.mxu0 %v7140_v1  ;;  %6337 = vmatprep.subr.bf16.mxu1 %v7140_v1 }
 0x312   : > { %6258 = vmatpush3.bf16.msra.mxu0 %v8759_v49  ;;  %6338 = vmatpush3.bf16.msra.mxu1 %v8764_v50 }
 0x313   : > { %6259 = vmatprep.subr.bf16.mxu0 %v7140_v1  ;;  %6339 = vmatprep.subr.bf16.mxu1 %v7140_v1 }
 0x316   : > { %6260 = vmatpush3.bf16.msra.mxu0 %v8773_v51  ;;  %6340 = vmatpush3.bf16.msra.mxu1 %v8778_v52 }
 0x317   : > { %6261 = vmatprep.subr.bf16.mxu0 %v7140_v1  ;;  %6341 = vmatprep.subr.bf16.mxu1 %v7140_v1 }
 0x31a   : > { %6262 = vmatpush3.bf16.msra.mxu0 %v8794_v57  ;;  %6342 = vmatpush3.bf16.msra.mxu1 %v8797_v58 }
 0x31b   : > { %6267 = vmatprep.subr.bf16.mxu0 %v7140_v1  ;;  %6347 = vmatprep.subr.bf16.mxu1 %v7140_v1 }
 0x31d   : > { %6264 = vmatmul.mubr.msk.bf16.vlgmr.msra.gmra.mrb[16].mxu0 %vm2617_vm3, %v8812_v33  ;;  %6344 = vmatmul.mubr.msk.bf16.vlgmr.msra.gmra.mrb[16].mxu1 %vm2617_vm3, %v8812_v33 }
 0x31e   : > { %6268 = vmatpush3.bf16.msra.mxu0 %v8805_v10  ;;  %6348 = vmatpush3.bf16.msra.mxu1 %v8810_v11 }
 0x31f   : > { %6269 = vmatprep.subr.bf16.mxu0 %v7140_v1  ;;  %6349 = vmatprep.subr.bf16.mxu1 %v7140_v1 }
 0x320   : > { %6279 = vmatprep.mubr.msk.bf16.mxu0 %vm7141_vm0, %v7140_v1  ;;  %6359 = vmatprep.mubr.msk.bf16.mxu1 %vm7141_vm0, %v7140_v1 }
 0x322   : > { %6270 = vmatpush3.bf16.msra.mxu0 %v8825_v43  ;;  %6350 = vmatpush3.bf16.msra.mxu1 %v8830_v5 }
 0x323   : > { %6271 = vmatprep.subr.bf16.mxu0 %v7140_v1  ;;  %6351 = vmatprep.subr.bf16.mxu1 %v7140_v1 }
 0x326   : > { %6272 = vmatpush3.bf16.msra.mxu0 %v8843_v38  ;;  %6352 = vmatpush3.bf16.msra.mxu1 %v8848_v39  ;;  %v8899_v38 = vrot.slane %v8616_v17, 1 }
 0x327   : > { %6273 = vmatprep.subr.bf16.mxu0 %v7140_v1  ;;  %6353 = vmatprep.subr.bf16.mxu1 %v7140_v1 }
 0x32a   : > { %6274 = vmatpush3.bf16.msra.mxu0 %v8857_v53  ;;  %6354 = vmatpush3.bf16.msra.mxu1 %v8862_v55  ;;  %v6981_v55 = vld [vmem:[%s9303_s3 + $0x1b4] ss:$0 sps:$4 sm:$0x33]   ;;  %v8891_v53 = vsel %vm2621_vm2, %v6980_v9, 0  ;;  %v7012_v9 = vld [vmem:[%s9307_s7 + $0x28] sm:$0xff]  }
 0x32b   : > { %6275 = vmatprep.subr.bf16.mxu0 %v7140_v1  ;;  %6355 = vmatprep.subr.bf16.mxu1 %v7140_v1  ;;  %v8894_v39 = vsel %vm2621_vm2, %v6981_v55, 0  ;;  %v7009_v55 = vld [vmem:[%s9307_s7 + $0x10] sm:$0xff]  }
 0x32e   : > { %6276 = vmatpush3.bf16.msra.mxu0 %v8871_v56  ;;  %6356 = vmatpush3.bf16.msra.mxu1 %v8876_v8 }
 0x32f   : > { %6277 = vmatprep.subr.bf16.mxu0 %v7140_v1  ;;  %6357 = vmatprep.subr.bf16.mxu1 %v7140_v1 }
 0x332   : > { %6278 = vmatpush3.bf16.msra.mxu0 %v8891_v53  ;;  %6358 = vmatpush3.bf16.msra.mxu1 %v8894_v39 }
 0x333   : > { %6363 = vmatprep.subr.bf16.mxu0 %v7140_v1  ;;  %6443 = vmatprep.subr.bf16.mxu1 %v7140_v1 }
 0x335   : > { %6280 = vmatmul.mubr.msk.bf16.vlgmr.msra.gmra.mrb[16].mxu0 %vm2617_vm3, %v8899_v38  ;;  %6360 = vmatmul.mubr.msk.bf16.vlgmr.msra.gmra.mrb[16].mxu1 %vm2617_vm3, %v8899_v38 }
 0x336   : > { %6364 = vmatpush3.bf16.msra.mxu0 %v8416_v0  ;;  %6444 = vmatpush3.bf16.msra.mxu1 %v8423_v2  ;;  %v9326_v0 = vld [vmem:[#allocation5_spill] sm:$0xff]  ;;  %v9327_v2 = vld [vmem:[#allocation6_spill] sm:$0xff] }
 0x337   : > { %6365 = vmatprep.subr.bf16.mxu0 %v7140_v1  ;;  %6445 = vmatprep.subr.bf16.mxu1 %v7140_v1 }
 0x338   : > { %6375 = vmatprep.mubr.msk.bf16.mxu0 %vm7141_vm0, %v7140_v1  ;;  %6455 = vmatprep.mubr.msk.bf16.mxu1 %vm7141_vm0, %v7140_v1 }
 0x33a   : > { %6366 = vmatpush3.bf16.msra.mxu0 %v8432_v3  ;;  %6446 = vmatpush3.bf16.msra.mxu1 %v8439_v4  ;;  %v9328_v3 = vld [vmem:[#allocation7_spill] sm:$0xff]  ;;  %v9329_v4 = vld [vmem:[#allocation8_spill] sm:$0xff] }
 0x33b   : > { %6367 = vmatprep.subr.bf16.mxu0 %v7140_v1  ;;  %6447 = vmatprep.subr.bf16.mxu1 %v7140_v1 }
 0x33e   : > { %6368 = vmatpush3.bf16.msra.mxu0 %v8450_v26  ;;  %6448 = vmatpush3.bf16.msra.mxu1 %v8457_v25  ;;  %v6982_v26 = vld [vmem:[%s9305_s5] sm:$0xff]   ;;  %v6983_v25 = vld [vmem:[%s9305_s5 + $0x28] sm:$0xff]  }
 0x33f   : > { %6369 = vmatprep.subr.bf16.mxu0 %v7140_v1  ;;  %6449 = vmatprep.subr.bf16.mxu1 %v7140_v1 }
 0x342   : > { %6370 = vmatpush3.bf16.msra.mxu0 %v8464_v27  ;;  %6450 = vmatpush3.bf16.msra.mxu1 %v8471_v29  ;;  %v3640_v27 = vrot.slane %v8521_v61, 1  ;;  %v6984_v29 = vld [vmem:[%s9305_s5 + $0x8] sm:$0xff]  }
 0x343   : > { %6371 = vmatprep.subr.bf16.mxu0 %v7140_v1  ;;  %6451 = vmatprep.subr.bf16.mxu1 %v7140_v1 }
 0x346   : > { %6372 = vmatpush3.bf16.msra.mxu0 %v8481_v30  ;;  %6452 = vmatpush3.bf16.msra.mxu1 %v8486_v31  ;;  %v6985_v30 = vld [vmem:[%s9305_s5 + $0x30] sm:$0xff]  }
 0x347   : > { %6373 = vmatprep.subr.bf16.mxu0 %v7140_v1  ;;  %6453 = vmatprep.subr.bf16.mxu1 %v7140_v1  ;;  %v6986_v31 = vld [vmem:[%s9305_s5 + $0x10] sm:$0xff]  }
 0x34a   : > { %6374 = vmatpush3.bf16.msra.mxu0 %v8499_v34  ;;  %6454 = vmatpush3.bf16.msra.mxu1 %v8502_v35  ;;  %v6987_v34 = vld [vmem:[%s9305_s5 + $0x38] sm:$0xff]  }
 0x34b   : > { %6379 = vmatprep.subr.bf16.mxu0 %v7140_v1  ;;  %6459 = vmatprep.subr.bf16.mxu1 %v7140_v1  ;;  %v6988_v35 = vld [vmem:[%s9305_s5 + $0x18] sm:$0xff]  }
 0x34d   : > { %6376 = vmatmul.mubr.msk.bf16.vlgmr.msra.gmra.mrb[20].mxu0 %vm2617_vm3, %v8714_v44  ;;  %6456 = vmatmul.mubr.msk.bf16.vlgmr.msra.gmra.mrb[20].mxu1 %vm2617_vm3, %v8714_v44 }
 0x34e   : > { %6380 = vmatpush3.bf16.msra.mxu0 %v8514_v59  ;;  %6460 = vmatpush3.bf16.msra.mxu1 %v8519_v60  ;;  %v6989_v59 = vld [vmem:[%s9305_s5 + $0x40] sm:$0xff]  }
 0x34f   : > { %6381 = vmatprep.subr.bf16.mxu0 %v7140_v1  ;;  %6461 = vmatprep.subr.bf16.mxu1 %v7140_v1  ;;  %v6990_v60 = vld [vmem:[%s9305_s5 + $0x20] sm:$0xff]  }
 0x350   : > { %6391 = vmatprep.mubr.msk.bf16.mxu0 %vm7141_vm0, %v7140_v1  ;;  %6471 = vmatprep.mubr.msk.bf16.mxu1 %vm7141_vm0, %v7140_v1 }
 0x352   : > { %6382 = vmatpush3.bf16.msra.mxu0 %v8532_v62  ;;  %6462 = vmatpush3.bf16.msra.mxu1 %v8537_v63 }
 0x353   : > { %6383 = vmatprep.subr.bf16.mxu0 %v7140_v1  ;;  %6463 = vmatprep.subr.bf16.mxu1 %v7140_v1 }
 0x356   : > { %6384 = vmatpush3.bf16.msra.mxu0 %v8550_v28  ;;  %6464 = vmatpush3.bf16.msra.mxu1 %v8555_v40 }
 0x357   : > { %6385 = vmatprep.subr.bf16.mxu0 %v7140_v1  ;;  %6465 = vmatprep.subr.bf16.mxu1 %v7140_v1 }
 0x35a   : > { %6386 = vmatpush3.bf16.msra.mxu0 %v8564_v54  ;;  %6466 = vmatpush3.bf16.msra.mxu1 %v8569_v12 }
 0x35b   : > { %6387 = vmatprep.subr.bf16.mxu0 %v7140_v1  ;;  %6467 = vmatprep.subr.bf16.mxu1 %v7140_v1 }
 0x35e   : > { %6388 = vmatpush3.bf16.msra.mxu0 %v8578_v6  ;;  %6468 = vmatpush3.bf16.msra.mxu1 %v8583_v7 }
 0x35f   : > { %6389 = vmatprep.subr.bf16.mxu0 %v7140_v1  ;;  %6469 = vmatprep.subr.bf16.mxu1 %v7140_v1 }
 0x362   : > { %6390 = vmatpush3.bf16.msra.mxu0 %v8599_v13  ;;  %6470 = vmatpush3.bf16.msra.mxu1 %v8602_v14 }
 0x363   : > { %6395 = vmatprep.subr.bf16.mxu0 %v7140_v1  ;;  %6475 = vmatprep.subr.bf16.mxu1 %v7140_v1 }
 0x365   : > { %6392 = vmatmul.mubr.msk.bf16.vlgmr.msra.gmra.mrb[20].mxu0 %vm2617_vm3, %v8521_v61  ;;  %6472 = vmatmul.mubr.msk.bf16.vlgmr.msra.gmra.mrb[20].mxu1 %vm2617_vm3, %v8521_v61  ;;  %v6991_v61 = vld [vmem:[%s9305_s5 + $0x48] sm:$0xff]  }
 0x366   : > { %6396 = vmatpush3.bf16.msra.mxu0 %v8609_v15  ;;  %6476 = vmatpush3.bf16.msra.mxu1 %v8614_v16 }
 0x367   : > { %6397 = vmatprep.subr.bf16.mxu0 %v7140_v1  ;;  %6477 = vmatprep.subr.bf16.mxu1 %v7140_v1 }
 0x368   : > { %6407 = vmatprep.mubr.msk.bf16.mxu0 %vm7141_vm0, %v7140_v1  ;;  %6487 = vmatprep.mubr.msk.bf16.mxu1 %vm7141_vm0, %v7140_v1 }
 0x36a   : > { %6398 = vmatpush3.bf16.msra.mxu0 %v8629_v18  ;;  %6478 = vmatpush3.bf16.msra.mxu1 %v8634_v19  ;;  %v5006_v19 = vld [vmem:[%s9304_s4] ss:$0 sm:$0xff] }
 0x36b   : > { %6399 = vmatprep.subr.bf16.mxu0 %v7140_v1  ;;  %6479 = vmatprep.subr.bf16.mxu1 %v7140_v1 }
 0x36e   : > { %6400 = vmatpush3.bf16.msra.mxu0 %v8647_v20  ;;  %6480 = vmatpush3.bf16.msra.mxu1 %v8652_v21 }
 0x36f   : > { %6401 = vmatprep.subr.bf16.mxu0 %v7140_v1  ;;  %6481 = vmatprep.subr.bf16.mxu1 %v7140_v1 }
 0x372   : > { %6402 = vmatpush3.bf16.msra.mxu0 %v8661_v22  ;;  %6482 = vmatpush3.bf16.msra.mxu1 %v8666_v23 }
 0x373   : > { %6403 = vmatprep.subr.bf16.mxu0 %v7140_v1  ;;  %6483 = vmatprep.subr.bf16.mxu1 %v7140_v1 }
 0x376   : > { %6404 = vmatpush3.bf16.msra.mxu0 %v8675_v24  ;;  %6484 = vmatpush3.bf16.msra.mxu1 %v8680_v32 }
 0x377   : > { %6405 = vmatprep.subr.bf16.mxu0 %v7140_v1  ;;  %6485 = vmatprep.subr.bf16.mxu1 %v7140_v1 }
 0x37a   : > { %6406 = vmatpush3.bf16.msra.mxu0 %v8696_v36  ;;  %6486 = vmatpush3.bf16.msra.mxu1 %v8699_v37  ;;  %v6992_v37 = vld [vmem:[%s9305_s5 + $0x78] sm:$0xff]  }
 0x37b   : > { %6411 = vmatprep.subr.bf16.mxu0 %v7140_v1  ;;  %6491 = vmatprep.subr.bf16.mxu1 %v7140_v1 }
 0x37d   : > { %6408 = vmatmul.mubr.msk.bf16.vlgmr.msra.gmra.mrb[20].mxu0 %vm2617_vm3, %v8812_v33  ;;  %6488 = vmatmul.mubr.msk.bf16.vlgmr.msra.gmra.mrb[20].mxu1 %vm2617_vm3, %v8812_v33  ;;  %v7004_v33 = vld [vmem:[%s9305_s5 + $0xb0] sm:$0xff]  }
 0x37e   : > { %6412 = vmatpush3.bf16.msra.mxu0 %v8707_v41  ;;  %6492 = vmatpush3.bf16.msra.mxu1 %v8712_v42  ;;  %v6993_v42 = vld [vmem:[%s9305_s5 + $0x50] sm:$0xff]  }
 0x37f   : > { %6413 = vmatprep.subr.bf16.mxu0 %v7140_v1  ;;  %6493 = vmatprep.subr.bf16.mxu1 %v7140_v1 }
 0x380   : > { %6423 = vmatprep.mubr.msk.bf16.mxu0 %vm7141_vm0, %v7140_v1  ;;  %6503 = vmatprep.mubr.msk.bf16.mxu1 %vm7141_vm0, %v7140_v1 }
 0x382   : > { %6414 = vmatpush3.bf16.msra.mxu0 %v8727_v45  ;;  %6494 = vmatpush3.bf16.msra.mxu1 %v8732_v46  ;;  %v6994_v45 = vld [vmem:[%s9305_s5 + $0x80] sm:$0xff]   ;;  %v6995_v46 = vld [vmem:[%s9305_s5 + $0x58] sm:$0xff]  }
 0x383   : > { %6415 = vmatprep.subr.bf16.mxu0 %v7140_v1  ;;  %6495 = vmatprep.subr.bf16.mxu1 %v7140_v1 }
 0x386   : > { %6416 = vmatpush3.bf16.msra.mxu0 %v8745_v47  ;;  %6496 = vmatpush3.bf16.msra.mxu1 %v8750_v48  ;;  %v6996_v47 = vld [vmem:[%s9305_s5 + $0x88] sm:$0xff]   ;;  %v6997_v48 = vld [vmem:[%s9305_s5 + $0x60] sm:$0xff]  }
 0x387   : > { %6417 = vmatprep.subr.bf16.mxu0 %v7140_v1  ;;  %6497 = vmatprep.subr.bf16.mxu1 %v7140_v1 }
 0x38a   : > { %6418 = vmatpush3.bf16.msra.mxu0 %v8759_v49  ;;  %6498 = vmatpush3.bf16.msra.mxu1 %v8764_v50  ;;  %v6998_v49 = vld [vmem:[%s9305_s5 + $0x90] sm:$0xff]   ;;  %v6999_v50 = vld [vmem:[%s9305_s5 + $0x68] sm:$0xff]  }
 0x38b   : > { %6419 = vmatprep.subr.bf16.mxu0 %v7140_v1  ;;  %6499 = vmatprep.subr.bf16.mxu1 %v7140_v1 }
 0x38e   : > { %6420 = vmatpush3.bf16.msra.mxu0 %v8773_v51  ;;  %6500 = vmatpush3.bf16.msra.mxu1 %v8778_v52  ;;  %v7000_v51 = vld [vmem:[%s9305_s5 + $0x98] sm:$0xff]   ;;  %v7001_v52 = vld [vmem:[%s9305_s5 + $0x70] sm:$0xff]  }
 0x38f   : > { %6421 = vmatprep.subr.bf16.mxu0 %v7140_v1  ;;  %6501 = vmatprep.subr.bf16.mxu1 %v7140_v1 }
 0x392   : > { %6422 = vmatpush3.bf16.msra.mxu0 %v8794_v57  ;;  %6502 = vmatpush3.bf16.msra.mxu1 %v8797_v58  ;;  %v7002_v58 = vld [vmem:[%s9305_s5 + $0xa0] sm:$0xff]  }
 0x393   : > { %6427 = vmatprep.subr.bf16.mxu0 %v7140_v1  ;;  %6507 = vmatprep.subr.bf16.mxu1 %v7140_v1 }
 0x395   : > { %6424 = vmatmul.mubr.msk.bf16.vlgmr.msra.gmra.mrb[20].mxu0 %vm2617_vm3, %v8899_v38  ;;  %6504 = vmatmul.mubr.msk.bf16.vlgmr.msra.gmra.mrb[20].mxu1 %vm2617_vm3, %v8899_v38 }
 0x396   : > { %6428 = vmatpush3.bf16.msra.mxu0 %v8805_v10  ;;  %6508 = vmatpush3.bf16.msra.mxu1 %v8810_v11  ;;  %v7003_v11 = vld [vmem:[%s9305_s5 + $0xa8] sm:$0xff]  }
 0x397   : > { %6429 = vmatprep.subr.bf16.mxu0 %v7140_v1  ;;  %6509 = vmatprep.subr.bf16.mxu1 %v7140_v1 }
 0x398   : > { %6439 = vmatprep.mubr.msk.bf16.mxu0 %vm7141_vm0, %v7140_v1  ;;  %6519 = vmatprep.mubr.msk.bf16.mxu1 %vm7141_vm0, %v7140_v1 }
 0x39a   : > { %6430 = vmatpush3.bf16.msra.mxu0 %v8825_v43  ;;  %6510 = vmatpush3.bf16.msra.mxu1 %v8830_v5  ;;  %v7005_v43 = vld [vmem:[%s9305_s5 + $0xb8] sm:$0xff]   ;;  %v7006_v5 = vld [vmem:[%s9305_s5 + $0xc0] sm:$0xff]  }
 0x39b   : > { %6431 = vmatprep.subr.bf16.mxu0 %v7140_v1  ;;  %6511 = vmatprep.subr.bf16.mxu1 %v7140_v1 }
 0x39e   : > { %6432 = vmatpush3.bf16.msra.mxu0 %v9326_v0  ;;  %6512 = vmatpush3.bf16.msra.mxu1 %v9327_v2  ;;  %v7013_v0 = vld [vmem:[%s9307_s7 + $0x30] sm:$0xff]   ;;  %v7014_v2 = vld [vmem:[%s9307_s7 + $0x38] ss:$0 sps:$4 sm:$0xff]  }
 0x39f   : > { %6433 = vmatprep.subr.bf16.mxu0 %v7140_v1  ;;  %6513 = vmatprep.subr.bf16.mxu1 %v7140_v1 }
 0x3a2   : > { %6434 = vmatpush3.bf16.msra.mxu0 %v9328_v3  ;;  %6514 = vmatpush3.bf16.msra.mxu1 %v9329_v4  ;;  %v4401_v3 = vsel %vm4399_vm5, %v7014_v2, 0  ;;  %v7015_v4 = vld [vmem:[%s9309_s9] sm:$0xff]  }
 0x3a3   : > { %6435 = vmatprep.subr.bf16.mxu0 %v7140_v1  ;;  %6515 = vmatprep.subr.bf16.mxu1 %v7140_v1 }
 0x3a6   : > { %6436 = vmatpush3.bf16.msra.mxu0 %v8871_v56  ;;  %6516 = vmatpush3.bf16.msra.mxu1 %v8876_v8  ;;  %v7010_v56 = vld [vmem:[%s9307_s7 + $0x18] sm:$0xff]   ;;  %v7011_v8 = vld [vmem:[%s9307_s7 + $0x20] sm:$0xff]  }
 0x3a7   : > { %6437 = vmatprep.subr.bf16.mxu0 %v7140_v1  ;;  %6517 = vmatprep.subr.bf16.mxu1 %v7140_v1 }
 0x3aa   : > { %6438 = vmatpush3.bf16.msra.mxu0 %v8891_v53  ;;  %6518 = vmatpush3.bf16.msra.mxu1 %v8894_v39  ;;  %v7007_v39 = vld [vmem:[%s9307_s7] sm:$0xff]   ;;  %v7008_v53 = vld [vmem:[%s9307_s7 + $0x8] sm:$0xff]  }
 0x3ab   : > { %6537 = vmatprep.subr.bf16.mxu1 %v7140_v1  ;;  %6523 = vmatprep.subr.bf16.mxu0 %v7140_v1 }
 0x3ad   : > { %6440 = vmatmul.mubr.msk.bf16.vlgmr.msra.gmra.mrb[20].mxu0 %vm2617_vm3, %v3640_v27  ;;  %6520 = vmatmul.mubr.msk.bf16.vlgmr.msra.gmra.mrb[20].mxu1 %vm2617_vm3, %v3640_v27  ;;  %v7018_v27 = vld [vmem:[%s9309_s9 + $0x18] sm:$0xff]  }
 0x3ae   : > { %6538 = vmatpush3.bf16.msra.mxu1 %v6982_v26  ;;  %6524 = vmatpush3.bf16.msra.mxu0 %v6983_v25  ;;  %v7016_v26 = vld [vmem:[%s9309_s9 + $0x8] sm:$0xff]   ;;  %v7017_v25 = vld [vmem:[%s9309_s9 + $0x10] sm:$0xff]  }
 0x3af   : > { %6539 = vmatprep.subr.bf16.mxu1 %v7140_v1  ;;  %6525 = vmatprep.subr.bf16.mxu0 %v7140_v1 }
 0x3b0   : > { %6547 = vmatprep.mubr.msk.bf16.mxu1 %vm7141_vm0, %v7140_v1  ;;  %6533 = vmatprep.mubr.msk.bf16.mxu0 %vm7141_vm0, %v7140_v1 }
 0x3b2   : > { %6540 = vmatpush3.bf16.msra.mxu1 %v6984_v29  ;;  %6526 = vmatpush3.bf16.msra.mxu0 %v6985_v30 }
 0x3b3   : > { %6541 = vmatprep.subr.bf16.mxu1 %v7140_v1  ;;  %6527 = vmatprep.subr.bf16.mxu0 %v7140_v1 }
 0x3b6   : > { %6542 = vmatpush3.bf16.msra.mxu1 %v6986_v31  ;;  %6528 = vmatpush3.bf16.msra.mxu0 %v6987_v34 }
 0x3b7   : > { %6543 = vmatprep.subr.bf16.mxu1 %v7140_v1  ;;  %6529 = vmatprep.subr.bf16.mxu0 %v7140_v1 }
 0x3ba   : > { %6544 = vmatpush3.bf16.msra.mxu1 %v6988_v35  ;;  %6530 = vmatpush3.bf16.msra.mxu0 %v6989_v59 }
 0x3bb   : > { %6545 = vmatprep.subr.bf16.mxu1 %v7140_v1  ;;  %6531 = vmatprep.subr.bf16.mxu0 %v7140_v1 }
 0x3be   : > { %6546 = vmatpush3.bf16.msra.mxu1 %v6990_v60  ;;  %6532 = vmatpush3.bf16.msra.mxu0 %v6991_v61 }
 0x3bf   : > { %6565 = vmatprep.subr.bf16.mxu1 %v7140_v1  ;;  %6551 = vmatprep.subr.bf16.mxu0 %v7140_v1 }
 0x408   : > { %v3027_v62 = vpop.f32.mrb[16].mxu0  ;;  %v3470_v63 = vpop.f32.mrb[16].mxu1 }
 0x409   : > { %v3888_v28 = vmax.f32 %v3027_v62, %v3470_v63  ;;  %v6281_v40 = vpop.f32.mrb[17].mxu0  ;;  %v6361_v54 = vpop.f32.mrb[17].mxu1 }
 0x40a   : > { %v3030_v12 = vpop.f32.mrb[18].mxu0  ;;  %v3473_v6 = vpop.f32.mrb[18].mxu1 }
 0x40b   : > { %v6282_v7 = vpop.f32.mrb[19].mxu0  ;;  %v6362_v13 = vpop.f32.mrb[19].mxu1 }
 0x480   : > { %v3678_v14 = vpop.f32.mrb[20].mxu0  ;;  %v3881_v15 = vpop.f32.mrb[20].mxu1 }
 0x481   : > { %v3889_v16 = vmax.f32 %v3678_v14, %v3881_v15  ;;  %v6441_v17 = vpop.f32.mrb[21].mxu0  ;;  %v6521_v18 = vpop.f32.mrb[21].mxu1 }
 0x482   : > { %v3681_v20 = vpop.f32.mrb[22].mxu0  ;;  %v3884_v21 = vpop.f32.mrb[22].mxu1  ;;  %v4330_v17 = vld [vmem:[%s9306_s6] sm:$0x1] }
 0x483   : > { %v3890_v22 = vmax.f32 %v3888_v28, %v3889_v16  ;;  %v6442_v23 = vpop.f32.mrb[23].mxu0  ;;  %v6522_v24 = vpop.f32.mrb[23].mxu1 }
 0x485   : > { %v3898_v32 = vadd.f32 %v5006_v19, %v3890_v22 }
 0x487   : > { %v3899_v36 = vmax.f32 %v3898_v32, 0.0  ;;  %v7019_v32 = vld [vmem:[%s9309_s9 + $0x20] sm:$0xff]  }
 0x489   : > { %v3900_v41 = vpack.c.bf16 %v3899_v36, %v3899_v36  ;;  %v7020_v36 = vld [vmem:[%s9309_s9 + $0x28] ss:$0 sps:$4 sm:$0x33]  }
 0x48b   : > { %6548 = vmatmul.mubr.msk.bf16.vlgmr.msra.gmra.mrb[24].mxu1 %vm3955_vm4, %v3900_v41  ;;  %v3923_v44 = vshrl.u32 %v3900_v41, 16  ;;  %v4083_v10 = vrot.slane %v3900_v41, 1  ;;  %v4255_v38 = vrot.slane %v3900_v41, 2  ;;  %v4349_v41 = vld [vmem:[%s9308_s8] sm:$0x1] }
 0x48c   : > { %6566 = vmatpush3.bf16.msra.mxu1 %v6992_v37  ;;  %6575 = vmatprep.mubr.msk.bf16.mxu1 %vm7141_vm0, %v7140_v1  ;;  %v4494_v37 = vsel %vm2621_vm2, %v7020_v36, 0 }
 0x48d   : > { %6534 = vmatmul.mubr.msk.bf16.vlgmr.msra.gmra.mrb[24].mxu0 %vm3955_vm4, %v3923_v44  ;;  %6567 = vmatprep.subr.bf16.mxu1 %v7140_v1  ;;  %v4169_v57 = vrot.slane %v3923_v44, 1 }
 0x48e   : > { %6552 = vmatpush3.bf16.msra.mxu0 %v6993_v42  ;;  %6561 = vmatprep.mubr.msk.bf16.mxu0 %vm7141_vm0, %v7140_v1 }
 0x48f   : > { %6553 = vmatprep.subr.bf16.mxu0 %v7140_v1 }
 0x490   : > { %6568 = vmatpush3.bf16.msra.mxu1 %v6994_v45 }
 0x491   : > { %6569 = vmatprep.subr.bf16.mxu1 %v7140_v1 }
 0x492   : > { %6554 = vmatpush3.bf16.msra.mxu0 %v6995_v46 }
 0x493   : > { %6555 = vmatprep.subr.bf16.mxu0 %v7140_v1 }
 0x494   : > { %6570 = vmatpush3.bf16.msra.mxu1 %v6996_v47 }
 0x495   : > { %6571 = vmatprep.subr.bf16.mxu1 %v7140_v1 }
 0x496   : > { %6556 = vmatpush3.bf16.msra.mxu0 %v6997_v48 }
 0x497   : > { %6557 = vmatprep.subr.bf16.mxu0 %v7140_v1 }
 0x498   : > { %6572 = vmatpush3.bf16.msra.mxu1 %v6998_v49 }
 0x499   : > { %6573 = vmatprep.subr.bf16.mxu1 %v7140_v1 }
 0x49a   : > { %6558 = vmatpush3.bf16.msra.mxu0 %v6999_v50 }
 0x49b   : > { %6559 = vmatprep.subr.bf16.mxu0 %v7140_v1 }
 0x49c   : > { %6574 = vmatpush3.bf16.msra.mxu1 %v7000_v51 }
 0x49d   : > { %6593 = vmatprep.subr.bf16.mxu1 %v7140_v1 }
 0x49e   : > { %6560 = vmatpush3.bf16.msra.mxu0 %v7001_v52 }
 0x49f   : > { %6576 = vmatmul.mubr.msk.bf16.vlgmr.msra.gmra.mrb[28].mxu1 %vm3955_vm4, %v4169_v57  ;;  %6579 = vmatprep.subr.bf16.mxu0 %v7140_v1 }
 0x4a0   : > { %6609 = vmatprep.mubr.msk.bf16.mxu1 %vm7141_vm0, %v7140_v1  ;;  %6594 = vmatpush3.bf16.msra.mxu1 %v7007_v39 }
 0x4a1   : > { %6562 = vmatmul.mubr.msk.bf16.vlgmr.msra.gmra.mrb[28].mxu0 %vm3955_vm4, %v4083_v10  ;;  %6595 = vmatprep.subr.bf16.mxu1 %v7140_v1 }
 0x4a2   : > { %6580 = vmatpush3.bf16.msra.mxu0 %v7002_v58  ;;  %6589 = vmatprep.mubr.msk.bf16.mxu0 %vm7141_vm0, %v7140_v1 }
 0x4a3   : > { %6581 = vmatprep.subr.bf16.mxu0 %v7140_v1 }
 0x4a4   : > { %6596 = vmatpush3.bf16.msra.mxu1 %v7008_v53 }
 0x4a5   : > { %6597 = vmatprep.subr.bf16.mxu1 %v7140_v1 }
 0x4a6   : > { %6582 = vmatpush3.bf16.msra.mxu0 %v7003_v11 }
 0x4a7   : > { %6583 = vmatprep.subr.bf16.mxu0 %v7140_v1 }
 0x4a8   : > { %6598 = vmatpush3.bf16.msra.mxu1 %v7009_v55 }
 0x4a9   : > { %6599 = vmatprep.subr.bf16.mxu1 %v7140_v1 }
 0x4aa   : > { %6584 = vmatpush3.bf16.msra.mxu0 %v7004_v33 }
 0x4ab   : > { %6585 = vmatprep.subr.bf16.mxu0 %v7140_v1 }
 0x4ac   : > { %6600 = vmatpush3.bf16.msra.mxu1 %v7010_v56 }
 0x4ad   : > { %6601 = vmatprep.subr.bf16.mxu1 %v7140_v1 }
 0x4ae   : > { %6586 = vmatpush3.bf16.msra.mxu0 %v7005_v43 }
 0x4af   : > { %6587 = vmatprep.subr.bf16.mxu0 %v7140_v1 }
 0x4b0   : > { %6602 = vmatpush3.bf16.msra.mxu1 %v7011_v8 }
 0x4b1   : > { %6603 = vmatprep.subr.bf16.mxu1 %v7140_v1 }
 0x4b2   : > { %6588 = vmatpush3.bf16.msra.mxu0 %v7006_v5 }
 0x4b3   : > { %6613 = vmatprep.subr.bf16.mxu0 %v7140_v1 }
 0x4b4   : > { %6604 = vmatpush3.bf16.msra.mxu1 %v7012_v9 }
 0x4b5   : > { %6590 = vmatmul.mubr.msk.bf16.vlgmr.msra.gmra.mrb[32].mxu0 %vm3955_vm4, %v4255_v38  ;;  %6605 = vmatprep.subr.bf16.mxu1 %v7140_v1 }
 0x4b6   : > { %6625 = vmatprep.mubr.msk.bf16.mxu0 %vm7141_vm0, %v7140_v1  ;;  %6614 = vmatpush3.bf16.msra.mxu0 %v7015_v4 }
 0x4b7   : > { %6615 = vmatprep.subr.bf16.mxu0 %v7140_v1 }
 0x4b8   : > { %6606 = vmatpush3.bf16.msra.mxu1 %v7013_v0 }
 0x4b9   : > { %6607 = vmatprep.subr.bf16.mxu1 %v7140_v1 }
 0x4ba   : > { %6616 = vmatpush3.bf16.msra.mxu0 %v7016_v26 }
 0x4bb   : > { %6617 = vmatprep.subr.bf16.mxu0 %v7140_v1 }
 0x4bc   : > { %6608 = vmatpush3.bf16.msra.mxu1 %v4401_v3 }
 0x4be   : > { %6618 = vmatpush3.bf16.msra.mxu0 %v7017_v25 }
 0x4bf   : > { %6619 = vmatprep.subr.bf16.mxu0 %v7140_v1 }
 0x4c2   : > { %6620 = vmatpush3.bf16.msra.mxu0 %v7018_v27 }
 0x4c3   : > { %6621 = vmatprep.subr.bf16.mxu0 %v7140_v1 }
 0x4c6   : > { %6622 = vmatpush3.bf16.msra.mxu0 %v7019_v32 }
 0x4c7   : > { %6623 = vmatprep.subr.bf16.mxu0 %v7140_v1  ;;  %v4456_v1 = vld [vmem:[%s9310_s10] sm:$0x1] }
 0x4ca   : > { %6624 = vmatpush3.bf16.msra.mxu0 %v4494_v37 }
 0x55e   : > { %v4065_v29 = vpop.f32.mrb[24].mxu1 }
 0x55f   : > { %v6549_v30 = vpop.f32.mrb[25].mxu1 }
 0x560   : > { %v3993_v31 = vpop.f32.mrb[24].mxu0  ;;  %v4068_v34 = vpop.f32.mrb[26].mxu1 }
 0x561   : > { %v4066_v35 = vadd.f32 %v4065_v29, %v3993_v31  ;;  %v6535_v59 = vpop.f32.mrb[25].mxu0  ;;  %v6550_v60 = vpop.f32.mrb[27].mxu1 }
 0x562   : > { %v3996_v61 = vpop.f32.mrb[26].mxu0 }
 0x563   : > { %v6536_v62 = vpop.f32.mrb[27].mxu0 }
 0x572   : > { %v4237_v63 = vpop.f32.mrb[28].mxu1 }
 0x573   : > { %v6577_v28 = vpop.f32.mrb[29].mxu1 }
 0x574   : > { %v4151_v40 = vpop.f32.mrb[28].mxu0  ;;  %v4240_v54 = vpop.f32.mrb[30].mxu1 }
 0x575   : > { %v4157_v12 = vadd.f32 %v4151_v40, %v4066_v35  ;;  %v6563_v6 = vpop.f32.mrb[29].mxu0  ;;  %v6578_v7 = vpop.f32.mrb[31].mxu1 }
 0x576   : > { %v4154_v13 = vpop.f32.mrb[30].mxu0 }
 0x577   : > { %v6564_v14 = vpop.f32.mrb[31].mxu0  ;;  %v4243_v15 = vadd.f32 %v4237_v63, %v4157_v12 }
 0x588   : > { %v4323_v16 = vpop.f32.mrb[32].mxu0 }
 0x589   : > { %v4329_v18 = vadd.f32 %v4323_v16, %v4243_v15  ;;  %v6591_v19 = vpop.f32.mrb[33].mxu0 }
 0x58a   : > { %v4326_v20 = vpop.f32.mrb[34].mxu0 }
 0x58b   : > { %v4331_v21 = vadd.f32 %v4330_v17, %v4329_v18  ;;  %v6592_v22 = vpop.f32.mrb[35].mxu0 }
 0x58d   : > { %v4332_v23 = vmax.f32 %v4331_v21, 0.0 }
 0x58f   : > { %v4333_v24 = vpack.c.bf16 %v4332_v23, %v4332_v23 }
 0x591   : > { %6610 = vmatmul.mubr.msk.bf16.vlgmr.msra.gmra.mrb[32].mxu1 %vm4395_vm6, %v4333_v24 }
 0x664   : > { %v4437_v42 = vpop.f32.mrb[32].mxu1 }
 0x665   : > { %v4438_v44 = vadd.f32 %v4437_v42, %v4349_v41  ;;  %v6611_v45 = vpop.f32.mrb[33].mxu1 }
 0x666   : > { %v4440_v46 = vpop.f32.mrb[34].mxu1 }
 0x667   : > { %v4443_v47 = vmax.f32 %v4438_v44, 0.0  ;;  %v6612_v48 = vpop.f32.mrb[35].mxu1 }
 0x669   : > { %v4444_v49 = vpack.c.bf16 %v4443_v47, %v4443_v47 }
 0x66b   : > { %6626 = vmatmul.mubr.msk.bf16.vlgmr.msra.gmra.mrb[36].mxu0 %vm2617_vm3, %v4444_v49 }
 0x73e   : > { %v4530_v50 = vpop.f32.mrb[36].mxu0 }
 0x73f   : > { %v4531_v51 = vadd.f32 %v4530_v50, %v4456_v1  ;;  %v6627_v52 = vpop.f32.mrb[37].mxu0 }
 0x740   : > { %v4533_v57 = vpop.f32.mrb[38].mxu0 }
 0x741   : > { %v6628_v58 = vpop.f32.mrb[39].mxu0  ;;  %4537 = vst.msk [vmem:[%s378_s25] sm:$0x1] %vm4536_vm7, %v4531_v51 }
 0x742   : > { %7089 = shalt.err (!%p7086_p3)
}
 0x743   : > { %s7090_s14 = scalar_lea.hbm %s9258_s30, 16  ;;  %s7094_s12 = scalar_lea.hbm %s9311_s11, 32 }
 0x744   : > { %p7091_p4 = scmp.ne.s32.totalorder %s9258_s30, %s7090_s14  ;;  %p7095_p9 = scmp.lt.u32.totalorder %s9258_s30, %s9311_s11 }
 0x745   : > { %p7096_p10 = scmp.lt.u32.totalorder %s7094_s12, %s7090_s14  ;;  %p7098_p12 = scmp.lt.u32.totalorder %s7090_s14, %s9258_s30 }
 0x746   : > { %p7092_p7 = pnand %p7091_p4, %p7241_p5 }
 0x747   : > { %p7097_p11 = por %p7096_p10, %p7095_p9 }
 0x748   : > { %p7093_p8 = pneg %p7092_p7 }
 0x749   : > { %p7099_p13 = por %p7098_p12, %p7097_p11 }
 0x74b   : > { %p7100_p0 = pnand %p7099_p13, %p7093_p8 }
 0x74d   : > { %7103 = shalt.err (!%p7100_p0)
}
 0x74e   : > { %6821 = dma.vmem_to_hbm [thread:$0]  (%p7241_p5), %s9260_s22, 16, %s9258_s30, %s4539_s21  }
 0x74f PF: > { %p6827_p1 = scmp.ge.s32.totalorder %s7138_s20, 2  ;;  %s4563_s13 = sand.u32 1, %s7126_s17  }
 0x750   : > { %s4564_s29 = scalar_lea.sflag [#allocation3], %s4563_s13 }
 0x751   : > { %p6824_p2 = pnand %p6827_p1, %p7245_p6 }
 0x753   : > { %7121 = dma.done.wait (!%p6824_p2), %s4564_s29, 16  }
 0x754   : > { %7123 = vsyncadd (!%p6824_p2), %s4564_s29, 4294967280  ;;  %p21_p3 = scmp.ge.s32.totalorder %s7228_s23, 4   ;;  %s9330_s17 = smov %s7130_s18 }
 0x755   : > { %s9331_s18 = smov %s7134_s19  ;;  %s9332_s19 = smov %s7239_s26 }
 0x756   : > { %s9333_s20 = smov %s7228_s23  ;;  %23 = sbr.rel (!%p21_p3) target bundleno = 3 (0x3), region = 124 }
 0x75d   :  { %4568 = vsyncpa [#allocation3], 1 }
 0x75e   :  { %4570 = vsyncpa [#allocation3 + $0x1], 1 }

</bundles_post_ra>
